<compile_context>
chip_gen: v7x
topology: tpu7x:2x2x1
jax: 0.10.0
libtpu: 0.0.40
codegen_flags: <defaults>
</compile_context>

<pallas_src>
import functools

import jax
import jax.numpy as jnp
from jax.experimental import pallas as pl
from jax.experimental.pallas import tpu as pltpu

A_CHANNELS = (4, 8)           # a_channels
R_CHANNELS = (4, 8)           # r_channels (defaults to a_channels in the module)


def _pad8(x):
    return ((x + 7) // 8) * 8


# ----------------------------------------------------------------------------- #
# Fused PredNet kernel (whole network, whole time loop)
# ----------------------------------------------------------------------------- #
@functools.lru_cache(maxsize=None)
def _build_prednet_call(B, T, H, W, a_ch, r_ch):
    n = len(a_ch)
    r = list(r_ch) + [0]
    Hs = [H // (2 ** l) for l in range(n)]
    Ws = [W // (2 ** l) for l in range(n)]
    Ns = [B * Hs[l] * Ws[l] for l in range(n)]
    a0, N0 = a_ch[0], Ns[0]

    Ce = [2 * a_ch[l] for l in range(n)]                       # error block channels
    Ch = [_pad8(r[l]) for l in range(n)]                       # hidden block (padded)
    Cu = [Ch[l + 1] if l < n - 1 else 0 for l in range(n)]     # upsample block channels
    Koff_u = [9 * Ce[l] for l in range(n)]
    Koff_h = [9 * (Ce[l] + Cu[l]) for l in range(n)]
    Ktot = [9 * (Ce[l] + Cu[l] + Ch[l]) for l in range(n)]
    denom = [float(a_ch[l] * Hs[l] * Ws[l]) for l in range(n)]

    def kernel(*refs):
        it = iter(refs)
        A_ref = next(it)                                       # (1, a0, N0) current frame
        mask_r = [next(it) for _ in range(n)]                  # (9, N_l) f32 edge masks
        up_r = [None] + [next(it) for _ in range(n - 1)]       # (N_l, N_{l-1}) bf16
        dn_r = [next(it) for _ in range(n - 1)]                # (N_l, N_{l+1}) bf16
        cw_r, cb_r, pw_r, pb_r = [], [], [], []
        for _ in range(n):
            cw_r.append(next(it)); cb_r.append(next(it))
            pw_r.append(next(it)); pb_r.append(next(it))
        uw_r, ub_r = [], []
        for _ in range(n - 1):
            uw_r.append(next(it)); ub_r.append(next(it))
        pred_ref = next(it); loss_ref = next(it); eval_ref = next(it)
        h_s, c_s, p_s = [], [], []
        for _ in range(n):
            h_s.append(next(it)); c_s.append(next(it)); p_s.append(next(it))

        t = pl.program_id(0)
        nT = pl.num_programs(0)
        notfirst = (t > 0).astype(jnp.float32)                 # Ahat is exactly 0 at t==0

        @pl.when(t == 0)
        def _init():
            for l in range(n):
                h_s[l][...] = jnp.zeros_like(h_s[l])
                c_s[l][...] = jnp.zeros_like(c_s[l])
            loss_ref[...] = jnp.zeros_like(loss_ref)

        masks = [mask_r[l][...] for l in range(n)]             # small, kept resident

        def fill_block(l, row_off, v):
            """Write the 9-tap im2col of v (C, N_l) into patch rows [row_off, +9*C)."""
            C, N = v.shape
            for k in range(9):
                ky, kx = k // 3, k % 3
                off = (ky - 1) * Ws[l] + (kx - 1)
                sh = v if off == 0 else pltpu.roll(v, shift=(-off) % N, axis=1)
                if not (ky == 1 and kx == 1):                  # zero out-of-image taps
                    sh = sh * masks[l][k:k + 1, :]
                p_s[l][row_off + k * C: row_off + (k + 1) * C, :] = (
                    sh.astype(jnp.bfloat16))

        def sse_per_batch(diff, l):
            """diff: (C, N_l) -> (1, B) per-batch sum of squared error."""
            HW = Hs[l] * Ws[l]
            d2 = diff * diff
            cols = []
            for b in range(B):
                blk = d2[:, b * HW:(b + 1) * HW]
                s = jnp.sum(blk, axis=1, keepdims=True)        # lane reduce
                cols.append(jnp.sum(s, axis=0, keepdims=True))  # sublane reduce
            return jnp.concatenate(cols, axis=1)

        # ---- phase 1: im2col(h_prev) into the h-block; Ahat_l = conv_l(h_prev) --------
        # (conv_l is deferred from the previous step so its im2col is shared with the cell)
        ahat = [None] * n
        for l in range(n):
            fill_block(l, Koff_h[l], h_s[l][...])
            pre = jnp.dot(pw_r[l][...],
                          p_s[l][Koff_h[l]:Koff_h[l] + 9 * Ch[l], :],
                          preferred_element_type=jnp.float32) + pb_r[l][...]
            act = jnp.clip(pre, 0.0, 1.0) if l == 0 else jnp.maximum(pre, 0.0)
            ahat[l] = act * notfirst

        # ---- phase 2: down_to_up (errors, update_a + maxpool, per-batch SSE) ----------
        sse = [None] * n
        A = A_ref[0]                                           # (a0, N0) f32
        for l in range(n):
            diff = ahat[l] - A
            sse[l] = sse_per_batch(diff, l)
            E = jnp.maximum(jnp.concatenate([diff, -diff], axis=0), 0.0)
            fill_block(l, 0, E)                                # shared by update_a & cell
            if l < n - 1:
                cu = jnp.dot(uw_r[l][...], p_s[l][0:9 * Ce[l], :],
                             preferred_element_type=jnp.float32) + ub_r[l][...]
                # 2x2 / stride-2 maxpool: max of 4 shifted views + 0/1-matmul gather
                N = Ns[l]
                m = cu
                for s_off in (1, Ws[l], Ws[l] + 1):
                    m = jnp.maximum(m, pltpu.roll(cu, shift=(-s_off) % N, axis=1))
                A = jnp.dot(m.astype(jnp.bfloat16), dn_r[l][...],
                            preferred_element_type=jnp.float32)

        # reference: total_loss += MSE(frame_prediction, gt) for every loop step t < T-1
        loss_ref[...] += sse[0] * (notfirst / denom[0])

        # ---- phase 3: up_to_down (ConvLSTM cells); skipped on the final (eval) step ----
        @pl.when(t < nT - 1)
        def _cells():
            h_new = [None] * n
            for l in reversed(range(n)):
                if l < n - 1:
                    up = jnp.dot(h_new[l + 1].astype(jnp.bfloat16), up_r[l + 1][...],
                                 preferred_element_type=jnp.float32)
                    fill_block(l, Koff_u[l], up)
                gates = jnp.dot(cw_r[l][...], p_s[l][...],
                                preferred_element_type=jnp.float32) + cb_r[l][...]
                hp = Ch[l]
                i_g = jax.nn.sigmoid(gates[0 * hp:1 * hp, :])
                f_g = jax.nn.sigmoid(gates[1 * hp:2 * hp, :])
                o_g = jax.nn.sigmoid(gates[2 * hp:3 * hp, :])
                g_g = jnp.tanh(gates[3 * hp:4 * hp, :])
                c_n = f_g * c_s[l][...] + i_g * g_g
                h_n = o_g * jnp.tanh(c_n)
                h_s[l][...] = h_n
                c_s[l][...] = c_n
                h_new[l] = h_n

        # ---- final step: frame prediction + per-layer eval MSE --------------------------
        @pl.when(t == nT - 1)
        def _final():
            pred_ref[...] = ahat[0]
            eval_ref[...] = jnp.concatenate(
                [sse[l] * (1.0 / denom[l]) for l in range(n)], axis=0)

    # ---------------- specs ----------------
    def _const(shape):
        zeros = (0,) * len(shape)
        return pl.BlockSpec(shape, lambda t, _z=zeros: _z)

    in_specs = [pl.BlockSpec((1, a0, N0), lambda t: (t, 0, 0))]     # frames
    for l in range(n):
        in_specs.append(_const((9, Ns[l])))                         # edge masks
    for l in range(1, n):
        in_specs.append(_const((Ns[l], Ns[l - 1])))                  # upsample matrix
    for l in range(n - 1):
        in_specs.append(_const((Ns[l], Ns[l + 1])))                  # downsample selector
    for l in range(n):
        in_specs += [_const((4 * Ch[l], Ktot[l])), _const((4 * Ch[l], 1)),
                     _const((a_ch[l], 9 * Ch[l])), _const((a_ch[l], 1))]
    for l in range(n - 1):
        in_specs += [_const((a_ch[l + 1], 9 * Ce[l])), _const((a_ch[l + 1], 1))]

    out_shape = (jax.ShapeDtypeStruct((a0, N0), jnp.float32),        # frame prediction
                 jax.ShapeDtypeStruct((1, B), jnp.float32),          # total_loss
                 jax.ShapeDtypeStruct((n, B), jnp.float32))          # eval_index
    out_specs = (_const((a0, N0)), _const((1, B)), _const((n, B)))

    scratch = []
    for l in range(n):
        scratch += [pltpu.VMEM((Ch[l], Ns[l]), jnp.float32),         # h   (f32 state)
                    pltpu.VMEM((Ch[l], Ns[l]), jnp.float32),         # c   (f32 state)
                    pltpu.VMEM((Ktot[l], Ns[l]), jnp.bfloat16)]      # im2col patch

    return pl.pallas_call(
        kernel,
        out_shape=out_shape,
        grid=(T,),
        in_specs=in_specs,
        out_specs=out_specs,
        scratch_shapes=scratch,
        compiler_params=pltpu.CompilerParams(
            dimension_semantics=("arbitrary",)),                     # recurrent time axis
    )


# ----------------------------------------------------------------------------- #
# Host-side constants (masks / selector matrices) and weight packing
# ----------------------------------------------------------------------------- #
def _tap_masks(B, H, W):
    """(9, B*H*W) 0/1 masks zeroing out-of-image (and cross-batch) im2col taps."""
    N = B * H * W
    idx = jnp.arange(N, dtype=jnp.int32)
    x = idx % W
    y = (idx // W) % H
    rows = []
    for ky in range(3):
        for kx in range(3):
            m = jnp.ones((N,), jnp.bool_)
            if ky == 0:
                m = m & (y >= 1)
            if ky == 2:
                m = m & (y <= H - 2)
            if kx == 0:
                m = m & (x >= 1)
            if kx == 2:
                m = m & (x <= W - 2)
            rows.append(m)
    return jnp.stack(rows, 0).astype(jnp.float32)


def _upsample_matrix(B, Hs, Ws):
    """(B*Hs*Ws, B*(2Hs)*(2Ws)) nearest-neighbour expansion (batch block-diagonal)."""
    H, W = 2 * Hs, 2 * Ws
    i = jnp.arange(B * H * W, dtype=jnp.int32)
    b = i // (H * W)
    rem = i % (H * W)
    src = b * (Hs * Ws) + (rem // W // 2) * Ws + (rem % W) // 2
    j = jnp.arange(B * Hs * Ws, dtype=jnp.int32)
    return (j[:, None] == src[None, :]).astype(jnp.bfloat16)


def _downsample_matrix(B, H, W):
    """(B*H*W, B*(H//2)*(W//2)) selector of the top-left anchor of each 2x2 block."""
    Hs, Ws = H // 2, W // 2
    k = jnp.arange(B * Hs * Ws, dtype=jnp.int32)
    b = k // (Hs * Ws)
    rem = k % (Hs * Ws)
    anchor = b * (H * W) + (rem // Ws) * 2 * W + (rem % Ws) * 2
    i = jnp.arange(B * H * W, dtype=jnp.int32)
    return (i[:, None] == anchor[None, :]).astype(jnp.bfloat16)


def _tap_major(w):
    """(3,3,Cin,Cout) HWIO -> (Cout, 9, Cin), tap index = ky*3+kx."""
    cin, cout = w.shape[2], w.shape[3]
    return jnp.transpose(w, (3, 0, 1, 2)).reshape(cout, 9, cin)


def _pack_update_a(w, b):
    wt = _tap_major(w)                                       # (a_next, 9, 2a)
    cout = wt.shape[0]
    return (wt.reshape(cout, -1).astype(jnp.bfloat16),
            b.reshape(cout, 1).astype(jnp.float32))


def _pack_conv(w, b, ch_pad):
    wt = _tap_major(w)                                       # (a, 9, r)
    a_l, _, r_l = wt.shape
    wt = jnp.pad(wt, ((0, 0), (0, 0), (0, ch_pad - r_l)))
    return (wt.reshape(a_l, 9 * ch_pad).astype(jnp.bfloat16),
            b.reshape(a_l, 1).astype(jnp.float32))


def _pack_cell(w, b, ce, cu, cu_pad, hid, hid_pad):
    """Cell gate conv -> (4*hid_pad, K) with source-major K blocks [E | up | h]."""
    wt = _tap_major(w)                                       # (4*hid, 9, ce+cu+hid)
    cout = wt.shape[0]
    parts = [wt[:, :, 0:ce].reshape(cout, 9 * ce)]
    if cu_pad > 0:
        wu = jnp.pad(wt[:, :, ce:ce + cu], ((0, 0), (0, 0), (0, cu_pad - cu)))
        parts.append(wu.reshape(cout, 9 * cu_pad))
    wh = jnp.pad(wt[:, :, ce + cu:], ((0, 0), (0, 0), (0, hid_pad - hid)))
    parts.append(wh.reshape(cout, 9 * hid_pad))
    wk = jnp.concatenate(parts, axis=1)                      # (4*hid, K)
    K = wk.shape[1]
    wk = wk.reshape(4, hid, K)
    wk = jnp.pad(wk, ((0, 0), (0, hid_pad - hid), (0, 0))).reshape(4 * hid_pad, K)
    bb = jnp.pad(b.reshape(4, hid), ((0, 0), (0, hid_pad - hid))).reshape(4 * hid_pad, 1)
    return wk.astype(jnp.bfloat16), bb.astype(jnp.float32)


# ----------------------------------------------------------------------------- #
# Parameter init (deterministic, synthetic)
# ----------------------------------------------------------------------------- #
def init_params(key, a_channels, r_channels):
    n = len(a_channels)
    r = list(r_channels) + [0]
    scale = 0.1
    params = {"cell": [], "conv": [], "update_a": []}
    keys = jax.random.split(key, 3 * n)
    ki = 0
    for l in range(n):
        cin = 2 * a_channels[l] + r[l + 1] + r[l]            # [E | up | h] input channels
        cout = 4 * r[l]                                      # gates i, f, o, g
        k1, k2 = jax.random.split(keys[ki]); ki += 1
        params["cell"].append(
            (scale * jax.random.normal(k1, (3, 3, cin, cout), jnp.float32),
             scale * jax.random.normal(k2, (cout,), jnp.float32)))
    for l in range(n):
        k1, k2 = jax.random.split(keys[ki]); ki += 1
        params["conv"].append(
            (scale * jax.random.normal(k1, (3, 3, r[l], a_channels[l]), jnp.float32),
             scale * jax.random.normal(k2, (a_channels[l],), jnp.float32)))
    for l in range(n - 1):
        k1, k2 = jax.random.split(keys[ki]); ki += 1
        params["update_a"].append(
            (scale * jax.random.normal(k1, (3, 3, 2 * a_channels[l], a_channels[l + 1]),
                                       jnp.float32),
             scale * jax.random.normal(k2, (a_channels[l + 1],), jnp.float32)))
    return params


# ----------------------------------------------------------------------------- #
# PredNet forward (round_mode='down_up_down', output_mode='error')
# ----------------------------------------------------------------------------- #
@jax.jit
def prednet_forward(x_btchw, params):
    a_ch, r_ch = A_CHANNELS, R_CHANNELS
    n = len(a_ch)
    r = list(r_ch) + [0]
    B, T, C0, H, W = x_btchw.shape
    Hs = [H // (2 ** l) for l in range(n)]
    Ws = [W // (2 ** l) for l in range(n)]
    N0 = B * H * W

    Ce = [2 * a_ch[l] for l in range(n)]
    Ch = [_pad8(r[l]) for l in range(n)]
    Cu = [Ch[l + 1] if l < n - 1 else 0 for l in range(n)]

    # (B,T,C,H,W) -> (T, C, B*H*W): channel-major, batch folded into the lane axis.
    x_flat = jnp.transpose(x_btchw.astype(jnp.float32), (1, 2, 0, 3, 4)).reshape(T, C0, N0)

    consts = [_tap_masks(B, Hs[l], Ws[l]) for l in range(n)]
    consts += [_upsample_matrix(B, Hs[l], Ws[l]) for l in range(1, n)]
    consts += [_downsample_matrix(B, Hs[l], Ws[l]) for l in range(n - 1)]

    weights = []
    for l in range(n):
        cw, cb = params["cell"][l]
        wk, bk = _pack_cell(cw, cb, Ce[l], r[l + 1], Cu[l], r[l], Ch[l])
        pw, pb = _pack_conv(*params["conv"][l], Ch[l])
        weights += [wk, bk, pw, pb]
    for l in range(n - 1):
        uw, ub = _pack_update_a(*params["update_a"][l])
        weights += [uw, ub]

    call = _build_prednet_call(B, T, H, W, a_ch, r_ch)
    pred_flat, loss, evals = call(x_flat, *consts, *weights)

    pred_nchw = jnp.transpose(pred_flat.reshape(a_ch[0], B, H, W), (1, 0, 2, 3))
    return pred_nchw, loss[0], tuple(evals[l] for l in range(n))


# ----------------------------------------------------------------------------- #
if __name__ == "__main__":
    B, T, H, W = 2, 4, 16, 16
    key = jax.random.PRNGKey(0)
    k_x, k_p = jax.random.split(key)
    x = jax.random.uniform(k_x, (B, T, A_CHANNELS[0], H, W), jnp.float32)
    params = init_params(k_p, A_CHANNELS, R_CHANNELS)

    pred, total_loss, eval_index = prednet_forward(x, params)
    jax.block_until_ready((pred, total_loss, eval_index))

    assert pred.shape == (B, A_CHANNELS[0], H, W)
    assert total_loss.shape == (B,)
    assert len(eval_index) == len(A_CHANNELS)
    print("KERNEL_OK")
</pallas_src>

<mosaic_0001>
module attributes {stable_mosaic.version = 11 : i64} {
  func.func @kernel(%arg0: i32, %arg1: memref<1x4x512xf32, #tpu.memory_space<vmem>>, %arg2: memref<9x512xf32, #tpu.memory_space<vmem>>, %arg3: memref<9x128xf32, #tpu.memory_space<vmem>>, %arg4: memref<128x512xbf16, #tpu.memory_space<vmem>>, %arg5: memref<512x128xbf16, #tpu.memory_space<vmem>>, %arg6: memref<32x216xbf16, #tpu.memory_space<vmem>>, %arg7: memref<32x1xf32, #tpu.memory_space<vmem>>, %arg8: memref<4x72xbf16, #tpu.memory_space<vmem>>, %arg9: memref<4x1xf32, #tpu.memory_space<vmem>>, %arg10: memref<32x216xbf16, #tpu.memory_space<vmem>>, %arg11: memref<32x1xf32, #tpu.memory_space<vmem>>, %arg12: memref<8x72xbf16, #tpu.memory_space<vmem>>, %arg13: memref<8x1xf32, #tpu.memory_space<vmem>>, %arg14: memref<8x72xbf16, #tpu.memory_space<vmem>>, %arg15: memref<8x1xf32, #tpu.memory_space<vmem>>, %arg16: memref<4x512xf32, #tpu.memory_space<vmem>>, %arg17: memref<1x2xf32, #tpu.memory_space<vmem>>, %arg18: memref<2x2xf32, #tpu.memory_space<vmem>>, %arg19: memref<8x512xf32, #tpu.memory_space<vmem>>, %arg20: memref<8x512xf32, #tpu.memory_space<vmem>>, %arg21: memref<216x512xbf16, #tpu.memory_space<vmem>>, %arg22: memref<8x128xf32, #tpu.memory_space<vmem>>, %arg23: memref<8x128xf32, #tpu.memory_space<vmem>>, %arg24: memref<216x128xbf16, #tpu.memory_space<vmem>>) attributes {dimension_semantics = [#tpu.dimension_semantics<arbitrary>], iteration_bounds = array<i64: 4>, scalar_prefetch = 0 : i64, scratch_operands = 6 : i64, tpu.core_type = #tpu.core_type<tc>, window_params = [{transform_indices = @transform_0, window_bounds = array<i64: 1, 4, 512>}, {pipeline_mode = #tpu.pipeline_mode<synchronous>, transform_indices = @transform_1, window_bounds = array<i64: 9, 512>}, {pipeline_mode = #tpu.pipeline_mode<synchronous>, transform_indices = @transform_2, window_bounds = array<i64: 9, 128>}, {pipeline_mode = #tpu.pipeline_mode<synchronous>, transform_indices = @transform_3, window_bounds = array<i64: 128, 512>}, {pipeline_mode = #tpu.pipeline_mode<synchronous>, transform_indices = @transform_4, window_bounds = array<i64: 512, 128>}, {pipeline_mode = #tpu.pipeline_mode<synchronous>, transform_indices = @transform_5, window_bounds = array<i64: 32, 216>}, {pipeline_mode = #tpu.pipeline_mode<synchronous>, transform_indices = @transform_6, window_bounds = array<i64: 32, 1>}, {pipeline_mode = #tpu.pipeline_mode<synchronous>, transform_indices = @transform_7, window_bounds = array<i64: 4, 72>}, {pipeline_mode = #tpu.pipeline_mode<synchronous>, transform_indices = @transform_8, window_bounds = array<i64: 4, 1>}, {pipeline_mode = #tpu.pipeline_mode<synchronous>, transform_indices = @transform_9, window_bounds = array<i64: 32, 216>}, {pipeline_mode = #tpu.pipeline_mode<synchronous>, transform_indices = @transform_10, window_bounds = array<i64: 32, 1>}, {pipeline_mode = #tpu.pipeline_mode<synchronous>, transform_indices = @transform_11, window_bounds = array<i64: 8, 72>}, {pipeline_mode = #tpu.pipeline_mode<synchronous>, transform_indices = @transform_12, window_bounds = array<i64: 8, 1>}, {pipeline_mode = #tpu.pipeline_mode<synchronous>, transform_indices = @transform_13, window_bounds = array<i64: 8, 72>}, {pipeline_mode = #tpu.pipeline_mode<synchronous>, transform_indices = @transform_14, window_bounds = array<i64: 8, 1>}, {pipeline_mode = #tpu.pipeline_mode<synchronous>, transform_indices = @transform_15, window_bounds = array<i64: 4, 512>}, {pipeline_mode = #tpu.pipeline_mode<synchronous>, transform_indices = @transform_16, window_bounds = array<i64: 1, 2>}, {pipeline_mode = #tpu.pipeline_mode<synchronous>, transform_indices = @transform_17, window_bounds = array<i64: 2, 2>}]} {
    %c0_i32 = arith.constant 0 : i32
    %0 = arith.cmpi sgt, %arg0, %c0_i32 : i32
    %1 = arith.extui %0 : i1 to i32
    %2 = arith.sitofp %1 : i32 to f32
    %c0_i32_0 = arith.constant 0 : i32
    %3 = arith.cmpi eq, %arg0, %c0_i32_0 : i32
    %4 = arith.extui %3 : i1 to i32
    %c0_i32_1 = arith.constant 0 : i32
    %5 = arith.cmpi ne, %4, %c0_i32_1 : i32
    scf.if %5 {
      %cst_129 = arith.constant 0.000000e+00 : f32
      %297 = vector.broadcast %cst_129 : f32 to vector<8x512xf32>
      %c0_130 = arith.constant 0 : index
      %c0_131 = arith.constant 0 : index
      %298 = vector.load %arg19[%c0_130, %c0_131] : memref<8x512xf32, #tpu.memory_space<vmem>>, vector<8x512xf32>
      tpu.vector_store %arg19[%c0_130, %c0_131], %297 {strides = array<i32>} : memref<8x512xf32, #tpu.memory_space<vmem>>, vector<8x512xf32>,
      %cst_132 = arith.constant 0.000000e+00 : f32
      %299 = vector.broadcast %cst_132 : f32 to vector<8x512xf32>
      %c0_133 = arith.constant 0 : index
      %c0_134 = arith.constant 0 : index
      %300 = vector.load %arg20[%c0_133, %c0_134] : memref<8x512xf32, #tpu.memory_space<vmem>>, vector<8x512xf32>
      tpu.vector_store %arg20[%c0_133, %c0_134], %299 {strides = array<i32>} : memref<8x512xf32, #tpu.memory_space<vmem>>, vector<8x512xf32>,
      %cst_135 = arith.constant 0.000000e+00 : f32
      %301 = vector.broadcast %cst_135 : f32 to vector<8x128xf32>
      %c0_136 = arith.constant 0 : index
      %c0_137 = arith.constant 0 : index
      %302 = vector.load %arg22[%c0_136, %c0_137] : memref<8x128xf32, #tpu.memory_space<vmem>>, vector<8x128xf32>
      tpu.vector_store %arg22[%c0_136, %c0_137], %301 {strides = array<i32>} : memref<8x128xf32, #tpu.memory_space<vmem>>, vector<8x128xf32>,
      %cst_138 = arith.constant 0.000000e+00 : f32
      %303 = vector.broadcast %cst_138 : f32 to vector<8x128xf32>
      %c0_139 = arith.constant 0 : index
      %c0_140 = arith.constant 0 : index
      %304 = vector.load %arg23[%c0_139, %c0_140] : memref<8x128xf32, #tpu.memory_space<vmem>>, vector<8x128xf32>
      tpu.vector_store %arg23[%c0_139, %c0_140], %303 {strides = array<i32>} : memref<8x128xf32, #tpu.memory_space<vmem>>, vector<8x128xf32>,
      %cst_141 = arith.constant 0.000000e+00 : f32
      %305 = vector.broadcast %cst_141 : f32 to vector<1x2xf32>
      %c0_142 = arith.constant 0 : index
      %c0_143 = arith.constant 0 : index
      %306 = vector.load %arg17[%c0_142, %c0_143] : memref<1x2xf32, #tpu.memory_space<vmem>>, vector<1x2xf32>
      tpu.vector_store %arg17[%c0_142, %c0_143], %305 {strides = array<i32>} : memref<1x2xf32, #tpu.memory_space<vmem>>, vector<1x2xf32>,
    } else {
    }
    %c0 = arith.constant 0 : index
    %c0_2 = arith.constant 0 : index
    %6 = vector.load %arg2[%c0, %c0_2] : memref<9x512xf32, #tpu.memory_space<vmem>>, vector<9x512xf32>
    %c0_3 = arith.constant 0 : index
    %c0_4 = arith.constant 0 : index
    %7 = vector.load %arg3[%c0_3, %c0_4] : memref<9x128xf32, #tpu.memory_space<vmem>>, vector<9x128xf32>
    %c0_5 = arith.constant 0 : index
    %c0_6 = arith.constant 0 : index
    %8 = vector.load %arg19[%c0_5, %c0_6] : memref<8x512xf32, #tpu.memory_space<vmem>>, vector<8x512xf32>
    %c17_i32 = arith.constant 17 : i32
    %9 = tpu.dynamic_rotate %8 by %c17_i32 dim 1 : vector<8x512xf32>, i32 -> vector<8x512xf32>
    %10 = vector.extract_strided_slice %6 {offsets = [0, 0], sizes = [1, 512], strides = [1, 1]} : vector<9x512xf32> to vector<1x512xf32>
    %11 = vector.broadcast %10 : vector<1x512xf32> to vector<8x512xf32>
    %12 = arith.mulf %9, %11 : vector<8x512xf32>
    %13 = arith.truncf %12 : vector<8x512xf32> to vector<8x512xbf16>
    %c144 = arith.constant 144 : index
    %c0_7 = arith.constant 0 : index
    %14 = vector.load %arg21[%c144, %c0_7] : memref<216x512xbf16, #tpu.memory_space<vmem>>, vector<8x512xbf16>
    tpu.vector_store %arg21[%c144, %c0_7], %13 {strides = array<i32>} : memref<216x512xbf16, #tpu.memory_space<vmem>>, vector<8x512xbf16>,
    %c16_i32 = arith.constant 16 : i32
    %15 = tpu.dynamic_rotate %8 by %c16_i32 dim 1 : vector<8x512xf32>, i32 -> vector<8x512xf32>
    %16 = vector.extract_strided_slice %6 {offsets = [1, 0], sizes = [1, 512], strides = [1, 1]} : vector<9x512xf32> to vector<1x512xf32>
    %17 = vector.broadcast %16 : vector<1x512xf32> to vector<8x512xf32>
    %18 = arith.mulf %15, %17 : vector<8x512xf32>
    %19 = arith.truncf %18 : vector<8x512xf32> to vector<8x512xbf16>
    %c152 = arith.constant 152 : index
    %c0_8 = arith.constant 0 : index
    %20 = vector.load %arg21[%c152, %c0_8] : memref<216x512xbf16, #tpu.memory_space<vmem>>, vector<8x512xbf16>
    tpu.vector_store %arg21[%c152, %c0_8], %19 {strides = array<i32>} : memref<216x512xbf16, #tpu.memory_space<vmem>>, vector<8x512xbf16>,
    %c15_i32 = arith.constant 15 : i32
    %21 = tpu.dynamic_rotate %8 by %c15_i32 dim 1 : vector<8x512xf32>, i32 -> vector<8x512xf32>
    %22 = vector.extract_strided_slice %6 {offsets = [2, 0], sizes = [1, 512], strides = [1, 1]} : vector<9x512xf32> to vector<1x512xf32>
    %23 = vector.broadcast %22 : vector<1x512xf32> to vector<8x512xf32>
    %24 = arith.mulf %21, %23 : vector<8x512xf32>
    %25 = arith.truncf %24 : vector<8x512xf32> to vector<8x512xbf16>
    %c160 = arith.constant 160 : index
    %c0_9 = arith.constant 0 : index
    %26 = vector.load %arg21[%c160, %c0_9] : memref<216x512xbf16, #tpu.memory_space<vmem>>, vector<8x512xbf16>
    tpu.vector_store %arg21[%c160, %c0_9], %25 {strides = array<i32>} : memref<216x512xbf16, #tpu.memory_space<vmem>>, vector<8x512xbf16>,
    %c1_i32 = arith.constant 1 : i32
    %27 = tpu.dynamic_rotate %8 by %c1_i32 dim 1 : vector<8x512xf32>, i32 -> vector<8x512xf32>
    %28 = vector.extract_strided_slice %6 {offsets = [3, 0], sizes = [1, 512], strides = [1, 1]} : vector<9x512xf32> to vector<1x512xf32>
    %29 = vector.broadcast %28 : vector<1x512xf32> to vector<8x512xf32>
    %30 = arith.mulf %27, %29 : vector<8x512xf32>
    %31 = arith.truncf %30 : vector<8x512xf32> to vector<8x512xbf16>
    %c168 = arith.constant 168 : index
    %c0_10 = arith.constant 0 : index
    %32 = vector.load %arg21[%c168, %c0_10] : memref<216x512xbf16, #tpu.memory_space<vmem>>, vector<8x512xbf16>
    tpu.vector_store %arg21[%c168, %c0_10], %31 {strides = array<i32>} : memref<216x512xbf16, #tpu.memory_space<vmem>>, vector<8x512xbf16>,
    %33 = arith.truncf %8 : vector<8x512xf32> to vector<8x512xbf16>
    %c176 = arith.constant 176 : index
    %c0_11 = arith.constant 0 : index
    %34 = vector.load %arg21[%c176, %c0_11] : memref<216x512xbf16, #tpu.memory_space<vmem>>, vector<8x512xbf16>
    tpu.vector_store %arg21[%c176, %c0_11], %33 {strides = array<i32>} : memref<216x512xbf16, #tpu.memory_space<vmem>>, vector<8x512xbf16>,
    %c511_i32 = arith.constant 511 : i32
    %35 = tpu.dynamic_rotate %8 by %c511_i32 dim 1 : vector<8x512xf32>, i32 -> vector<8x512xf32>
    %36 = vector.extract_strided_slice %6 {offsets = [5, 0], sizes = [1, 512], strides = [1, 1]} : vector<9x512xf32> to vector<1x512xf32>
    %37 = vector.broadcast %36 : vector<1x512xf32> to vector<8x512xf32>
    %38 = arith.mulf %35, %37 : vector<8x512xf32>
    %39 = arith.truncf %38 : vector<8x512xf32> to vector<8x512xbf16>
    %c184 = arith.constant 184 : index
    %c0_12 = arith.constant 0 : index
    %40 = vector.load %arg21[%c184, %c0_12] : memref<216x512xbf16, #tpu.memory_space<vmem>>, vector<8x512xbf16>
    tpu.vector_store %arg21[%c184, %c0_12], %39 {strides = array<i32>} : memref<216x512xbf16, #tpu.memory_space<vmem>>, vector<8x512xbf16>,
    %c497_i32 = arith.constant 497 : i32
    %41 = tpu.dynamic_rotate %8 by %c497_i32 dim 1 : vector<8x512xf32>, i32 -> vector<8x512xf32>
    %42 = vector.extract_strided_slice %6 {offsets = [6, 0], sizes = [1, 512], strides = [1, 1]} : vector<9x512xf32> to vector<1x512xf32>
    %43 = vector.broadcast %42 : vector<1x512xf32> to vector<8x512xf32>
    %44 = arith.mulf %41, %43 : vector<8x512xf32>
    %45 = arith.truncf %44 : vector<8x512xf32> to vector<8x512xbf16>
    %c192 = arith.constant 192 : index
    %c0_13 = arith.constant 0 : index
    %46 = vector.load %arg21[%c192, %c0_13] : memref<216x512xbf16, #tpu.memory_space<vmem>>, vector<8x512xbf16>
    tpu.vector_store %arg21[%c192, %c0_13], %45 {strides = array<i32>} : memref<216x512xbf16, #tpu.memory_space<vmem>>, vector<8x512xbf16>,
    %c496_i32 = arith.constant 496 : i32
    %47 = tpu.dynamic_rotate %8 by %c496_i32 dim 1 : vector<8x512xf32>, i32 -> vector<8x512xf32>
    %48 = vector.extract_strided_slice %6 {offsets = [7, 0], sizes = [1, 512], strides = [1, 1]} : vector<9x512xf32> to vector<1x512xf32>
    %49 = vector.broadcast %48 : vector<1x512xf32> to vector<8x512xf32>
    %50 = arith.mulf %47, %49 : vector<8x512xf32>
    %51 = arith.truncf %50 : vector<8x512xf32> to vector<8x512xbf16>
    %c200 = arith.constant 200 : index
    %c0_14 = arith.constant 0 : index
    %52 = vector.load %arg21[%c200, %c0_14] : memref<216x512xbf16, #tpu.memory_space<vmem>>, vector<8x512xbf16>
    tpu.vector_store %arg21[%c200, %c0_14], %51 {strides = array<i32>} : memref<216x512xbf16, #tpu.memory_space<vmem>>, vector<8x512xbf16>,
    %c495_i32 = arith.constant 495 : i32
    %53 = tpu.dynamic_rotate %8 by %c495_i32 dim 1 : vector<8x512xf32>, i32 -> vector<8x512xf32>
    %54 = vector.extract_strided_slice %6 {offsets = [8, 0], sizes = [1, 512], strides = [1, 1]} : vector<9x512xf32> to vector<1x512xf32>
    %55 = vector.broadcast %54 : vector<1x512xf32> to vector<8x512xf32>
    %56 = arith.mulf %53, %55 : vector<8x512xf32>
    %57 = arith.truncf %56 : vector<8x512xf32> to vector<8x512xbf16>
    %c208 = arith.constant 208 : index
    %c0_15 = arith.constant 0 : index
    %58 = vector.load %arg21[%c208, %c0_15] : memref<216x512xbf16, #tpu.memory_space<vmem>>, vector<8x512xbf16>
    tpu.vector_store %arg21[%c208, %c0_15], %57 {strides = array<i32>} : memref<216x512xbf16, #tpu.memory_space<vmem>>, vector<8x512xbf16>,
    %c0_16 = arith.constant 0 : index
    %c0_17 = arith.constant 0 : index
    %59 = vector.load %arg8[%c0_16, %c0_17] : memref<4x72xbf16, #tpu.memory_space<vmem>>, vector<4x72xbf16>
    %c144_18 = arith.constant 144 : index
    %c0_19 = arith.constant 0 : index
    %60 = vector.load %arg21[%c144_18, %c0_19] : memref<216x512xbf16, #tpu.memory_space<vmem>>, vector<72x512xbf16>
    %cst = arith.constant dense<0.000000e+00> : vector<4x512xf32>
    %61 = tpu.matmul %59, %60, %cst {dimension_numbers = #tpu.dot_dimension_numbers<[1], [0], [0], [1], [0, 0, 1, 1], [], []>} : vector<4x72xbf16>, vector<72x512xbf16>, vector<4x512xf32> -> vector<4x512xf32>
    %c0_20 = arith.constant 0 : index
    %c0_21 = arith.constant 0 : index
    %62 = vector.load %arg9[%c0_20, %c0_21] : memref<4x1xf32, #tpu.memory_space<vmem>>, vector<4x1xf32>
    %63 = vector.broadcast %62 : vector<4x1xf32> to vector<4x512xf32>
    %64 = arith.addf %61, %63 : vector<4x512xf32>
    %cst_22 = arith.constant 0.000000e+00 : f32
    %cst_23 = arith.constant 1.000000e+00 : f32
    %65 = vector.broadcast %cst_22 : f32 to vector<4x512xf32>
    %66 = arith.maximumf %65, %64 : vector<4x512xf32>
    %67 = vector.broadcast %cst_23 : f32 to vector<4x512xf32>
    %68 = arith.minimumf %67, %66 : vector<4x512xf32>
    %69 = vector.broadcast %2 : f32 to vector<4x512xf32>
    %70 = arith.mulf %68, %69 : vector<4x512xf32>
    %c0_24 = arith.constant 0 : index
    %c0_25 = arith.constant 0 : index
    %71 = vector.load %arg22[%c0_24, %c0_25] : memref<8x128xf32, #tpu.memory_space<vmem>>, vector<8x128xf32>
    %c9_i32 = arith.constant 9 : i32
    %72 = tpu.dynamic_rotate %71 by %c9_i32 dim 1 : vector<8x128xf32>, i32 -> vector<8x128xf32>
    %73 = vector.extract_strided_slice %7 {offsets = [0, 0], sizes = [1, 128], strides = [1, 1]} : vector<9x128xf32> to vector<1x128xf32>
    %74 = vector.broadcast %73 : vector<1x128xf32> to vector<8x128xf32>
    %75 = arith.mulf %72, %74 : vector<8x128xf32>
    %76 = arith.truncf %75 : vector<8x128xf32> to vector<8x128xbf16>
    %c144_26 = arith.constant 144 : index
    %c0_27 = arith.constant 0 : index
    %77 = vector.load %arg24[%c144_26, %c0_27] : memref<216x128xbf16, #tpu.memory_space<vmem>>, vector<8x128xbf16>
    tpu.vector_store %arg24[%c144_26, %c0_27], %76 {strides = array<i32>} : memref<216x128xbf16, #tpu.memory_space<vmem>>, vector<8x128xbf16>,
    %c8_i32 = arith.constant 8 : i32
    %78 = tpu.dynamic_rotate %71 by %c8_i32 dim 1 : vector<8x128xf32>, i32 -> vector<8x128xf32>
    %79 = vector.extract_strided_slice %7 {offsets = [1, 0], sizes = [1, 128], strides = [1, 1]} : vector<9x128xf32> to vector<1x128xf32>
    %80 = vector.broadcast %79 : vector<1x128xf32> to vector<8x128xf32>
    %81 = arith.mulf %78, %80 : vector<8x128xf32>
    %82 = arith.truncf %81 : vector<8x128xf32> to vector<8x128xbf16>
    %c152_28 = arith.constant 152 : index
    %c0_29 = arith.constant 0 : index
    %83 = vector.load %arg24[%c152_28, %c0_29] : memref<216x128xbf16, #tpu.memory_space<vmem>>, vector<8x128xbf16>
    tpu.vector_store %arg24[%c152_28, %c0_29], %82 {strides = array<i32>} : memref<216x128xbf16, #tpu.memory_space<vmem>>, vector<8x128xbf16>,
    %c7_i32 = arith.constant 7 : i32
    %84 = tpu.dynamic_rotate %71 by %c7_i32 dim 1 : vector<8x128xf32>, i32 -> vector<8x128xf32>
    %85 = vector.extract_strided_slice %7 {offsets = [2, 0], sizes = [1, 128], strides = [1, 1]} : vector<9x128xf32> to vector<1x128xf32>
    %86 = vector.broadcast %85 : vector<1x128xf32> to vector<8x128xf32>
    %87 = arith.mulf %84, %86 : vector<8x128xf32>
    %88 = arith.truncf %87 : vector<8x128xf32> to vector<8x128xbf16>
    %c160_30 = arith.constant 160 : index
    %c0_31 = arith.constant 0 : index
    %89 = vector.load %arg24[%c160_30, %c0_31] : memref<216x128xbf16, #tpu.memory_space<vmem>>, vector<8x128xbf16>
    tpu.vector_store %arg24[%c160_30, %c0_31], %88 {strides = array<i32>} : memref<216x128xbf16, #tpu.memory_space<vmem>>, vector<8x128xbf16>,
    %c1_i32_32 = arith.constant 1 : i32
    %90 = tpu.dynamic_rotate %71 by %c1_i32_32 dim 1 : vector<8x128xf32>, i32 -> vector<8x128xf32>
    %91 = vector.extract_strided_slice %7 {offsets = [3, 0], sizes = [1, 128], strides = [1, 1]} : vector<9x128xf32> to vector<1x128xf32>
    %92 = vector.broadcast %91 : vector<1x128xf32> to vector<8x128xf32>
    %93 = arith.mulf %90, %92 : vector<8x128xf32>
    %94 = arith.truncf %93 : vector<8x128xf32> to vector<8x128xbf16>
    %c168_33 = arith.constant 168 : index
    %c0_34 = arith.constant 0 : index
    %95 = vector.load %arg24[%c168_33, %c0_34] : memref<216x128xbf16, #tpu.memory_space<vmem>>, vector<8x128xbf16>
    tpu.vector_store %arg24[%c168_33, %c0_34], %94 {strides = array<i32>} : memref<216x128xbf16, #tpu.memory_space<vmem>>, vector<8x128xbf16>,
    %96 = arith.truncf %71 : vector<8x128xf32> to vector<8x128xbf16>
    %c176_35 = arith.constant 176 : index
    %c0_36 = arith.constant 0 : index
    %97 = vector.load %arg24[%c176_35, %c0_36] : memref<216x128xbf16, #tpu.memory_space<vmem>>, vector<8x128xbf16>
    tpu.vector_store %arg24[%c176_35, %c0_36], %96 {strides = array<i32>} : memref<216x128xbf16, #tpu.memory_space<vmem>>, vector<8x128xbf16>,
    %c127_i32 = arith.constant 127 : i32
    %98 = tpu.dynamic_rotate %71 by %c127_i32 dim 1 : vector<8x128xf32>, i32 -> vector<8x128xf32>
    %99 = vector.extract_strided_slice %7 {offsets = [5, 0], sizes = [1, 128], strides = [1, 1]} : vector<9x128xf32> to vector<1x128xf32>
    %100 = vector.broadcast %99 : vector<1x128xf32> to vector<8x128xf32>
    %101 = arith.mulf %98, %100 : vector<8x128xf32>
    %102 = arith.truncf %101 : vector<8x128xf32> to vector<8x128xbf16>
    %c184_37 = arith.constant 184 : index
    %c0_38 = arith.constant 0 : index
    %103 = vector.load %arg24[%c184_37, %c0_38] : memref<216x128xbf16, #tpu.memory_space<vmem>>, vector<8x128xbf16>
    tpu.vector_store %arg24[%c184_37, %c0_38], %102 {strides = array<i32>} : memref<216x128xbf16, #tpu.memory_space<vmem>>, vector<8x128xbf16>,
    %c121_i32 = arith.constant 121 : i32
    %104 = tpu.dynamic_rotate %71 by %c121_i32 dim 1 : vector<8x128xf32>, i32 -> vector<8x128xf32>
    %105 = vector.extract_strided_slice %7 {offsets = [6, 0], sizes = [1, 128], strides = [1, 1]} : vector<9x128xf32> to vector<1x128xf32>
    %106 = vector.broadcast %105 : vector<1x128xf32> to vector<8x128xf32>
    %107 = arith.mulf %104, %106 : vector<8x128xf32>
    %108 = arith.truncf %107 : vector<8x128xf32> to vector<8x128xbf16>
    %c192_39 = arith.constant 192 : index
    %c0_40 = arith.constant 0 : index
    %109 = vector.load %arg24[%c192_39, %c0_40] : memref<216x128xbf16, #tpu.memory_space<vmem>>, vector<8x128xbf16>
    tpu.vector_store %arg24[%c192_39, %c0_40], %108 {strides = array<i32>} : memref<216x128xbf16, #tpu.memory_space<vmem>>, vector<8x128xbf16>,
    %c120_i32 = arith.constant 120 : i32
    %110 = tpu.dynamic_rotate %71 by %c120_i32 dim 1 : vector<8x128xf32>, i32 -> vector<8x128xf32>
    %111 = vector.extract_strided_slice %7 {offsets = [7, 0], sizes = [1, 128], strides = [1, 1]} : vector<9x128xf32> to vector<1x128xf32>
    %112 = vector.broadcast %111 : vector<1x128xf32> to vector<8x128xf32>
    %113 = arith.mulf %110, %112 : vector<8x128xf32>
    %114 = arith.truncf %113 : vector<8x128xf32> to vector<8x128xbf16>
    %c200_41 = arith.constant 200 : index
    %c0_42 = arith.constant 0 : index
    %115 = vector.load %arg24[%c200_41, %c0_42] : memref<216x128xbf16, #tpu.memory_space<vmem>>, vector<8x128xbf16>
    tpu.vector_store %arg24[%c200_41, %c0_42], %114 {strides = array<i32>} : memref<216x128xbf16, #tpu.memory_space<vmem>>, vector<8x128xbf16>,
    %c119_i32 = arith.constant 119 : i32
    %116 = tpu.dynamic_rotate %71 by %c119_i32 dim 1 : vector<8x128xf32>, i32 -> vector<8x128xf32>
    %117 = vector.extract_strided_slice %7 {offsets = [8, 0], sizes = [1, 128], strides = [1, 1]} : vector<9x128xf32> to vector<1x128xf32>
    %118 = vector.broadcast %117 : vector<1x128xf32> to vector<8x128xf32>
    %119 = arith.mulf %116, %118 : vector<8x128xf32>
    %120 = arith.truncf %119 : vector<8x128xf32> to vector<8x128xbf16>
    %c208_43 = arith.constant 208 : index
    %c0_44 = arith.constant 0 : index
    %121 = vector.load %arg24[%c208_43, %c0_44] : memref<216x128xbf16, #tpu.memory_space<vmem>>, vector<8x128xbf16>
    tpu.vector_store %arg24[%c208_43, %c0_44], %120 {strides = array<i32>} : memref<216x128xbf16, #tpu.memory_space<vmem>>, vector<8x128xbf16>,
    %c0_45 = arith.constant 0 : index
    %c0_46 = arith.constant 0 : index
    %122 = vector.load %arg12[%c0_45, %c0_46] : memref<8x72xbf16, #tpu.memory_space<vmem>>, vector<8x72xbf16>
    %c144_47 = arith.constant 144 : index
    %c0_48 = arith.constant 0 : index
    %123 = vector.load %arg24[%c144_47, %c0_48] : memref<216x128xbf16, #tpu.memory_space<vmem>>, vector<72x128xbf16>
    %cst_49 = arith.constant dense<0.000000e+00> : vector<8x128xf32>
    %124 = tpu.matmul %122, %123, %cst_49 {dimension_numbers = #tpu.dot_dimension_numbers<[1], [0], [0], [1], [0, 0, 1, 1], [], []>} : vector<8x72xbf16>, vector<72x128xbf16>, vector<8x128xf32> -> vector<8x128xf32>
    %c0_50 = arith.constant 0 : index
    %c0_51 = arith.constant 0 : index
    %125 = vector.load %arg13[%c0_50, %c0_51] : memref<8x1xf32, #tpu.memory_space<vmem>>, vector<8x1xf32>
    %126 = vector.broadcast %125 : vector<8x1xf32> to vector<8x128xf32>
    %127 = arith.addf %124, %126 : vector<8x128xf32>
    %cst_52 = arith.constant 0.000000e+00 : f32
    %128 = vector.broadcast %cst_52 : f32 to vector<8x128xf32>
    %129 = arith.maximumf %127, %128 : vector<8x128xf32>
    %130 = vector.broadcast %2 : f32 to vector<8x128xf32>
    %131 = arith.mulf %129, %130 : vector<8x128xf32>
    %c0_53 = arith.constant 0 : index
    %c0_54 = arith.constant 0 : index
    %c0_55 = arith.constant 0 : index
    %132 = vector.load %arg1[%c0_53, %c0_54, %c0_55] : memref<1x4x512xf32, #tpu.memory_space<vmem>>, vector<1x4x512xf32>
    %133 = vector.shape_cast %132 : vector<1x4x512xf32> to vector<4x512xf32>
    %134 = arith.subf %70, %133 : vector<4x512xf32>
    %135 = arith.mulf %134, %134 : vector<4x512xf32>
    %136 = vector.extract_strided_slice %135 {offsets = [0, 0], sizes = [4, 256], strides = [1, 1]} : vector<4x512xf32> to vector<4x256xf32>
    %cst_56 = arith.constant dense<0.000000e+00> : vector<4xf32>
    %137 = vector.multi_reduction <add>, %136, %cst_56 [1] : vector<4x256xf32> to vector<4xf32>
    %138 = vector.shape_cast %137 : vector<4xf32> to vector<4x1xf32>
    %cst_57 = arith.constant dense<0.000000e+00> : vector<1xf32>
    %139 = vector.multi_reduction <add>, %138, %cst_57 [0] : vector<4x1xf32> to vector<1xf32>
    %140 = vector.shape_cast %139 : vector<1xf32> to vector<1x1xf32>
    %141 = vector.extract_strided_slice %135 {offsets = [0, 256], sizes = [4, 256], strides = [1, 1]} : vector<4x512xf32> to vector<4x256xf32>
    %cst_58 = arith.constant dense<0.000000e+00> : vector<4xf32>
    %142 = vector.multi_reduction <add>, %141, %cst_58 [1] : vector<4x256xf32> to vector<4xf32>
    %143 = vector.shape_cast %142 : vector<4xf32> to vector<4x1xf32>
    %cst_59 = arith.constant dense<0.000000e+00> : vector<1xf32>
    %144 = vector.multi_reduction <add>, %143, %cst_59 [0] : vector<4x1xf32> to vector<1xf32>
    %145 = vector.shape_cast %144 : vector<1xf32> to vector<1x1xf32>
    %146 = tpu.concatenate %140, %145 in 1 : vector<1x1xf32>, vector<1x1xf32> -> vector<1x2xf32>
    %cst_60 = arith.constant 0.000000e+00 : f32
    %147 = vector.broadcast %cst_60 : f32 to vector<4x512xf32>
    %148 = arith.subf %147, %134 : vector<4x512xf32>
    %149 = tpu.concatenate %134, %148 in 0 : vector<4x512xf32>, vector<4x512xf32> -> vector<8x512xf32>
    %cst_61 = arith.constant 0.000000e+00 : f32
    %150 = vector.broadcast %cst_61 : f32 to vector<8x512xf32>
    %151 = arith.maximumf %149, %150 : vector<8x512xf32>
    %c17_i32_62 = arith.constant 17 : i32
    %152 = tpu.dynamic_rotate %151 by %c17_i32_62 dim 1 : vector<8x512xf32>, i32 -> vector<8x512xf32>
    %153 = vector.extract_strided_slice %6 {offsets = [0, 0], sizes = [1, 512], strides = [1, 1]} : vector<9x512xf32> to vector<1x512xf32>
    %154 = vector.broadcast %153 : vector<1x512xf32> to vector<8x512xf32>
    %155 = arith.mulf %152, %154 : vector<8x512xf32>
    %156 = arith.truncf %155 : vector<8x512xf32> to vector<8x512xbf16>
    %c0_63 = arith.constant 0 : index
    %c0_64 = arith.constant 0 : index
    %157 = vector.load %arg21[%c0_63, %c0_64] : memref<216x512xbf16, #tpu.memory_space<vmem>>, vector<8x512xbf16>
    tpu.vector_store %arg21[%c0_63, %c0_64], %156 {strides = array<i32>} : memref<216x512xbf16, #tpu.memory_space<vmem>>, vector<8x512xbf16>,
    %c16_i32_65 = arith.constant 16 : i32
    %158 = tpu.dynamic_rotate %151 by %c16_i32_65 dim 1 : vector<8x512xf32>, i32 -> vector<8x512xf32>
    %159 = vector.extract_strided_slice %6 {offsets = [1, 0], sizes = [1, 512], strides = [1, 1]} : vector<9x512xf32> to vector<1x512xf32>
    %160 = vector.broadcast %159 : vector<1x512xf32> to vector<8x512xf32>
    %161 = arith.mulf %158, %160 : vector<8x512xf32>
    %162 = arith.truncf %161 : vector<8x512xf32> to vector<8x512xbf16>
    %c8 = arith.constant 8 : index
    %c0_66 = arith.constant 0 : index
    %163 = vector.load %arg21[%c8, %c0_66] : memref<216x512xbf16, #tpu.memory_space<vmem>>, vector<8x512xbf16>
    tpu.vector_store %arg21[%c8, %c0_66], %162 {strides = array<i32>} : memref<216x512xbf16, #tpu.memory_space<vmem>>, vector<8x512xbf16>,
    %c15_i32_67 = arith.constant 15 : i32
    %164 = tpu.dynamic_rotate %151 by %c15_i32_67 dim 1 : vector<8x512xf32>, i32 -> vector<8x512xf32>
    %165 = vector.extract_strided_slice %6 {offsets = [2, 0], sizes = [1, 512], strides = [1, 1]} : vector<9x512xf32> to vector<1x512xf32>
    %166 = vector.broadcast %165 : vector<1x512xf32> to vector<8x512xf32>
    %167 = arith.mulf %164, %166 : vector<8x512xf32>
    %168 = arith.truncf %167 : vector<8x512xf32> to vector<8x512xbf16>
    %c16 = arith.constant 16 : index
    %c0_68 = arith.constant 0 : index
    %169 = vector.load %arg21[%c16, %c0_68] : memref<216x512xbf16, #tpu.memory_space<vmem>>, vector<8x512xbf16>
    tpu.vector_store %arg21[%c16, %c0_68], %168 {strides = array<i32>} : memref<216x512xbf16, #tpu.memory_space<vmem>>, vector<8x512xbf16>,
    %c1_i32_69 = arith.constant 1 : i32
    %170 = tpu.dynamic_rotate %151 by %c1_i32_69 dim 1 : vector<8x512xf32>, i32 -> vector<8x512xf32>
    %171 = vector.extract_strided_slice %6 {offsets = [3, 0], sizes = [1, 512], strides = [1, 1]} : vector<9x512xf32> to vector<1x512xf32>
    %172 = vector.broadcast %171 : vector<1x512xf32> to vector<8x512xf32>
    %173 = arith.mulf %170, %172 : vector<8x512xf32>
    %174 = arith.truncf %173 : vector<8x512xf32> to vector<8x512xbf16>
    %c24 = arith.constant 24 : index
    %c0_70 = arith.constant 0 : index
    %175 = vector.load %arg21[%c24, %c0_70] : memref<216x512xbf16, #tpu.memory_space<vmem>>, vector<8x512xbf16>
    tpu.vector_store %arg21[%c24, %c0_70], %174 {strides = array<i32>} : memref<216x512xbf16, #tpu.memory_space<vmem>>, vector<8x512xbf16>,
    %176 = arith.truncf %151 : vector<8x512xf32> to vector<8x512xbf16>
    %c32 = arith.constant 32 : index
    %c0_71 = arith.constant 0 : index
    %177 = vector.load %arg21[%c32, %c0_71] : memref<216x512xbf16, #tpu.memory_space<vmem>>, vector<8x512xbf16>
    tpu.vector_store %arg21[%c32, %c0_71], %176 {strides = array<i32>} : memref<216x512xbf16, #tpu.memory_space<vmem>>, vector<8x512xbf16>,
    %c511_i32_72 = arith.constant 511 : i32
    %178 = tpu.dynamic_rotate %151 by %c511_i32_72 dim 1 : vector<8x512xf32>, i32 -> vector<8x512xf32>
    %179 = vector.extract_strided_slice %6 {offsets = [5, 0], sizes = [1, 512], strides = [1, 1]} : vector<9x512xf32> to vector<1x512xf32>
    %180 = vector.broadcast %179 : vector<1x512xf32> to vector<8x512xf32>
    %181 = arith.mulf %178, %180 : vector<8x512xf32>
    %182 = arith.truncf %181 : vector<8x512xf32> to vector<8x512xbf16>
    %c40 = arith.constant 40 : index
    %c0_73 = arith.constant 0 : index
    %183 = vector.load %arg21[%c40, %c0_73] : memref<216x512xbf16, #tpu.memory_space<vmem>>, vector<8x512xbf16>
    tpu.vector_store %arg21[%c40, %c0_73], %182 {strides = array<i32>} : memref<216x512xbf16, #tpu.memory_space<vmem>>, vector<8x512xbf16>,
    %c497_i32_74 = arith.constant 497 : i32
    %184 = tpu.dynamic_rotate %151 by %c497_i32_74 dim 1 : vector<8x512xf32>, i32 -> vector<8x512xf32>
    %185 = vector.extract_strided_slice %6 {offsets = [6, 0], sizes = [1, 512], strides = [1, 1]} : vector<9x512xf32> to vector<1x512xf32>
    %186 = vector.broadcast %185 : vector<1x512xf32> to vector<8x512xf32>
    %187 = arith.mulf %184, %186 : vector<8x512xf32>
    %188 = arith.truncf %187 : vector<8x512xf32> to vector<8x512xbf16>
    %c48 = arith.constant 48 : index
    %c0_75 = arith.constant 0 : index
    %189 = vector.load %arg21[%c48, %c0_75] : memref<216x512xbf16, #tpu.memory_space<vmem>>, vector<8x512xbf16>
    tpu.vector_store %arg21[%c48, %c0_75], %188 {strides = array<i32>} : memref<216x512xbf16, #tpu.memory_space<vmem>>, vector<8x512xbf16>,
    %c496_i32_76 = arith.constant 496 : i32
    %190 = tpu.dynamic_rotate %151 by %c496_i32_76 dim 1 : vector<8x512xf32>, i32 -> vector<8x512xf32>
    %191 = vector.extract_strided_slice %6 {offsets = [7, 0], sizes = [1, 512], strides = [1, 1]} : vector<9x512xf32> to vector<1x512xf32>
    %192 = vector.broadcast %191 : vector<1x512xf32> to vector<8x512xf32>
    %193 = arith.mulf %190, %192 : vector<8x512xf32>
    %194 = arith.truncf %193 : vector<8x512xf32> to vector<8x512xbf16>
    %c56 = arith.constant 56 : index
    %c0_77 = arith.constant 0 : index
    %195 = vector.load %arg21[%c56, %c0_77] : memref<216x512xbf16, #tpu.memory_space<vmem>>, vector<8x512xbf16>
    tpu.vector_store %arg21[%c56, %c0_77], %194 {strides = array<i32>} : memref<216x512xbf16, #tpu.memory_space<vmem>>, vector<8x512xbf16>,
    %c495_i32_78 = arith.constant 495 : i32
    %196 = tpu.dynamic_rotate %151 by %c495_i32_78 dim 1 : vector<8x512xf32>, i32 -> vector<8x512xf32>
    %197 = vector.extract_strided_slice %6 {offsets = [8, 0], sizes = [1, 512], strides = [1, 1]} : vector<9x512xf32> to vector<1x512xf32>
    %198 = vector.broadcast %197 : vector<1x512xf32> to vector<8x512xf32>
    %199 = arith.mulf %196, %198 : vector<8x512xf32>
    %200 = arith.truncf %199 : vector<8x512xf32> to vector<8x512xbf16>
    %c64 = arith.constant 64 : index
    %c0_79 = arith.constant 0 : index
    %201 = vector.load %arg21[%c64, %c0_79] : memref<216x512xbf16, #tpu.memory_space<vmem>>, vector<8x512xbf16>
    tpu.vector_store %arg21[%c64, %c0_79], %200 {strides = array<i32>} : memref<216x512xbf16, #tpu.memory_space<vmem>>, vector<8x512xbf16>,
    %c0_80 = arith.constant 0 : index
    %c0_81 = arith.constant 0 : index
    %202 = vector.load %arg14[%c0_80, %c0_81] : memref<8x72xbf16, #tpu.memory_space<vmem>>, vector<8x72xbf16>
    %c0_82 = arith.constant 0 : index
    %c0_83 = arith.constant 0 : index
    %203 = vector.load %arg21[%c0_82, %c0_83] : memref<216x512xbf16, #tpu.memory_space<vmem>>, vector<72x512xbf16>
    %cst_84 = arith.constant dense<0.000000e+00> : vector<8x512xf32>
    %204 = tpu.matmul %202, %203, %cst_84 {dimension_numbers = #tpu.dot_dimension_numbers<[1], [0], [0], [1], [0, 0, 1, 1], [], []>} : vector<8x72xbf16>, vector<72x512xbf16>, vector<8x512xf32> -> vector<8x512xf32>
    %c0_85 = arith.constant 0 : index
    %c0_86 = arith.constant 0 : index
    %205 = vector.load %arg15[%c0_85, %c0_86] : memref<8x1xf32, #tpu.memory_space<vmem>>, vector<8x1xf32>
    %206 = vector.broadcast %205 : vector<8x1xf32> to vector<8x512xf32>
    %207 = arith.addf %204, %206 : vector<8x512xf32>
    %c511_i32_87 = arith.constant 511 : i32
    %208 = tpu.dynamic_rotate %207 by %c511_i32_87 dim 1 : vector<8x512xf32>, i32 -> vector<8x512xf32>
    %209 = arith.maximumf %207, %208 : vector<8x512xf32>
    %c496_i32_88 = arith.constant 496 : i32
    %210 = tpu.dynamic_rotate %207 by %c496_i32_88 dim 1 : vector<8x512xf32>, i32 -> vector<8x512xf32>
    %211 = arith.maximumf %209, %210 : vector<8x512xf32>
    %c495_i32_89 = arith.constant 495 : i32
    %212 = tpu.dynamic_rotate %207 by %c495_i32_89 dim 1 : vector<8x512xf32>, i32 -> vector<8x512xf32>
    %213 = arith.maximumf %211, %212 : vector<8x512xf32>
    %214 = arith.truncf %213 : vector<8x512xf32> to vector<8x512xbf16>
    %c0_90 = arith.constant 0 : index
    %c0_91 = arith.constant 0 : index
    %215 = vector.load %arg5[%c0_90, %c0_91] : memref<512x128xbf16, #tpu.memory_space<vmem>>, vector<512x128xbf16>
    %cst_92 = arith.constant dense<0.000000e+00> : vector<8x128xf32>
    %216 = tpu.matmul %214, %215, %cst_92 {dimension_numbers = #tpu.dot_dimension_numbers<[1], [0], [0], [1], [0, 0, 1, 1], [], []>} : vector<8x512xbf16>, vector<512x128xbf16>, vector<8x128xf32> -> vector<8x128xf32>
    %217 = arith.subf %131, %216 : vector<8x128xf32>
    %218 = arith.mulf %217, %217 : vector<8x128xf32>
    %219 = vector.extract_strided_slice %218 {offsets = [0, 0], sizes = [8, 64], strides = [1, 1]} : vector<8x128xf32> to vector<8x64xf32>
    %cst_93 = arith.constant dense<0.000000e+00> : vector<8xf32>
    %220 = vector.multi_reduction <add>, %219, %cst_93 [1] : vector<8x64xf32> to vector<8xf32>
    %221 = vector.shape_cast %220 : vector<8xf32> to vector<8x1xf32>
    %cst_94 = arith.constant dense<0.000000e+00> : vector<1xf32>
    %222 = vector.multi_reduction <add>, %221, %cst_94 [0] : vector<8x1xf32> to vector<1xf32>
    %223 = vector.shape_cast %222 : vector<1xf32> to vector<1x1xf32>
    %224 = vector.extract_strided_slice %218 {offsets = [0, 64], sizes = [8, 64], strides = [1, 1]} : vector<8x128xf32> to vector<8x64xf32>
    %cst_95 = arith.constant dense<0.000000e+00> : vector<8xf32>
    %225 = vector.multi_reduction <add>, %224, %cst_95 [1] : vector<8x64xf32> to vector<8xf32>
    %226 = vector.shape_cast %225 : vector<8xf32> to vector<8x1xf32>
    %cst_96 = arith.constant dense<0.000000e+00> : vector<1xf32>
    %227 = vector.multi_reduction <add>, %226, %cst_96 [0] : vector<8x1xf32> to vector<1xf32>
    %228 = vector.shape_cast %227 : vector<1xf32> to vector<1x1xf32>
    %229 = tpu.concatenate %223, %228 in 1 : vector<1x1xf32>, vector<1x1xf32> -> vector<1x2xf32>
    %cst_97 = arith.constant 0.000000e+00 : f32
    %230 = vector.broadcast %cst_97 : f32 to vector<8x128xf32>
    %231 = arith.subf %230, %217 : vector<8x128xf32>
    %232 = tpu.concatenate %217, %231 in 0 : vector<8x128xf32>, vector<8x128xf32> -> vector<16x128xf32>
    %cst_98 = arith.constant 0.000000e+00 : f32
    %233 = vector.broadcast %cst_98 : f32 to vector<16x128xf32>
    %234 = arith.maximumf %232, %233 : vector<16x128xf32>
    %c9_i32_99 = arith.constant 9 : i32
    %235 = tpu.dynamic_rotate %234 by %c9_i32_99 dim 1 : vector<16x128xf32>, i32 -> vector<16x128xf32>
    %236 = vector.extract_strided_slice %7 {offsets = [0, 0], sizes = [1, 128], strides = [1, 1]} : vector<9x128xf32> to vector<1x128xf32>
    %237 = vector.broadcast %236 : vector<1x128xf32> to vector<16x128xf32>
    %238 = arith.mulf %235, %237 : vector<16x128xf32>
    %239 = arith.truncf %238 : vector<16x128xf32> to vector<16x128xbf16>
    %c0_100 = arith.constant 0 : index
    %c0_101 = arith.constant 0 : index
    %240 = vector.load %arg24[%c0_100, %c0_101] : memref<216x128xbf16, #tpu.memory_space<vmem>>, vector<16x128xbf16>
    tpu.vector_store %arg24[%c0_100, %c0_101], %239 {strides = array<i32>} : memref<216x128xbf16, #tpu.memory_space<vmem>>, vector<16x128xbf16>,
    %c8_i32_102 = arith.constant 8 : i32
    %241 = tpu.dynamic_rotate %234 by %c8_i32_102 dim 1 : vector<16x128xf32>, i32 -> vector<16x128xf32>
    %242 = vector.extract_strided_slice %7 {offsets = [1, 0], sizes = [1, 128], strides = [1, 1]} : vector<9x128xf32> to vector<1x128xf32>
    %243 = vector.broadcast %242 : vector<1x128xf32> to vector<16x128xf32>
    %244 = arith.mulf %241, %243 : vector<16x128xf32>
    %245 = arith.truncf %244 : vector<16x128xf32> to vector<16x128xbf16>
    %c16_103 = arith.constant 16 : index
    %c0_104 = arith.constant 0 : index
    %246 = vector.load %arg24[%c16_103, %c0_104] : memref<216x128xbf16, #tpu.memory_space<vmem>>, vector<16x128xbf16>
    tpu.vector_store %arg24[%c16_103, %c0_104], %245 {strides = array<i32>} : memref<216x128xbf16, #tpu.memory_space<vmem>>, vector<16x128xbf16>,
    %c7_i32_105 = arith.constant 7 : i32
    %247 = tpu.dynamic_rotate %234 by %c7_i32_105 dim 1 : vector<16x128xf32>, i32 -> vector<16x128xf32>
    %248 = vector.extract_strided_slice %7 {offsets = [2, 0], sizes = [1, 128], strides = [1, 1]} : vector<9x128xf32> to vector<1x128xf32>
    %249 = vector.broadcast %248 : vector<1x128xf32> to vector<16x128xf32>
    %250 = arith.mulf %247, %249 : vector<16x128xf32>
    %251 = arith.truncf %250 : vector<16x128xf32> to vector<16x128xbf16>
    %c32_106 = arith.constant 32 : index
    %c0_107 = arith.constant 0 : index
    %252 = vector.load %arg24[%c32_106, %c0_107] : memref<216x128xbf16, #tpu.memory_space<vmem>>, vector<16x128xbf16>
    tpu.vector_store %arg24[%c32_106, %c0_107], %251 {strides = array<i32>} : memref<216x128xbf16, #tpu.memory_space<vmem>>, vector<16x128xbf16>,
    %c1_i32_108 = arith.constant 1 : i32
    %253 = tpu.dynamic_rotate %234 by %c1_i32_108 dim 1 : vector<16x128xf32>, i32 -> vector<16x128xf32>
    %254 = vector.extract_strided_slice %7 {offsets = [3, 0], sizes = [1, 128], strides = [1, 1]} : vector<9x128xf32> to vector<1x128xf32>
    %255 = vector.broadcast %254 : vector<1x128xf32> to vector<16x128xf32>
    %256 = arith.mulf %253, %255 : vector<16x128xf32>
    %257 = arith.truncf %256 : vector<16x128xf32> to vector<16x128xbf16>
    %c48_109 = arith.constant 48 : index
    %c0_110 = arith.constant 0 : index
    %258 = vector.load %arg24[%c48_109, %c0_110] : memref<216x128xbf16, #tpu.memory_space<vmem>>, vector<16x128xbf16>
    tpu.vector_store %arg24[%c48_109, %c0_110], %257 {strides = array<i32>} : memref<216x128xbf16, #tpu.memory_space<vmem>>, vector<16x128xbf16>,
    %259 = arith.truncf %234 : vector<16x128xf32> to vector<16x128xbf16>
    %c64_111 = arith.constant 64 : index
    %c0_112 = arith.constant 0 : index
    %260 = vector.load %arg24[%c64_111, %c0_112] : memref<216x128xbf16, #tpu.memory_space<vmem>>, vector<16x128xbf16>
    tpu.vector_store %arg24[%c64_111, %c0_112], %259 {strides = array<i32>} : memref<216x128xbf16, #tpu.memory_space<vmem>>, vector<16x128xbf16>,
    %c127_i32_113 = arith.constant 127 : i32
    %261 = tpu.dynamic_rotate %234 by %c127_i32_113 dim 1 : vector<16x128xf32>, i32 -> vector<16x128xf32>
    %262 = vector.extract_strided_slice %7 {offsets = [5, 0], sizes = [1, 128], strides = [1, 1]} : vector<9x128xf32> to vector<1x128xf32>
    %263 = vector.broadcast %262 : vector<1x128xf32> to vector<16x128xf32>
    %264 = arith.mulf %261, %263 : vector<16x128xf32>
    %265 = arith.truncf %264 : vector<16x128xf32> to vector<16x128xbf16>
    %c80 = arith.constant 80 : index
    %c0_114 = arith.constant 0 : index
    %266 = vector.load %arg24[%c80, %c0_114] : memref<216x128xbf16, #tpu.memory_space<vmem>>, vector<16x128xbf16>
    tpu.vector_store %arg24[%c80, %c0_114], %265 {strides = array<i32>} : memref<216x128xbf16, #tpu.memory_space<vmem>>, vector<16x128xbf16>,
    %c121_i32_115 = arith.constant 121 : i32
    %267 = tpu.dynamic_rotate %234 by %c121_i32_115 dim 1 : vector<16x128xf32>, i32 -> vector<16x128xf32>
    %268 = vector.extract_strided_slice %7 {offsets = [6, 0], sizes = [1, 128], strides = [1, 1]} : vector<9x128xf32> to vector<1x128xf32>
    %269 = vector.broadcast %268 : vector<1x128xf32> to vector<16x128xf32>
    %270 = arith.mulf %267, %269 : vector<16x128xf32>
    %271 = arith.truncf %270 : vector<16x128xf32> to vector<16x128xbf16>
    %c96 = arith.constant 96 : index
    %c0_116 = arith.constant 0 : index
    %272 = vector.load %arg24[%c96, %c0_116] : memref<216x128xbf16, #tpu.memory_space<vmem>>, vector<16x128xbf16>
    tpu.vector_store %arg24[%c96, %c0_116], %271 {strides = array<i32>} : memref<216x128xbf16, #tpu.memory_space<vmem>>, vector<16x128xbf16>,
    %c120_i32_117 = arith.constant 120 : i32
    %273 = tpu.dynamic_rotate %234 by %c120_i32_117 dim 1 : vector<16x128xf32>, i32 -> vector<16x128xf32>
    %274 = vector.extract_strided_slice %7 {offsets = [7, 0], sizes = [1, 128], strides = [1, 1]} : vector<9x128xf32> to vector<1x128xf32>
    %275 = vector.broadcast %274 : vector<1x128xf32> to vector<16x128xf32>
    %276 = arith.mulf %273, %275 : vector<16x128xf32>
    %277 = arith.truncf %276 : vector<16x128xf32> to vector<16x128xbf16>
    %c112 = arith.constant 112 : index
    %c0_118 = arith.constant 0 : index
    %278 = vector.load %arg24[%c112, %c0_118] : memref<216x128xbf16, #tpu.memory_space<vmem>>, vector<16x128xbf16>
    tpu.vector_store %arg24[%c112, %c0_118], %277 {strides = array<i32>} : memref<216x128xbf16, #tpu.memory_space<vmem>>, vector<16x128xbf16>,
    %c119_i32_119 = arith.constant 119 : i32
    %279 = tpu.dynamic_rotate %234 by %c119_i32_119 dim 1 : vector<16x128xf32>, i32 -> vector<16x128xf32>
    %280 = vector.extract_strided_slice %7 {offsets = [8, 0], sizes = [1, 128], strides = [1, 1]} : vector<9x128xf32> to vector<1x128xf32>
    %281 = vector.broadcast %280 : vector<1x128xf32> to vector<16x128xf32>
    %282 = arith.mulf %279, %281 : vector<16x128xf32>
    %283 = arith.truncf %282 : vector<16x128xf32> to vector<16x128xbf16>
    %c128 = arith.constant 128 : index
    %c0_120 = arith.constant 0 : index
    %284 = vector.load %arg24[%c128, %c0_120] : memref<216x128xbf16, #tpu.memory_space<vmem>>, vector<16x128xbf16>
    tpu.vector_store %arg24[%c128, %c0_120], %283 {strides = array<i32>} : memref<216x128xbf16, #tpu.memory_space<vmem>>, vector<16x128xbf16>,
    %c0_121 = arith.constant 0 : index
    %c0_122 = arith.constant 0 : index
    %285 = vector.load %arg17[%c0_121, %c0_122] : memref<1x2xf32, #tpu.memory_space<vmem>>, vector<1x2xf32>
    %cst_123 = arith.constant 1.024000e+03 : f32
    %286 = arith.divf %2, %cst_123 : f32
    %287 = vector.broadcast %286 : f32 to vector<1x2xf32>
    %288 = arith.mulf %146, %287 : vector<1x2xf32>
    %289 = arith.addf %285, %288 : vector<1x2xf32>
    %c0_124 = arith.constant 0 : index
    %c0_125 = arith.constant 0 : index
    %290 = vector.load %arg17[%c0_124, %c0_125] : memref<1x2xf32, #tpu.memory_space<vmem>>, vector<1x2xf32>
    tpu.vector_store %arg17[%c0_124, %c0_125], %289 {strides = array<i32>} : memref<1x2xf32, #tpu.memory_space<vmem>>, vector<1x2xf32>,
    %c3_i32 = arith.constant 3 : i32
    %291 = arith.cmpi slt, %arg0, %c3_i32 : i32
    %292 = arith.extui %291 : i1 to i32
    %c0_i32_126 = arith.constant 0 : i32
    %293 = arith.cmpi ne, %292, %c0_i32_126 : i32
    scf.if %293 {
      %c0_129 = arith.constant 0 : index
      %c0_130 = arith.constant 0 : index
      %297 = vector.load %arg10[%c0_129, %c0_130] : memref<32x216xbf16, #tpu.memory_space<vmem>>, vector<32x216xbf16>
      %c0_131 = arith.constant 0 : index
      %c0_132 = arith.constant 0 : index
      %298 = vector.load %arg24[%c0_131, %c0_132] : memref<216x128xbf16, #tpu.memory_space<vmem>>, vector<216x128xbf16>
      %cst_133 = arith.constant dense<0.000000e+00> : vector<32x128xf32>
      %299 = tpu.matmul %297, %298, %cst_133 {dimension_numbers = #tpu.dot_dimension_numbers<[1], [0], [0], [1], [0, 0, 1, 1], [], []>} : vector<32x216xbf16>, vector<216x128xbf16>, vector<32x128xf32> -> vector<32x128xf32>
      %c0_134 = arith.constant 0 : index
      %c0_135 = arith.constant 0 : index
      %300 = vector.load %arg11[%c0_134, %c0_135] : memref<32x1xf32, #tpu.memory_space<vmem>>, vector<32x1xf32>
      %301 = vector.broadcast %300 : vector<32x1xf32> to vector<32x128xf32>
      %302 = arith.addf %299, %301 : vector<32x128xf32>
      %303 = vector.extract_strided_slice %302 {offsets = [0, 0], sizes = [8, 128], strides = [1, 1]} : vector<32x128xf32> to vector<8x128xf32>
      %304 = arith.negf %303 : vector<8x128xf32>
      %305 = math.exp %304 : vector<8x128xf32>
      %cst_136 = arith.constant 1.000000e+00 : f32
      %306 = vector.broadcast %cst_136 : f32 to vector<8x128xf32>
      %307 = arith.addf %306, %305 : vector<8x128xf32>
      %308 = arith.divf %306, %307 : vector<8x128xf32>
      %309 = vector.extract_strided_slice %302 {offsets = [8, 0], sizes = [8, 128], strides = [1, 1]} : vector<32x128xf32> to vector<8x128xf32>
      %310 = arith.negf %309 : vector<8x128xf32>
      %311 = math.exp %310 : vector<8x128xf32>
      %cst_137 = arith.constant 1.000000e+00 : f32
      %312 = vector.broadcast %cst_137 : f32 to vector<8x128xf32>
      %313 = arith.addf %312, %311 : vector<8x128xf32>
      %314 = arith.divf %312, %313 : vector<8x128xf32>
      %315 = vector.extract_strided_slice %302 {offsets = [16, 0], sizes = [8, 128], strides = [1, 1]} : vector<32x128xf32> to vector<8x128xf32>
      %316 = arith.negf %315 : vector<8x128xf32>
      %317 = math.exp %316 : vector<8x128xf32>
      %cst_138 = arith.constant 1.000000e+00 : f32
      %318 = vector.broadcast %cst_138 : f32 to vector<8x128xf32>
      %319 = arith.addf %318, %317 : vector<8x128xf32>
      %320 = arith.divf %318, %319 : vector<8x128xf32>
      %321 = vector.extract_strided_slice %302 {offsets = [24, 0], sizes = [8, 128], strides = [1, 1]} : vector<32x128xf32> to vector<8x128xf32>
      %322 = math.tanh %321 : vector<8x128xf32>
      %c0_139 = arith.constant 0 : index
      %c0_140 = arith.constant 0 : index
      %323 = vector.load %arg23[%c0_139, %c0_140] : memref<8x128xf32, #tpu.memory_space<vmem>>, vector<8x128xf32>
      %324 = arith.mulf %314, %323 : vector<8x128xf32>
      %325 = arith.mulf %308, %322 : vector<8x128xf32>
      %326 = arith.addf %324, %325 : vector<8x128xf32>
      %327 = math.tanh %326 : vector<8x128xf32>
      %328 = arith.mulf %320, %327 : vector<8x128xf32>
      %c0_141 = arith.constant 0 : index
      %c0_142 = arith.constant 0 : index
      %329 = vector.load %arg22[%c0_141, %c0_142] : memref<8x128xf32, #tpu.memory_space<vmem>>, vector<8x128xf32>
      tpu.vector_store %arg22[%c0_141, %c0_142], %328 {strides = array<i32>} : memref<8x128xf32, #tpu.memory_space<vmem>>, vector<8x128xf32>,
      %c0_143 = arith.constant 0 : index
      %c0_144 = arith.constant 0 : index
      %330 = vector.load %arg23[%c0_143, %c0_144] : memref<8x128xf32, #tpu.memory_space<vmem>>, vector<8x128xf32>
      tpu.vector_store %arg23[%c0_143, %c0_144], %326 {strides = array<i32>} : memref<8x128xf32, #tpu.memory_space<vmem>>, vector<8x128xf32>,
      %331 = arith.truncf %328 : vector<8x128xf32> to vector<8x128xbf16>
      %c0_145 = arith.constant 0 : index
      %c0_146 = arith.constant 0 : index
      %332 = vector.load %arg4[%c0_145, %c0_146] : memref<128x512xbf16, #tpu.memory_space<vmem>>, vector<128x512xbf16>
      %cst_147 = arith.constant dense<0.000000e+00> : vector<8x512xf32>
      %333 = tpu.matmul %331, %332, %cst_147 {dimension_numbers = #tpu.dot_dimension_numbers<[1], [0], [0], [1], [0, 0, 1, 1], [], []>} : vector<8x128xbf16>, vector<128x512xbf16>, vector<8x512xf32> -> vector<8x512xf32>
      %c17_i32_148 = arith.constant 17 : i32
      %334 = tpu.dynamic_rotate %333 by %c17_i32_148 dim 1 : vector<8x512xf32>, i32 -> vector<8x512xf32>
      %335 = vector.extract_strided_slice %6 {offsets = [0, 0], sizes = [1, 512], strides = [1, 1]} : vector<9x512xf32> to vector<1x512xf32>
      %336 = vector.broadcast %335 : vector<1x512xf32> to vector<8x512xf32>
      %337 = arith.mulf %334, %336 : vector<8x512xf32>
      %338 = arith.truncf %337 : vector<8x512xf32> to vector<8x512xbf16>
      %c72 = arith.constant 72 : index
      %c0_149 = arith.constant 0 : index
      %339 = vector.load %arg21[%c72, %c0_149] : memref<216x512xbf16, #tpu.memory_space<vmem>>, vector<8x512xbf16>
      tpu.vector_store %arg21[%c72, %c0_149], %338 {strides = array<i32>} : memref<216x512xbf16, #tpu.memory_space<vmem>>, vector<8x512xbf16>,
      %c16_i32_150 = arith.constant 16 : i32
      %340 = tpu.dynamic_rotate %333 by %c16_i32_150 dim 1 : vector<8x512xf32>, i32 -> vector<8x512xf32>
      %341 = vector.extract_strided_slice %6 {offsets = [1, 0], sizes = [1, 512], strides = [1, 1]} : vector<9x512xf32> to vector<1x512xf32>
      %342 = vector.broadcast %341 : vector<1x512xf32> to vector<8x512xf32>
      %343 = arith.mulf %340, %342 : vector<8x512xf32>
      %344 = arith.truncf %343 : vector<8x512xf32> to vector<8x512xbf16>
      %c80_151 = arith.constant 80 : index
      %c0_152 = arith.constant 0 : index
      %345 = vector.load %arg21[%c80_151, %c0_152] : memref<216x512xbf16, #tpu.memory_space<vmem>>, vector<8x512xbf16>
      tpu.vector_store %arg21[%c80_151, %c0_152], %344 {strides = array<i32>} : memref<216x512xbf16, #tpu.memory_space<vmem>>, vector<8x512xbf16>,
      %c15_i32_153 = arith.constant 15 : i32
      %346 = tpu.dynamic_rotate %333 by %c15_i32_153 dim 1 : vector<8x512xf32>, i32 -> vector<8x512xf32>
      %347 = vector.extract_strided_slice %6 {offsets = [2, 0], sizes = [1, 512], strides = [1, 1]} : vector<9x512xf32> to vector<1x512xf32>
      %348 = vector.broadcast %347 : vector<1x512xf32> to vector<8x512xf32>
      %349 = arith.mulf %346, %348 : vector<8x512xf32>
      %350 = arith.truncf %349 : vector<8x512xf32> to vector<8x512xbf16>
      %c88 = arith.constant 88 : index
      %c0_154 = arith.constant 0 : index
      %351 = vector.load %arg21[%c88, %c0_154] : memref<216x512xbf16, #tpu.memory_space<vmem>>, vector<8x512xbf16>
      tpu.vector_store %arg21[%c88, %c0_154], %350 {strides = array<i32>} : memref<216x512xbf16, #tpu.memory_space<vmem>>, vector<8x512xbf16>,
      %c1_i32_155 = arith.constant 1 : i32
      %352 = tpu.dynamic_rotate %333 by %c1_i32_155 dim 1 : vector<8x512xf32>, i32 -> vector<8x512xf32>
      %353 = vector.extract_strided_slice %6 {offsets = [3, 0], sizes = [1, 512], strides = [1, 1]} : vector<9x512xf32> to vector<1x512xf32>
      %354 = vector.broadcast %353 : vector<1x512xf32> to vector<8x512xf32>
      %355 = arith.mulf %352, %354 : vector<8x512xf32>
      %356 = arith.truncf %355 : vector<8x512xf32> to vector<8x512xbf16>
      %c96_156 = arith.constant 96 : index
      %c0_157 = arith.constant 0 : index
      %357 = vector.load %arg21[%c96_156, %c0_157] : memref<216x512xbf16, #tpu.memory_space<vmem>>, vector<8x512xbf16>
      tpu.vector_store %arg21[%c96_156, %c0_157], %356 {strides = array<i32>} : memref<216x512xbf16, #tpu.memory_space<vmem>>, vector<8x512xbf16>,
      %358 = arith.truncf %333 : vector<8x512xf32> to vector<8x512xbf16>
      %c104 = arith.constant 104 : index
      %c0_158 = arith.constant 0 : index
      %359 = vector.load %arg21[%c104, %c0_158] : memref<216x512xbf16, #tpu.memory_space<vmem>>, vector<8x512xbf16>
      tpu.vector_store %arg21[%c104, %c0_158], %358 {strides = array<i32>} : memref<216x512xbf16, #tpu.memory_space<vmem>>, vector<8x512xbf16>,
      %c511_i32_159 = arith.constant 511 : i32
      %360 = tpu.dynamic_rotate %333 by %c511_i32_159 dim 1 : vector<8x512xf32>, i32 -> vector<8x512xf32>
      %361 = vector.extract_strided_slice %6 {offsets = [5, 0], sizes = [1, 512], strides = [1, 1]} : vector<9x512xf32> to vector<1x512xf32>
      %362 = vector.broadcast %361 : vector<1x512xf32> to vector<8x512xf32>
      %363 = arith.mulf %360, %362 : vector<8x512xf32>
      %364 = arith.truncf %363 : vector<8x512xf32> to vector<8x512xbf16>
      %c112_160 = arith.constant 112 : index
      %c0_161 = arith.constant 0 : index
      %365 = vector.load %arg21[%c112_160, %c0_161] : memref<216x512xbf16, #tpu.memory_space<vmem>>, vector<8x512xbf16>
      tpu.vector_store %arg21[%c112_160, %c0_161], %364 {strides = array<i32>} : memref<216x512xbf16, #tpu.memory_space<vmem>>, vector<8x512xbf16>,
      %c497_i32_162 = arith.constant 497 : i32
      %366 = tpu.dynamic_rotate %333 by %c497_i32_162 dim 1 : vector<8x512xf32>, i32 -> vector<8x512xf32>
      %367 = vector.extract_strided_slice %6 {offsets = [6, 0], sizes = [1, 512], strides = [1, 1]} : vector<9x512xf32> to vector<1x512xf32>
      %368 = vector.broadcast %367 : vector<1x512xf32> to vector<8x512xf32>
      %369 = arith.mulf %366, %368 : vector<8x512xf32>
      %370 = arith.truncf %369 : vector<8x512xf32> to vector<8x512xbf16>
      %c120 = arith.constant 120 : index
      %c0_163 = arith.constant 0 : index
      %371 = vector.load %arg21[%c120, %c0_163] : memref<216x512xbf16, #tpu.memory_space<vmem>>, vector<8x512xbf16>
      tpu.vector_store %arg21[%c120, %c0_163], %370 {strides = array<i32>} : memref<216x512xbf16, #tpu.memory_space<vmem>>, vector<8x512xbf16>,
      %c496_i32_164 = arith.constant 496 : i32
      %372 = tpu.dynamic_rotate %333 by %c496_i32_164 dim 1 : vector<8x512xf32>, i32 -> vector<8x512xf32>
      %373 = vector.extract_strided_slice %6 {offsets = [7, 0], sizes = [1, 512], strides = [1, 1]} : vector<9x512xf32> to vector<1x512xf32>
      %374 = vector.broadcast %373 : vector<1x512xf32> to vector<8x512xf32>
      %375 = arith.mulf %372, %374 : vector<8x512xf32>
      %376 = arith.truncf %375 : vector<8x512xf32> to vector<8x512xbf16>
      %c128_165 = arith.constant 128 : index
      %c0_166 = arith.constant 0 : index
      %377 = vector.load %arg21[%c128_165, %c0_166] : memref<216x512xbf16, #tpu.memory_space<vmem>>, vector<8x512xbf16>
      tpu.vector_store %arg21[%c128_165, %c0_166], %376 {strides = array<i32>} : memref<216x512xbf16, #tpu.memory_space<vmem>>, vector<8x512xbf16>,
      %c495_i32_167 = arith.constant 495 : i32
      %378 = tpu.dynamic_rotate %333 by %c495_i32_167 dim 1 : vector<8x512xf32>, i32 -> vector<8x512xf32>
      %379 = vector.extract_strided_slice %6 {offsets = [8, 0], sizes = [1, 512], strides = [1, 1]} : vector<9x512xf32> to vector<1x512xf32>
      %380 = vector.broadcast %379 : vector<1x512xf32> to vector<8x512xf32>
      %381 = arith.mulf %378, %380 : vector<8x512xf32>
      %382 = arith.truncf %381 : vector<8x512xf32> to vector<8x512xbf16>
      %c136 = arith.constant 136 : index
      %c0_168 = arith.constant 0 : index
      %383 = vector.load %arg21[%c136, %c0_168] : memref<216x512xbf16, #tpu.memory_space<vmem>>, vector<8x512xbf16>
      tpu.vector_store %arg21[%c136, %c0_168], %382 {strides = array<i32>} : memref<216x512xbf16, #tpu.memory_space<vmem>>, vector<8x512xbf16>,
      %c0_169 = arith.constant 0 : index
      %c0_170 = arith.constant 0 : index
      %384 = vector.load %arg6[%c0_169, %c0_170] : memref<32x216xbf16, #tpu.memory_space<vmem>>, vector<32x216xbf16>
      %c0_171 = arith.constant 0 : index
      %c0_172 = arith.constant 0 : index
      %385 = vector.load %arg21[%c0_171, %c0_172] : memref<216x512xbf16, #tpu.memory_space<vmem>>, vector<216x512xbf16>
      %cst_173 = arith.constant dense<0.000000e+00> : vector<32x512xf32>
      %386 = tpu.matmul %384, %385, %cst_173 {dimension_numbers = #tpu.dot_dimension_numbers<[1], [0], [0], [1], [0, 0, 1, 1], [], []>} : vector<32x216xbf16>, vector<216x512xbf16>, vector<32x512xf32> -> vector<32x512xf32>
      %c0_174 = arith.constant 0 : index
      %c0_175 = arith.constant 0 : index
      %387 = vector.load %arg7[%c0_174, %c0_175] : memref<32x1xf32, #tpu.memory_space<vmem>>, vector<32x1xf32>
      %388 = vector.broadcast %387 : vector<32x1xf32> to vector<32x512xf32>
      %389 = arith.addf %386, %388 : vector<32x512xf32>
      %390 = vector.extract_strided_slice %389 {offsets = [0, 0], sizes = [8, 512], strides = [1, 1]} : vector<32x512xf32> to vector<8x512xf32>
      %391 = arith.negf %390 : vector<8x512xf32>
      %392 = math.exp %391 : vector<8x512xf32>
      %cst_176 = arith.constant 1.000000e+00 : f32
      %393 = vector.broadcast %cst_176 : f32 to vector<8x512xf32>
      %394 = arith.addf %393, %392 : vector<8x512xf32>
      %395 = arith.divf %393, %394 : vector<8x512xf32>
      %396 = vector.extract_strided_slice %389 {offsets = [8, 0], sizes = [8, 512], strides = [1, 1]} : vector<32x512xf32> to vector<8x512xf32>
      %397 = arith.negf %396 : vector<8x512xf32>
      %398 = math.exp %397 : vector<8x512xf32>
      %cst_177 = arith.constant 1.000000e+00 : f32
      %399 = vector.broadcast %cst_177 : f32 to vector<8x512xf32>
      %400 = arith.addf %399, %398 : vector<8x512xf32>
      %401 = arith.divf %399, %400 : vector<8x512xf32>
      %402 = vector.extract_strided_slice %389 {offsets = [16, 0], sizes = [8, 512], strides = [1, 1]} : vector<32x512xf32> to vector<8x512xf32>
      %403 = arith.negf %402 : vector<8x512xf32>
      %404 = math.exp %403 : vector<8x512xf32>
      %cst_178 = arith.constant 1.000000e+00 : f32
      %405 = vector.broadcast %cst_178 : f32 to vector<8x512xf32>
      %406 = arith.addf %405, %404 : vector<8x512xf32>
      %407 = arith.divf %405, %406 : vector<8x512xf32>
      %408 = vector.extract_strided_slice %389 {offsets = [24, 0], sizes = [8, 512], strides = [1, 1]} : vector<32x512xf32> to vector<8x512xf32>
      %409 = math.tanh %408 : vector<8x512xf32>
      %c0_179 = arith.constant 0 : index
      %c0_180 = arith.constant 0 : index
      %410 = vector.load %arg20[%c0_179, %c0_180] : memref<8x512xf32, #tpu.memory_space<vmem>>, vector<8x512xf32>
      %411 = arith.mulf %401, %410 : vector<8x512xf32>
      %412 = arith.mulf %395, %409 : vector<8x512xf32>
      %413 = arith.addf %411, %412 : vector<8x512xf32>
      %414 = math.tanh %413 : vector<8x512xf32>
      %415 = arith.mulf %407, %414 : vector<8x512xf32>
      %c0_181 = arith.constant 0 : index
      %c0_182 = arith.constant 0 : index
      %416 = vector.load %arg19[%c0_181, %c0_182] : memref<8x512xf32, #tpu.memory_space<vmem>>, vector<8x512xf32>
      tpu.vector_store %arg19[%c0_181, %c0_182], %415 {strides = array<i32>} : memref<8x512xf32, #tpu.memory_space<vmem>>, vector<8x512xf32>,
      %c0_183 = arith.constant 0 : index
      %c0_184 = arith.constant 0 : index
      %417 = vector.load %arg20[%c0_183, %c0_184] : memref<8x512xf32, #tpu.memory_space<vmem>>, vector<8x512xf32>
      tpu.vector_store %arg20[%c0_183, %c0_184], %413 {strides = array<i32>} : memref<8x512xf32, #tpu.memory_space<vmem>>, vector<8x512xf32>,
    } else {
    }
    %c3_i32_127 = arith.constant 3 : i32
    %294 = arith.cmpi eq, %arg0, %c3_i32_127 : i32
    %295 = arith.extui %294 : i1 to i32
    %c0_i32_128 = arith.constant 0 : i32
    %296 = arith.cmpi ne, %295, %c0_i32_128 : i32
    scf.if %296 {
      %c0_129 = arith.constant 0 : index
      %c0_130 = arith.constant 0 : index
      %297 = vector.load %arg16[%c0_129, %c0_130] : memref<4x512xf32, #tpu.memory_space<vmem>>, vector<4x512xf32>
      tpu.vector_store %arg16[%c0_129, %c0_130], %70 {strides = array<i32>} : memref<4x512xf32, #tpu.memory_space<vmem>>, vector<4x512xf32>,
      %cst_131 = arith.constant 9.765625E-4 : f32
      %298 = vector.broadcast %cst_131 : f32 to vector<1x2xf32>
      %299 = arith.mulf %146, %298 : vector<1x2xf32>
      %cst_132 = arith.constant 0.001953125 : f32
      %300 = vector.broadcast %cst_132 : f32 to vector<1x2xf32>
      %301 = arith.mulf %229, %300 : vector<1x2xf32>
      %302 = tpu.concatenate %299, %301 in 0 : vector<1x2xf32>, vector<1x2xf32> -> vector<2x2xf32>
      %c0_133 = arith.constant 0 : index
      %c0_134 = arith.constant 0 : index
      %303 = vector.load %arg18[%c0_133, %c0_134] : memref<2x2xf32, #tpu.memory_space<vmem>>, vector<2x2xf32>
      tpu.vector_store %arg18[%c0_133, %c0_134], %302 {strides = array<i32>} : memref<2x2xf32, #tpu.memory_space<vmem>>, vector<2x2xf32>,
    } else {
    }
    return
  }
  func.func @transform_0(%arg0: i32) -> (i32, i32, i32) {
    %c0_i32 = arith.constant 0 : i32
    %c0_i32_0 = arith.constant 0 : i32
    %c0_i32_1 = arith.constant 0 : i32
    return %arg0, %c0_i32, %c0_i32_0 : i32, i32, i32
  }
  func.func @transform_1(%arg0: i32) -> (i32, i32) {
    %c0_i32 = arith.constant 0 : i32
    %c0_i32_0 = arith.constant 0 : i32
    %c0_i32_1 = arith.constant 0 : i32
    return %c0_i32, %c0_i32_0 : i32, i32
  }
  func.func @transform_2(%arg0: i32) -> (i32, i32) {
    %c0_i32 = arith.constant 0 : i32
    %c0_i32_0 = arith.constant 0 : i32
    %c0_i32_1 = arith.constant 0 : i32
    return %c0_i32, %c0_i32_0 : i32, i32
  }
  func.func @transform_3(%arg0: i32) -> (i32, i32) {
    %c0_i32 = arith.constant 0 : i32
    %c0_i32_0 = arith.constant 0 : i32
    %c0_i32_1 = arith.constant 0 : i32
    return %c0_i32, %c0_i32_0 : i32, i32
  }
  func.func @transform_4(%arg0: i32) -> (i32, i32) {
    %c0_i32 = arith.constant 0 : i32
    %c0_i32_0 = arith.constant 0 : i32
    %c0_i32_1 = arith.constant 0 : i32
    return %c0_i32, %c0_i32_0 : i32, i32
  }
  func.func @transform_5(%arg0: i32) -> (i32, i32) {
    %c0_i32 = arith.constant 0 : i32
    %c0_i32_0 = arith.constant 0 : i32
    %c0_i32_1 = arith.constant 0 : i32
    return %c0_i32, %c0_i32_0 : i32, i32
  }
  func.func @transform_6(%arg0: i32) -> (i32, i32) {
    %c0_i32 = arith.constant 0 : i32
    %c0_i32_0 = arith.constant 0 : i32
    %c0_i32_1 = arith.constant 0 : i32
    return %c0_i32, %c0_i32_0 : i32, i32
  }
  func.func @transform_7(%arg0: i32) -> (i32, i32) {
    %c0_i32 = arith.constant 0 : i32
    %c0_i32_0 = arith.constant 0 : i32
    %c0_i32_1 = arith.constant 0 : i32
    return %c0_i32, %c0_i32_0 : i32, i32
  }
  func.func @transform_8(%arg0: i32) -> (i32, i32) {
    %c0_i32 = arith.constant 0 : i32
    %c0_i32_0 = arith.constant 0 : i32
    %c0_i32_1 = arith.constant 0 : i32
    return %c0_i32, %c0_i32_0 : i32, i32
  }
  func.func @transform_9(%arg0: i32) -> (i32, i32) {
    %c0_i32 = arith.constant 0 : i32
    %c0_i32_0 = arith.constant 0 : i32
    %c0_i32_1 = arith.constant 0 : i32
    return %c0_i32, %c0_i32_0 : i32, i32
  }
  func.func @transform_10(%arg0: i32) -> (i32, i32) {
    %c0_i32 = arith.constant 0 : i32
    %c0_i32_0 = arith.constant 0 : i32
    %c0_i32_1 = arith.constant 0 : i32
    return %c0_i32, %c0_i32_0 : i32, i32
  }
  func.func @transform_11(%arg0: i32) -> (i32, i32) {
    %c0_i32 = arith.constant 0 : i32
    %c0_i32_0 = arith.constant 0 : i32
    %c0_i32_1 = arith.constant 0 : i32
    return %c0_i32, %c0_i32_0 : i32, i32
  }
  func.func @transform_12(%arg0: i32) -> (i32, i32) {
    %c0_i32 = arith.constant 0 : i32
    %c0_i32_0 = arith.constant 0 : i32
    %c0_i32_1 = arith.constant 0 : i32
    return %c0_i32, %c0_i32_0 : i32, i32
  }
  func.func @transform_13(%arg0: i32) -> (i32, i32) {
    %c0_i32 = arith.constant 0 : i32
    %c0_i32_0 = arith.constant 0 : i32
    %c0_i32_1 = arith.constant 0 : i32
    return %c0_i32, %c0_i32_0 : i32, i32
  }
  func.func @transform_14(%arg0: i32) -> (i32, i32) {
    %c0_i32 = arith.constant 0 : i32
    %c0_i32_0 = arith.constant 0 : i32
    %c0_i32_1 = arith.constant 0 : i32
    return %c0_i32, %c0_i32_0 : i32, i32
  }
  func.func @transform_15(%arg0: i32) -> (i32, i32) {
    %c0_i32 = arith.constant 0 : i32
    %c0_i32_0 = arith.constant 0 : i32
    %c0_i32_1 = arith.constant 0 : i32
    return %c0_i32, %c0_i32_0 : i32, i32
  }
  func.func @transform_16(%arg0: i32) -> (i32, i32) {
    %c0_i32 = arith.constant 0 : i32
    %c0_i32_0 = arith.constant 0 : i32
    %c0_i32_1 = arith.constant 0 : i32
    return %c0_i32, %c0_i32_0 : i32, i32
  }
  func.func @transform_17(%arg0: i32) -> (i32, i32) {
    %c0_i32 = arith.constant 0 : i32
    %c0_i32_0 = arith.constant 0 : i32
    %c0_i32_1 = arith.constant 0 : i32
    return %c0_i32, %c0_i32_0 : i32, i32
  }
}

</mosaic_0001>

<bundles_post_ra>
// kernel: prednet_forward.1
= control target key start
LH: loop header
LB: loop body
LE: loop exit
PB: predicated region body
PF: predicated region fallthrough
CT: control target
= control target key end

     0   :  { %s6339_s0 = inlined_call_operand.vmem [shape: f32[4,4,512], index: 0, kind: input, shape index: {}]   ;;  %s6340_s1 = inlined_call_operand.vmem [shape: f32[9,512], index: 1, kind: input, shape index: {}]   ;;  %s6341_s2 = inlined_call_operand.vmem [shape: f32[9,128], index: 2, kind: input, shape index: {}]   ;;  %s6342_s3 = inlined_call_operand.vmem [shape: bf16[128,512], index: 3, kind: input, shape index: {}]   ;;  %s6343_s4 = inlined_call_operand.vmem [shape: bf16[512,128], index: 4, kind: input, shape index: {}]   ;;  %s6344_s5 = inlined_call_operand.vmem [shape: bf16[32,216], index: 5, kind: input, shape index: {}]   ;;  %s6345_s6 = inlined_call_operand.vmem [shape: f32[32,1], index: 6, kind: input, shape index: {}]   ;;  %s6346_s7 = inlined_call_operand.vmem [shape: bf16[4,72], index: 7, kind: input, shape index: {}]   ;;  %s6347_s8 = inlined_call_operand.vmem [shape: f32[4,1], index: 8, kind: input, shape index: {}]   ;;  %s6348_s9 = inlined_call_operand.vmem [shape: bf16[32,216], index: 9, kind: input, shape index: {}]   ;;  %s6349_s10 = inlined_call_operand.vmem [shape: f32[32,1], index: 10, kind: input, shape index: {}]   ;;  %s6350_s11 = inlined_call_operand.vmem [shape: bf16[8,72], index: 11, kind: input, shape index: {}]   ;;  %s6351_s12 = inlined_call_operand.vmem [shape: f32[8,1], index: 12, kind: input, shape index: {}]   ;;  %s6352_s13 = inlined_call_operand.vmem [shape: bf16[8,72], index: 13, kind: input, shape index: {}]   ;;  %s6353_s14 = inlined_call_operand.vmem [shape: f32[8,1], index: 14, kind: input, shape index: {}]   ;;  %s6354_s15 = inlined_call_operand.vmem [shape: f32[4,512], index: 15, kind: output, shape index: {0}]   ;;  %s6355_s16 = inlined_call_operand.hbm [shape: f32[1,2], index: 16, kind: output, shape index: {1}]   ;;  %s6356_s17 = inlined_call_operand.vmem [shape: f32[2,2], index: 17, kind: output, shape index: {2}]  }
   0x1   :  { %6402 = sst [smem:[#allocation23_spill]] %s6339_s0 }
   0x2   :  { %6403 = sst [smem:[#allocation24_spill]] %s6340_s1 }
   0x3   :  { %6404 = sst [smem:[#allocation25_spill]] %s6346_s7 }
   0x4   :  { %6405 = sst [smem:[#allocation26_spill]] %s6347_s8 }
   0x5   :  { %6406 = sst [smem:[#allocation27_spill]] %s6350_s11 }
   0x6   :  { %6407 = sst [smem:[#allocation28_spill]] %s6352_s13 }
   0x7   :  { %23 = vsyncpa [#allocation9], 0  ;;  %s5044_s24 = smov 0  }
   0x8 LB: > { %s5050_s25 = sadd.s32 4294967295, %s4923_s24   ;;  %p4012_p0 = scmp.ge.s32.totalorder %s4923_s24, 1  ;;  %s4923_s24 = sphi %s5044_s24, %s29_s24  }
   0x9   : > { %p478_p1 = scmp.lt.s32.totalorder %s4923_s24, 5 }
   0xb   : > { %p479_p2 = pnand %p4012_p0, %p478_p1 }
   0xd   : > { %482 = sbr.rel (%p479_p2) target bundleno = 2483 (0x9b3), region = 80 }
  0x14   : > { %p525_p3 = scmp.lt.s32.totalorder %s5050_s25, 3  ;;  %p531_p4 = scmp.gt.s32.totalorder %s5050_s25, 0 }
  0x15   : > { %s6408_s30 = sld [smem:[#allocation23_spill]]  ;;  %p4015_p5 = scmp.ne.s32.totalorder %s5050_s25, 0 }
  0x16   : > { %s526_s26 = scalar_select %p525_p3, %s5050_s25, 3 }
  0x17   : > { %s5057_s27 = scalar_select %p531_p4, 1, 0 }
  0x18   : > { %s4318_s28 = sshll.u32 %s526_s26, 4  ;;  %537 = sbr.rel (%p4015_p5) target bundleno = 31 (0x1f), region = 84  ;;  %vm548_vm0 = vcmask (!%p4015_p5), 8192   ;;  %v4925_v0 = vmov (!%p4015_p5), 0.0  }
  0x19   : > { %s6397_s19 = scvt.s32.f32 %s5057_s27  ;;  %538 = vst [vmem:[#allocation2] sm:$0xff] (!%p4015_p5), %v4925_v0  ;;  %539 = vst [vmem:[#allocation2 + $0x8] sm:$0xff] (!%p4015_p5), %v4925_v0 }
  0x1a   : > { %540 = vst [vmem:[#allocation2 + $0x10] sm:$0xff] (!%p4015_p5), %v4925_v0  ;;  %541 = vst [vmem:[#allocation2 + $0x18] sm:$0xff] (!%p4015_p5), %v4925_v0 }
  0x1b   : > { %s5062_s18 = scalar_lea.vmem %s6408_s30, %s4318_s28  ;;  %542 = vst [vmem:[#allocation3] sm:$0xff] (!%p4015_p5), %v4925_v0  ;;  %543 = vst [vmem:[#allocation3 + $0x8] sm:$0xff] (!%p4015_p5), %v4925_v0 }
  0x1c   : > { %544 = vst [vmem:[#allocation3 + $0x10] sm:$0xff] (!%p4015_p5), %v4925_v0  ;;  %545 = vst [vmem:[#allocation3 + $0x18] sm:$0xff] (!%p4015_p5), %v4925_v0 }
  0x1d   : > { %546 = vst [vmem:[#allocation5] sm:$0xff] (!%p4015_p5), %v4925_v0  ;;  %547 = vst [vmem:[#allocation6] sm:$0xff] (!%p4015_p5), %v4925_v0 }
  0x1e   : > { %549 = vst.msk [vmem:[#allocation8] sm:$0x1] (!%p4015_p5), %vm548_vm0, %v4925_v0 }
  0x1f PF: > { %s6374_s1 = smov 17   ;;  %s6372_s20 = smov 16   ;;  %v6376_v7 = vmov 0   ;;  %v572_v11 = vlaneseq  ;;  %vm1111_vm9 = vcmask 1043456   ;;  %vm1107_vm10 = vcmask 588800  }
  0x20   : > { %v5068_v2 = vld [vmem:[#allocation2] sm:$0xff]  ;;  %v5076_v4 = vld [vmem:[#allocation2 + $0x8] sm:$0xff]  ;;  %s6366_s21 = smov 15   ;;  %s6370_s22 = smov 1   ;;  %1156 = vmatprep.mubr.bf16.mxu0 %v6376_v7  ;;  %1197 = vmatprep.mubr.bf16.mxu1 %v6376_v7  ;;  %vm4942_vm11 = vmmov 0   ;;  %vm1425_vm12 = vcmask 7168  }
  0x21   : > { %v5066_v1 = vld [vmem:[#allocation2 + $0x10] sm:$0xff]  ;;  %564 = vrot.lane.b32.xlu0 %v5068_v2, %s6374_s1  ;;  %v5074_v3 = vld [vmem:[#allocation2 + $0x18] sm:$0xff]  ;;  %v4327_v5 = vpack.c.bf16 %v5076_v4, %v5068_v2  ;;  %s6398_s23 = smov 127   ;;  %s6360_s26 = smov 113   ;;  %4582 = vset.pattern.permute.xlu1 %v6376_v7  ;;  %v5159_v12 = vshrl.u32 %v572_v11, 7  ;;  %v5161_v13 = vand.u32 127, %v572_v11 }
  0x22   : > { %568 = vrot.lane.b32.xlu1 %v5066_v1, %s6374_s1  ;;  %v4328_v6 = vpack.c.bf16 %v5074_v3, %v5066_v1  ;;  %s6358_s28 = smov 112   ;;  %s6362_s29 = smov 111   ;;  %4551 = vset.pattern.permute.xlu0 %v6376_v7  ;;  %vm2515_vm13 = vcmask 8192   ;;  %vm2343_vm14 = vcmask 523264  }
  0x23   : > { %786 = vst [vmem:[#allocation4 + $0x160] sm:$0xff] %v4327_v5  ;;  %s6409_s8 = sld [smem:[#allocation26_spill]]  ;;  %v5164_v14 = vsub.s32 0, %v5159_v12  ;;  %vm574_vm1 = vcmp.lt.s32.totalorder %v5161_v13, 17  ;;  %v5204_v27 = vsub.s32 1, %v5159_v12  ;;  %vm625_vm2 = vcmp.lt.s32.totalorder %v5161_v13, 16 }
  0x24   : > { %787 = vst [vmem:[#allocation4 + $0x168] sm:$0xff] %v4328_v6  ;;  %v5141_v8 = vld [vmem:[#allocation5] sm:$0xff]  ;;  %v5244_v50 = vsub.s32 2, %v5159_v12  ;;  %vm676_vm3 = vcmp.lt.s32.totalorder %v5161_v13, 15  ;;  %vm727_vm4 = vcmp.lt.s32.totalorder %v5161_v13, 1  ;;  %vm796_vm5 = vcmp.lt.s32.totalorder %v5161_v13, 127 }
  0x25   : > { %566 = vrot.lane.b32.xlu0 %v5076_v4, %s6374_s1  ;;  %v1256_v9 = vpack.c.bf16 %v5141_v8, %v5141_v8  ;;  %vm847_vm6 = vcmp.lt.s32.totalorder %v5161_v13, 113  ;;  %vm898_vm7 = vcmp.lt.s32.totalorder %v5161_v13, 112  ;;  %vm949_vm8 = vcmp.lt.s32.totalorder %v5161_v13, 111  ;;  %s6417_s7 = sld [smem:[#allocation25_spill]]  ;;  %s6424_s0 = smov 16  }
  0x26   : > { %570 = vrot.lane.b32.xlu1 %v5074_v3, %s6374_s1  ;;  %s6426_s11 = sld [smem:[#allocation27_spill]]  ;;  %s6431_s30 = smov 112  }
  0x27   : > { %1257 = vst [vmem:[#allocation7 + $0x58] sm:$0xf] %v1256_v9  ;;  %s6432_s1 = smov 111   ;;  %s6433_s13 = sld [smem:[#allocation28_spill]] }
  0x28   : > { %p4161_p6 = scmp.ge.s32.totalorder %s5050_s25, 3 }
  0x29   : > { %617 = vrot.lane.b32.xlu0 %v5068_v2, %s6372_s20  ;;  %v1011_v10 = vld [vmem:[%s6409_s8] sm:$0xf]  ;;  %vm2675_vm15 = vcmask (!%p4161_p6), 719872   ;;  %s4948_s8 = smov (!%p4161_p6), 1  }
  0x2a   : > { %619 = vrot.lane.b32.xlu1 %v5076_v4, %s6372_s20 }
  0x2d   : > { %621 = vrot.lane.b32.xlu0 %v5066_v1, %s6372_s20 }
  0x2e   : > { %623 = vrot.lane.b32.xlu1 %v5074_v3, %s6372_s20  ;;  %s6428_s20 = smov 15  }
  0x31   : > { %668 = vrot.lane.b32.xlu0 %v5068_v2, %s6366_s21 }
  0x32   : > { %670 = vrot.lane.b32.xlu1 %v5076_v4, %s6366_s21 }
  0x35   : > { %672 = vrot.lane.b32.xlu0 %v5066_v1, %s6366_s21 }
  0x36   : > { %674 = vrot.lane.b32.xlu1 %v5074_v3, %s6366_s21  ;;  %s6395_s21 = smov 7  }
  0x39   : > { %719 = vrot.lane.b32.xlu0 %v5068_v2, %s6370_s22 }
  0x3a   : > { %721 = vrot.lane.b32.xlu1 %v5076_v4, %s6370_s22 }
  0x3d   : > { %723 = vrot.lane.b32.xlu0 %v5066_v1, %s6370_s22 }
  0x3e   : > { %725 = vrot.lane.b32.xlu1 %v5074_v3, %s6370_s22 }
  0x41   : > { %788 = vrot.lane.b32.xlu0 %v5068_v2, %s6398_s23 }
  0x42   : > { %790 = vrot.lane.b32.xlu1 %v5076_v4, %s6398_s23 }
  0x45   : > { %792 = vrot.lane.b32.xlu0 %v5066_v1, %s6398_s23 }
  0x46   : > { %794 = vrot.lane.b32.xlu1 %v5074_v3, %s6398_s23 }
  0x49   : > { %839 = vrot.lane.b32.xlu0 %v5068_v2, %s6360_s26 }
  0x4a   : > { %841 = vrot.lane.b32.xlu1 %v5076_v4, %s6360_s26 }
  0x4d   : > { %843 = vrot.lane.b32.xlu0 %v5066_v1, %s6360_s26 }
  0x4e   : > { %845 = vrot.lane.b32.xlu1 %v5074_v3, %s6360_s26  ;;  %s6368_s26 = smov 8  }
  0x51   : > { %890 = vrot.lane.b32.xlu0 %v5068_v2, %s6358_s28 }
  0x52   : > { %892 = vrot.lane.b32.xlu1 %v5076_v4, %s6358_s28 }
  0x55   : > { %894 = vrot.lane.b32.xlu0 %v5066_v1, %s6358_s28 }
  0x56   : > { %896 = vrot.lane.b32.xlu1 %v5074_v3, %s6358_s28  ;;  %s6364_s28 = smov 9  }
  0x59   : > { %941 = vrot.lane.b32.xlu0 %v5068_v2, %s6362_s29 }
  0x5a   : > { %943 = vrot.lane.b32.xlu1 %v5076_v4, %s6362_s29 }
  0x5d   : > { %945 = vrot.lane.b32.xlu0 %v5066_v1, %s6362_s29 }
  0x5e   : > { %947 = vrot.lane.b32.xlu1 %v5074_v3, %s6362_s29  ;;  %s6410_s29 = sld [smem:[#allocation24_spill]] }
  0x61   : > { %1014 = vperm.xlu0 %4551, %v1011_v10  }
  0x62   : > { %1220 = vrot.lane.b32.xlu1 %v5141_v8, %s6364_s28  ;;  %s6389_s28 = smov 119  }
  0x64   : > { %v5169_v15 = vld [vmem:[%s6410_s29] sm:$0xff]  ;;  %v5174_v16 = vld [vmem:[%s6410_s29 + $0x18] sm:$0xff]  ;;  %v5179_v17 = vld [vmem:[%s6410_s29 + $0x8] sm:$0xff] }
  0x65   : > { %v5184_v18 = vld [vmem:[%s6410_s29 + $0x10] sm:$0xff]  ;;  %v5189_v21 = vrot.slane %v5169_v15, %v5164_v14  ;;  %v5193_v22 = vrot.slane %v5174_v16, %v5164_v14  ;;  %v5197_v23 = vrot.slane %v5179_v17, %v5164_v14  ;;  %v5221_v40 = vrot.slane %v5179_v17, %v5204_v27  ;;  %1238 = vrot.lane.b32.xlu0 %v5141_v8, %s6395_s21  ;;  %s6442_s21 = smov 119  }
  0x66   : > { %1229 = vrot.lane.b32.xlu1 %v5141_v8, %s6368_s26  ;;  %v5201_v24 = vrot.slane %v5184_v18, %v5164_v14  ;;  %v5225_v41 = vrot.slane %v5169_v15, %v5204_v27  ;;  %v5229_v42 = vrot.slane %v5184_v18, %v5204_v27  ;;  %v5233_v43 = vrot.slane %v5174_v16, %v5204_v27  ;;  %s6391_s26 = smov 120  }
  0x67   : > { %6411 = vst [vmem:[#allocation11_spill] sm:$0xff] %v5189_v21  ;;  %6412 = vst [vmem:[#allocation12_spill] sm:$0xff] %v5193_v22  ;;  %v5253_v59 = vrot.slane %v5179_v17, %v5244_v50  ;;  %v5257_v60 = vrot.slane %v5169_v15, %v5244_v50  ;;  %v5261_v61 = vrot.slane %v5184_v18, %v5244_v50 }
  0x68   : > { %6413 = vst [vmem:[#allocation13_spill] sm:$0xff] %v5197_v23  ;;  %6414 = vst [vmem:[#allocation14_spill] sm:$0xff] %v5229_v42  ;;  %v5265_v62 = vrot.slane %v5174_v16, %v5244_v50 }
  0x69   : > { %1258 = vrot.lane.b32.xlu0 %v5141_v8, %s6398_s23 }
  0x6a   : > { %1247 = vrot.lane.b32.xlu1 %v5141_v8, %s6370_s22  ;;  %s6393_s22 = smov 121  }
  0x6d   : > { %1276 = vrot.lane.b32.xlu0 %v5141_v8, %s6391_s26  ;;  %s6434_s26 = smov 127  }
  0x6e   : > { %1267 = vrot.lane.b32.xlu1 %v5141_v8, %s6393_s22 }
  0x72   : > { %1285 = vrot.lane.b32.xlu1 %v5141_v8, %s6389_s28  ;;  %s4946_s28 = smov (!%p4161_p6), 16  }
  0x93   : > { %v565_v20 = vpop.permute.xlu0 %564 }
  0x94   : > { %v569_v19 = vpop.permute.xlu1 %568 }
  0x97   : > { %v567_v26 = vpop.permute.xlu0 %566 }
  0x98   : > { %v571_v25 = vpop.permute.xlu1 %570  ;;  %v576_v30 = vsel %vm574_vm1, %v567_v26, %v569_v19  ;;  %v577_v31 = vsel %vm574_vm1, %v565_v20, %v567_v26  ;;  %v5276_v26 = vsub.s32 3, %v5159_v12 }
  0x99   : > { %v575_v28 = vsel %vm574_vm1, %v569_v19, %v571_v25  ;;  %v578_v29 = vsel %vm574_vm1, %v571_v25, %v565_v20  ;;  %v596_v34 = vmul.f32 %v5197_v23, %v577_v31  ;;  %v597_v35 = vmul.f32 %v5201_v24, %v576_v30 }
  0x9a   : > { %v595_v32 = vmul.f32 %v5189_v21, %v578_v29  ;;  %v598_v33 = vmul.f32 %v5193_v22, %v575_v28 }
  0x9b   : > { %v618_v39 = vpop.permute.xlu0 %617 }
  0x9c   : > { %v4319_v36 = vpack.c.bf16 %v596_v34, %v595_v32  ;;  %v4320_v37 = vpack.c.bf16 %v598_v33, %v597_v35  ;;  %v620_v38 = vpop.permute.xlu1 %619 }
  0x9d   : > { %v628_v44 = vsel %vm625_vm2, %v618_v39, %v620_v38 }
  0x9e   : > { %615 = vst [vmem:[#allocation4 + $0x120] sm:$0xff] %v4319_v36  ;;  %616 = vst [vmem:[#allocation4 + $0x128] sm:$0xff] %v4320_v37  ;;  %v647_v51 = vmul.f32 %v5221_v40, %v628_v44  ;;  %v5285_v36 = vrot.slane %v5179_v17, %v5276_v26  ;;  %v5289_v37 = vrot.slane %v5169_v15, %v5276_v26 }
  0x9f   : > { %v622_v46 = vpop.permute.xlu0 %621 }
  0xa0   : > { %v624_v45 = vpop.permute.xlu1 %623  ;;  %v627_v49 = vsel %vm625_vm2, %v620_v38, %v622_v46  ;;  %v4831_v63 = vpack.c.bf16 %v647_v51, %v596_v34  ;;  %v5293_v38 = vrot.slane %v5184_v18, %v5276_v26 }
  0xa1   : > { %v629_v47 = vsel %vm625_vm2, %v624_v45, %v618_v39  ;;  %v626_v48 = vsel %vm625_vm2, %v622_v46, %v624_v45  ;;  %v648_v53 = vmul.f32 %v5229_v42, %v627_v49  ;;  %v5297_v39 = vrot.slane %v5174_v16, %v5276_v26 }
  0xa2   : > { %v646_v52 = vmul.f32 %v5225_v41, %v629_v47  ;;  %v649_v54 = vmul.f32 %v5233_v43, %v626_v48  ;;  %1124 = vmatprep.subr.bf16.mxu0 %v4831_v63 }
  0xa3   : > { %v669_v58 = vpop.permute.xlu0 %668  ;;  %v4834_v9 = vpack.c.bf16 %v648_v53, %v597_v35  ;;  %6415 = vst [vmem:[#allocation15_spill] sm:$0xff] %v5297_v39 }
  0xa4   : > { %v4321_v55 = vpack.c.bf16 %v647_v51, %v646_v52  ;;  %v4322_v56 = vpack.c.bf16 %v649_v54, %v648_v53  ;;  %v671_v57 = vpop.permute.xlu1 %670  ;;  %v4832_v0 = vpack.c.bf16 %v649_v54, %v598_v33  ;;  %v4833_v5 = vpack.c.bf16 %v646_v52, %v595_v32 }
  0xa5   : > { %v679_v6 = vsel %vm676_vm3, %v669_v58, %v671_v57  ;;  %v5308_v51 = vsub.s32 5, %v5159_v12 }
  0xa6   : > { %666 = vst [vmem:[#allocation4 + $0x130] sm:$0xff] %v4321_v55  ;;  %667 = vst [vmem:[#allocation4 + $0x138] sm:$0xff] %v4322_v56  ;;  %1165 = vmatprep.subr.bf16.mxu1 %v4832_v0  ;;  %1125 = vmatpush1.bf16.msra.mxu0 %v4833_v5  ;;  %v698_v28 = vmul.f32 %v5253_v59, %v679_v6 }
  0xa7   : > { %v673_v11 = vpop.permute.xlu0 %672  ;;  %1166 = vmatpush1.bf16.msra.mxu1 %v4834_v9  ;;  %v5317_v0 = vrot.slane %v5169_v15, %v5308_v51  ;;  %v5321_v5 = vrot.slane %v5174_v16, %v5308_v51  ;;  %v5325_v6 = vrot.slane %v5179_v17, %v5308_v51  ;;  %v5329_v9 = vrot.slane %v5184_v18, %v5308_v51 }
  0xa8   : > { %v675_v10 = vpop.permute.xlu1 %674  ;;  %v678_v25 = vsel %vm676_vm3, %v671_v57, %v673_v11 }
  0xa9   : > { %v680_v19 = vsel %vm676_vm3, %v675_v10, %v669_v58  ;;  %v677_v20 = vsel %vm676_vm3, %v673_v11, %v675_v10  ;;  %v699_v30 = vmul.f32 %v5261_v61, %v678_v25 }
  0xaa   : > { %v697_v29 = vmul.f32 %v5257_v60, %v680_v19  ;;  %v700_v31 = vmul.f32 %v5265_v62, %v677_v20 }
  0xab   : > { %v720_v35 = vpop.permute.xlu0 %719 }
  0xac   : > { %v4323_v32 = vpack.c.bf16 %v698_v28, %v697_v29  ;;  %v4324_v33 = vpack.c.bf16 %v700_v31, %v699_v30  ;;  %v722_v34 = vpop.permute.xlu1 %721 }
  0xad   : > { %v730_v44 = vsel %vm727_vm4, %v720_v35, %v722_v34  ;;  %v4720_v13 = vld [vmem:[#allocation4 + $0x128] ss:$16 sps:$4 sm:$0xff] (!%p4161_p6)  }
  0xae   : > { %717 = vst [vmem:[#allocation4 + $0x140] sm:$0xff] %v4323_v32  ;;  %718 = vst [vmem:[#allocation4 + $0x148] sm:$0xff] %v4324_v33  ;;  %v749_v52 = vmul.f32 %v5285_v36, %v730_v44 }
  0xaf   : > { %v724_v46 = vpop.permute.xlu0 %723 }
  0xb0   : > { %v726_v45 = vpop.permute.xlu1 %725  ;;  %v729_v49 = vsel %vm727_vm4, %v722_v34, %v724_v46  ;;  %v4835_v10 = vpack.c.bf16 %v749_v52, %v698_v28  ;;  %v5340_v28 = vsub.s32 6, %v5159_v12 }
  0xb1   : > { %v731_v47 = vsel %vm727_vm4, %v726_v45, %v720_v35  ;;  %v728_v48 = vsel %vm727_vm4, %v724_v46, %v726_v45  ;;  %v750_v54 = vmul.f32 %v5293_v38, %v729_v49 }
  0xb2   : > { %v748_v53 = vmul.f32 %v5289_v37, %v731_v47  ;;  %v751_v55 = vmul.f32 %v5297_v39, %v728_v48  ;;  %1126 = vmatprep.subr.bf16.mxu0 %v4835_v10 }
  0xb3   : > { %v789_v63 = vpop.permute.xlu0 %788  ;;  %v4838_v25 = vpack.c.bf16 %v750_v54, %v699_v30 }
  0xb4   : > { %v4325_v56 = vpack.c.bf16 %v749_v52, %v748_v53  ;;  %v4326_v57 = vpack.c.bf16 %v751_v55, %v750_v54  ;;  %v791_v58 = vpop.permute.xlu1 %790  ;;  %v4836_v11 = vpack.c.bf16 %v751_v55, %v700_v31  ;;  %v4837_v19 = vpack.c.bf16 %v748_v53, %v697_v29 }
  0xb5   : > { %v799_v20 = vsel %vm796_vm5, %v789_v63, %v791_v58  ;;  %v5349_v52 = vrot.slane %v5169_v15, %v5340_v28  ;;  %v5353_v53 = vrot.slane %v5174_v16, %v5340_v28  ;;  %v5357_v54 = vrot.slane %v5179_v17, %v5340_v28 }
  0xb6   : > { %768 = vst [vmem:[#allocation4 + $0x150] sm:$0xff] %v4325_v56  ;;  %769 = vst [vmem:[#allocation4 + $0x158] sm:$0xff] %v4326_v57  ;;  %1167 = vmatprep.subr.bf16.mxu1 %v4836_v11  ;;  %1127 = vmatpush1.bf16.msra.mxu0 %v4837_v19  ;;  %v817_v29 = vmul.f32 %v5317_v0, %v799_v20  ;;  %v5361_v55 = vrot.slane %v5184_v18, %v5340_v28 }
  0xb7   : > { %v793_v33 = vpop.permute.xlu0 %792  ;;  %1168 = vmatpush1.bf16.msra.mxu1 %v4838_v25 }
  0xb8   : > { %v795_v32 = vpop.permute.xlu1 %794  ;;  %v798_v44 = vsel %vm796_vm5, %v791_v58, %v793_v33  ;;  %v4841_v58 = vpack.c.bf16 %v817_v29, %v5068_v2  ;;  %v5376_v2 = vsub.s32 7, %v5159_v12 }
  0xb9   : > { %v800_v34 = vsel %vm796_vm5, %v795_v32, %v789_v63  ;;  %v797_v35 = vsel %vm796_vm5, %v793_v33, %v795_v32  ;;  %v818_v31 = vmul.f32 %v5325_v6, %v798_v44 }
  0xba   : > { %v820_v30 = vmul.f32 %v5321_v5, %v800_v34  ;;  %v819_v45 = vmul.f32 %v5329_v9, %v797_v35  ;;  %v5385_v12 = vrot.slane %v5169_v15, %v5376_v2 }
  0xbb   : > { %v4329_v46 = vpack.c.bf16 %v818_v31, %v817_v29  ;;  %v840_v49 = vpop.permute.xlu0 %839  ;;  %v4839_v56 = vpack.c.bf16 %v818_v31, %v5076_v4  ;;  %v5393_v31 = vrot.slane %v5179_v17, %v5376_v2 }
  0xbc   : > { %v4330_v47 = vpack.c.bf16 %v820_v30, %v819_v45  ;;  %v842_v48 = vpop.permute.xlu1 %841  ;;  %v4840_v57 = vpack.c.bf16 %v820_v30, %v5074_v3  ;;  %v4842_v10 = vpack.c.bf16 %v819_v45, %v5066_v1  ;;  %v5389_v30 = vrot.slane %v5174_v16, %v5376_v2 }
  0xbd   : > { %837 = vst [vmem:[#allocation4 + $0x170] sm:$0xff] %v4329_v46  ;;  %v850_v63 = vsel %vm847_vm6, %v840_v49, %v842_v48  ;;  %1128 = vmatprep.subr.bf16.mxu0 %v4839_v56  ;;  %v5397_v45 = vrot.slane %v5184_v18, %v5376_v2 }
  0xbe   : > { %838 = vst [vmem:[#allocation4 + $0x178] sm:$0xff] %v4330_v47  ;;  %1169 = vmatprep.subr.bf16.mxu1 %v4840_v57  ;;  %1129 = vmatpush1.bf16.msra.mxu0 %v4841_v58  ;;  %v868_v1 = vmul.f32 %v5349_v52, %v850_v63 }
  0xbf   : > { %v844_v19 = vpop.permute.xlu0 %843  ;;  %1170 = vmatpush1.bf16.msra.mxu1 %v4842_v10 }
  0xc0   : > { %v846_v11 = vpop.permute.xlu1 %845  ;;  %v849_v3 = vsel %vm847_vm6, %v842_v48, %v844_v19 }
  0xc1   : > { %v851_v20 = vsel %vm847_vm6, %v846_v11, %v840_v49  ;;  %v848_v25 = vsel %vm847_vm6, %v844_v19, %v846_v11  ;;  %v869_v32 = vmul.f32 %v5357_v54, %v849_v3  ;;  %v5415_v19 = vld [vmem:[%s6410_s29 + $0x20] ss:$0 sm:$0xff] }
  0xc2   : > { %v871_v4 = vmul.f32 %v5353_v53, %v851_v20  ;;  %v870_v33 = vmul.f32 %v5361_v55, %v848_v25 }
  0xc3   : > { %v4331_v34 = vpack.c.bf16 %v869_v32, %v868_v1  ;;  %v891_v29 = vpop.permute.xlu0 %890 }
  0xc4   : > { %v4332_v35 = vpack.c.bf16 %v871_v4, %v870_v33  ;;  %v893_v44 = vpop.permute.xlu1 %892 }
  0xc5   : > { %888 = vst [vmem:[#allocation4 + $0x180] sm:$0xff] %v4331_v34  ;;  %v901_v46 = vsel %vm898_vm7, %v891_v29, %v893_v44 }
  0xc6   : > { %889 = vst [vmem:[#allocation4 + $0x188] sm:$0xff] %v4332_v35  ;;  %v919_v17 = vmul.f32 %v5385_v12, %v901_v46  ;;  %v5422_v35 = vld [vmem:[%s6410_s29 + $0x38] ss:$0 sm:$0xff] }
  0xc7   : > { %v895_v48 = vpop.permute.xlu0 %894  ;;  %6416 = vst [vmem:[#allocation16_spill] sm:$0xff] %v5422_v35 }
  0xc8   : > { %v897_v47 = vpop.permute.xlu1 %896  ;;  %v900_v49 = vsel %vm898_vm7, %v893_v44, %v895_v48  ;;  %v4845_v3 = vpack.c.bf16 %v919_v17, %v868_v1  ;;  %v5427_v44 = vld [vmem:[%s6410_s29 + $0x28] ss:$0 sm:$0xff] }
  0xc9   : > { %v902_v15 = vsel %vm898_vm7, %v897_v47, %v891_v29  ;;  %v899_v16 = vsel %vm898_vm7, %v895_v48, %v897_v47  ;;  %v920_v18 = vmul.f32 %v5393_v31, %v900_v49  ;;  %v5432_v29 = vld [vmem:[%s6410_s29 + $0x30] ss:$0 sm:$0xff] }
  0xca   : > { %v922_v56 = vmul.f32 %v5389_v30, %v902_v15  ;;  %v921_v57 = vmul.f32 %v5397_v45, %v899_v16 }
  0xcb   : > { %v4333_v58 = vpack.c.bf16 %v920_v18, %v919_v17  ;;  %v942_v11 = vpop.permute.xlu0 %941  ;;  %v4843_v20 = vpack.c.bf16 %v920_v18, %v869_v32 }
  0xcc   : > { %v4334_v63 = vpack.c.bf16 %v922_v56, %v921_v57  ;;  %v944_v10 = vpop.permute.xlu1 %943  ;;  %v4844_v25 = vpack.c.bf16 %v922_v56, %v871_v4  ;;  %v4846_v4 = vpack.c.bf16 %v921_v57, %v870_v33 }
  0xcd   : > { %939 = vst [vmem:[#allocation4 + $0x190] sm:$0xff] %v4333_v58  ;;  %v952_v34 = vsel %vm949_vm8, %v942_v11, %v944_v10  ;;  %1130 = vmatprep.subr.bf16.mxu0 %v4843_v20  ;;  %v992_v20 = vld [vmem:[%s6417_s7] sm:$0x3]  ;;  %s4947_s7 = smov (!%p4161_p6), 15  }
  0xce   : > { %940 = vst [vmem:[#allocation4 + $0x198] sm:$0xff] %v4334_v63  ;;  %1171 = vmatprep.subr.bf16.mxu1 %v4844_v25  ;;  %1131 = vmatpush1.bf16.msra.mxu0 %v4845_v3  ;;  %v970_v15 = vmul.f32 %v5415_v19, %v952_v34  ;;  %v558_v3 = vld [vmem:[%s6341_s2] sm:$0xff] }
  0xcf   : > { %v946_v32 = vpop.permute.xlu0 %945  ;;  %1172 = vmatpush1.bf16.msra.mxu1 %v4846_v4  ;;  %v5468_v34 = vrot.slane %v558_v3, %v5164_v14  ;;  %v5471_v4 = vrot.slane %v558_v3, %v5204_v27 }
  0xd0   : > { %v948_v1 = vpop.permute.xlu1 %947  ;;  %v951_v48 = vsel %vm949_vm8, %v944_v10, %v946_v32  ;;  %v4849_v58 = vpack.c.bf16 %v970_v15, %v970_v15 }
  0xd1   : > { %v953_v46 = vsel %vm949_vm8, %v948_v1, %v942_v11  ;;  %v950_v47 = vsel %vm949_vm8, %v946_v32, %v948_v1  ;;  %v971_v33 = vmul.f32 %v5427_v44, %v951_v48  ;;  %v6383_v1 = vmov 0.0  }
  0xd2   : > { %v973_v16 = vmul.f32 %v5422_v35, %v953_v46  ;;  %v972_v49 = vmul.f32 %v5432_v29, %v950_v47  ;;  %v1113_v10 = vsel %vm1111_vm9, %v4849_v58, 0  ;;  %v5477_v48 = vrot.slane %v558_v3, %v5276_v26 }
  0xd3   : > { %v4335_v17 = vpack.c.bf16 %v971_v33, %v970_v15  ;;  %v4847_v18 = vpack.c.bf16 %v971_v33, %v971_v33 }
  0xd4   : > { %v4336_v56 = vpack.c.bf16 %v973_v16, %v972_v49  ;;  %v4848_v57 = vpack.c.bf16 %v973_v16, %v973_v16  ;;  %v4850_v63 = vpack.c.bf16 %v972_v49, %v972_v49  ;;  %v1221_v25 = vpop.permute.xlu1 %1220 }
  0xd5   : > { %990 = vst [vmem:[#allocation4 + $0x1a0] sm:$0xff] %v4335_v17  ;;  %4058 = vmatprep.subr.msk.bf16.mxu0 %vm1111_vm9, %v4847_v18  ;;  %v1226_v32 = vmul.f32 %v5468_v34, %v1221_v25  ;;  %v5482_v17 = vrot.slane %v558_v3, %v5244_v50  ;;  %v5486_v18 = vrot.slane %v558_v3, %v5308_v51 }
  0xd6   : > { %991 = vst [vmem:[#allocation4 + $0x1a8] sm:$0xff] %v4336_v56  ;;  %4060 = vmatprep.subr.msk.bf16.mxu1 %vm1111_vm9, %v4848_v57  ;;  %v1119_v11 = vsel %vm1111_vm9, %v4850_v63, 0  ;;  %1133 = vmatpush1.bf16.msra.mxu0 %v1113_v10  ;;  %v5490_v10 = vrot.slane %v558_v3, %v5340_v28 }
  0xd7   : > { %1174 = vmatpush1.bf16.msra.mxu1 %v1119_v11  ;;  %4494 = vmatprep.subr.bf16.mxu0 %v6383_v1  ;;  %v1227_v47 = vpack.c.bf16 %v1226_v32, %v1226_v32  ;;  %v5493_v11 = vrot.slane %v558_v3, %v5376_v2  ;;  %v4062_v3 = vld [vmem:[%s6341_s2 + $0x8] ss:$0 sm:$0xff] }
  0xd8   : > { %v1230_v46 = vpop.permute.xlu1 %1229 }
  0xd9   : > { %4059 = vmatmul.mubr.msk.bf16.vlgmr.msra.gmra.mrb[0].mxu0 %vm1107_vm10, %v992_v20  ;;  %v1235_v8 = vmul.f32 %v5471_v4, %v1230_v46  ;;  %1228 = vst [vmem:[#allocation7 + $0x48] sm:$0xf] %v1227_v47  ;;  %6418 = vst [vmem:[#allocation17_spill] sm:$0xff] %v5493_v11 }
  0xda   : > { %4061 = vmatmul.mubr.msk.bf16.vlgmr.msra.gmra.mrb[0].mxu1 %vm1107_vm10, %v992_v20 }
  0xdb   : > { %1903 = vmatprep.mubr.bf16.mxu1 %v6376_v7  ;;  %v1236_v15 = vpack.c.bf16 %v1235_v8, %v1235_v8 }
  0xdc   : > { %v1248_v16 = vpop.permute.xlu1 %1247 }
  0xdd   : > { %1237 = vst [vmem:[#allocation7 + $0x4c] sm:$0xf] %v1236_v15  ;;  %v1253_v14 = vmul.f32 %v5477_v48, %v1248_v16 }
  0xdf   : > { %v1254_v27 = vpack.c.bf16 %v1253_v14, %v1253_v14 }
  0xe0   : > { %v1015_v49 = vpop.permute.xlu0 %1014  ;;  %v1268_v50 = vpop.permute.xlu1 %1267 }
  0xe1   : > { %1255 = vst [vmem:[#allocation7 + $0x54] sm:$0xf] %v1254_v27  ;;  %v1273_v32 = vmul.f32 %v5490_v10, %v1268_v50  ;;  %v1386_v50 = vld [vmem:[%s5062_s18 + $0x8] sm:$0xff] }
  0xe3   : > { %v1274_v14 = vpack.c.bf16 %v1273_v32, %v1273_v32  ;;  %v5504_v32 = vstv %s6397_s19  ;;  %s6438_s19 = smov 9  }
  0xe4   : > { %v4585_v33 = vld [vmem:[#allocation7 + $0x48] sm:$0xff]   ;;  %v1239_v56 = vpop.permute.xlu0 %1238  ;;  %v1286_v7 = vpop.permute.xlu1 %1285 }
  0xe5   : > { %4495 = vmatpush3.bf16.msra.mxu0 %v4585_v33  ;;  %v1244_v26 = vmul.f32 %v5482_v17, %v1239_v56  ;;  %1275 = vst [vmem:[#allocation7 + $0x60] sm:$0xf] %v1274_v14 }
  0xe6   : > { %4496 = vmatprep.subr.bf16.mxu0 %v6383_v1 }
  0xe7   : > { %v1245_v57 = vpack.c.bf16 %v1244_v26, %v1244_v26 }
  0xe8   : > { %v1259_v58 = vpop.permute.xlu0 %1258 }
  0xe9   : > { %1246 = vst [vmem:[#allocation7 + $0x50] sm:$0xf] %v1245_v57  ;;  %v1264_v63 = vmul.f32 %v5486_v18, %v1259_v58 }
  0xeb   : > { %v1265_v20 = vpack.c.bf16 %v1264_v63, %v1264_v63  ;;  %v1385_v63 = vld [vmem:[%s5062_s18] sm:$0xff]  ;;  %s6423_s18 = smov 17  }
  0xec   : > { %v1277_v25 = vpop.permute.xlu0 %1276 }
  0xed   : > { %1266 = vst [vmem:[#allocation7 + $0x5c] sm:$0xf] %v1265_v20  ;;  %v1282_v51 = vmul.f32 %v5493_v11, %v1277_v25 }
  0xef   : > { %v1283_v2 = vpack.c.bf16 %v1282_v51, %v1282_v51 }
  0xf0   : > { %v4586_v57 = vld [vmem:[#allocation7 + $0x50] sm:$0xff]  }
  0xf1   : > { %1284 = vst [vmem:[#allocation7 + $0x64] sm:$0xf] %v1283_v2  ;;  %4497 = vmatpush3.bf16.msra.mxu0 %v4586_v57 }
  0xf2   : > { %4498 = vmatprep.subr.bf16.mxu0 %v6383_v1 }
 0x1ac   : > { %v1158_v46 = vpop.f32.mrb[0].mxu0 }
 0x1ad   : > { %v1199_v47 = vpop.f32.mrb[0].mxu1  ;;  %v1159_v8 = vadd.f32 %v1158_v46, %v1015_v49  ;;  %v1160_v16 = vpop.f32.mrb[1].mxu0 }
 0x1ae   : > { %v1200_v15 = vadd.f32 %v1199_v47, %v1015_v49  ;;  %v1201_v28 = vpop.f32.mrb[1].mxu1  ;;  %v1161_v27 = vadd.f32 %v1160_v16, %v1015_v49  ;;  %v1162_v56 = vpop.f32.mrb[2].mxu0 }
 0x1af   : > { %v1202_v33 = vadd.f32 %v1201_v28, %v1015_v49  ;;  %v1203_v26 = vpop.f32.mrb[2].mxu1  ;;  %v1206_v58 = vmax.f32 %v1159_v8, 0.0  ;;  %v1163_v25 = vpop.f32.mrb[3].mxu0  ;;  %v1291_v28 = vmul.f32 %v4062_v3, %v1286_v7  ;;  %v1389_v56 = vcombine.high %v1385_v63, %v1385_v63 }
 0x1b0   : > { %v1208_v20 = vmax.f32 %v1200_v15, 0.0  ;;  %v1204_v46 = vpop.f32.mrb[3].mxu1  ;;  %v1207_v51 = vmax.f32 %v1161_v27, 0.0  ;;  %v1390_v26 = vcombine.high %v1386_v50, %v1386_v50  ;;  %v4587_v25 = vld [vmem:[#allocation7 + $0x58] sm:$0xff]  }
 0x1b1   : > { %v1209_v47 = vmax.f32 %v1202_v33, 0.0  ;;  %v1210_v16 = vmin.f32 %v1206_v58, 1.0  ;;  %v1292_v27 = vpack.c.bf16 %v1291_v28, %v1291_v28  ;;  %4499 = vmatpush3.bf16.msra.mxu0 %v4587_v25  ;;  %v4588_v46 = vld [vmem:[#allocation7 + $0x60] sm:$0xff]  }
 0x1b2   : > { %v1212_v49 = vmin.f32 %v1208_v20, 1.0  ;;  %v1211_v8 = vmin.f32 %v1207_v51, 1.0  ;;  %4500 = vmatprep.subr.bf16.mxu0 %v6383_v1 }
 0x1b3   : > { %v1213_v15 = vmin.f32 %v1209_v47, 1.0  ;;  %v5508_v14 = vmul.f32 %v5504_v32, %v1210_v16  ;;  %1293 = vst [vmem:[#allocation7 + $0x68] sm:$0xf] %v1292_v27 }
 0x1b4   : > { %v5511_v2 = vmul.f32 %v5504_v32, %v1212_v49  ;;  %v5514_v33 = vmul.f32 %v5504_v32, %v1211_v8 }
 0x1b5   : > { %6419 = vst [vmem:[#allocation18_spill] sm:$0xff] %v5508_v14  ;;  %v5517_v57 = vmul.f32 %v5504_v32, %v1213_v15  ;;  %v1393_v7 = vsub.f32 %v5508_v14, %v1385_v63  ;;  %4501 = vmatpush3.bf16.msra.mxu0 %v4588_v46 }
 0x1b6   : > { %6420 = vst [vmem:[#allocation19_spill] sm:$0xff] %v5511_v2  ;;  %6421 = vst [vmem:[#allocation20_spill] sm:$0xff] %v5514_v33  ;;  %v1395_v3 = vsub.f32 %v5511_v2, %v1386_v50  ;;  %v1394_v58 = vsub.f32 %v5514_v33, %v1389_v56  ;;  %4502 = vmatprep.subr.bf16.mxu0 %v6383_v1 }
 0x1b7   : > { %6422 = vst [vmem:[#allocation21_spill] sm:$0xff] %v5517_v57  ;;  %v1396_v20 = vsub.f32 %v5517_v57, %v1390_v26  ;;  %v1427_v51 = vsub.f32 0.0, %v1393_v7  ;;  %v1397_v49 = vmul.f32 %v1393_v7, %v1393_v7 }
 0x1b8   : > { %v1429_v47 = vsub.f32 0.0, %v1395_v3  ;;  %v1399_v16 = vmul.f32 %v1395_v3, %v1395_v3  ;;  %v1428_v28 = vsub.f32 0.0, %v1394_v58  ;;  %v1398_v25 = vmul.f32 %v1394_v58, %v1394_v58 }
 0x1b9   : > { %v1430_v8 = vsub.f32 0.0, %v1396_v20  ;;  %v1400_v15 = vmul.f32 %v1396_v20, %v1396_v20  ;;  %v1435_v63 = vrot.slane %v1427_v51, 4  ;;  %v1401_v56 = vsel %vm1111_vm9, %v1397_v49, 0.0 }
 0x1ba   : > { %v1437_v14 = vrot.slane %v1429_v47, 4  ;;  %v1413_v50 = vsel %vm1111_vm9, %v1399_v16, 0.0  ;;  %v1436_v27 = vrot.slane %v1428_v28, 4  ;;  %v1402_v57 = vsel %vm1111_vm9, %v1398_v25, 0.0  ;;  %v4589_v28 = vld [vmem:[#allocation7 + $0x68] ss:$0 sps:$4 sm:$0xff]  }
 0x1bb   : > { %v1438_v26 = vrot.slane %v1430_v8, 4  ;;  %v1414_v2 = vsel %vm1111_vm9, %v1400_v15, 0.0  ;;  %v1443_v33 = vsel %vm1111_vm9, %v1393_v7, %v1435_v63  ;;  %v5533_v51 = vadd.f32 %v1402_v57, %v1401_v56  ;;  %v1294_v7 = vld [vmem:[%s6426_s11] sm:$0xf]  ;;  %s4949_s11 = smov (!%p4161_p6), 127  }
 0x1bc   : > { %v1445_v46 = vsel %vm1111_vm9, %v1395_v3, %v1437_v14  ;;  %v5531_v11 = vadd.f32 %v1414_v2, %v1413_v50  ;;  %v5535_v47 = vmax.f32 %v1443_v33, 0.0  ;;  %v1444_v16 = vsel %vm1111_vm9, %v1394_v58, %v1436_v27  ;;  %v1760_v58 = vld [vmem:[%s6353_s14] sm:$0xff] }
 0x1bd   : > { %v5537_v1 = vmax.f32 %v1445_v46, 0.0  ;;  %v1446_v49 = vsel %vm1111_vm9, %v1396_v20, %v1438_v26  ;;  %v5541_v8 = vmax.f32 %v1444_v16, 0.0  ;;  %v1341_v14 = vsel %vm1111_vm9, %v4589_v28, 0 }
 0x1be   : > { %v5543_v15 = vmax.f32 %v1446_v49, 0.0  ;;  %1451 = vrot.lane.b32.xlu0 %v5535_v47, %s6423_s18  ;;  %4503 = vmatpush3.bf16.msra.mxu0 %v1341_v14  ;;  %v6425_v57 = vmov 0.0   ;;  %v6427_v3 = vmov 0  }
 0x1bf   : > { %1453 = vrot.lane.b32.xlu1 %v5541_v8, %s6423_s18  ;;  %v4345_v2 = vpack.c.bf16 %v5541_v8, %v5535_v47  ;;  %4504 = vmatprep.mubr.msk.bf16.mxu0 %vm4942_vm11, %v6425_v57 }
 0x1c0   : > { %v4346_v33 = vpack.c.bf16 %v5543_v15, %v5537_v1 }
 0x1c1   : > { %1603 = vst [vmem:[#allocation4 + $0x40] sm:$0xff] %v4345_v2  ;;  %4505 = vmatmul.mubr.msk.bf16.vlgmr.msra.gmra.mrb[4].mxu0 %vm1107_vm10, %v1294_v7 }
 0x1c2   : > { %1604 = vst [vmem:[#allocation4 + $0x48] sm:$0xff] %v4346_v33  ;;  %1455 = vrot.lane.b32.xlu0 %v5537_v1, %s6423_s18  ;;  %1944 = vmatprep.mubr.bf16.mxu0 %v6427_v3 }
 0x1c3   : > { %1457 = vrot.lane.b32.xlu1 %v5543_v15, %s6423_s18  ;;  %s6429_s18 = smov 1  }
 0x1c6   : > { %1485 = vrot.lane.b32.xlu0 %v5535_v47, %s6424_s0 }
 0x1c7   : > { %1487 = vrot.lane.b32.xlu1 %v5541_v8, %s6424_s0 }
 0x1ca   : > { %1489 = vrot.lane.b32.xlu0 %v5537_v1, %s6424_s0 }
 0x1cb   : > { %1491 = vrot.lane.b32.xlu1 %v5543_v15, %s6424_s0  ;;  %s6430_s0 = smov 113  }
 0x1ce   : > { %1519 = vrot.lane.b32.xlu0 %v5535_v47, %s6428_s20 }
 0x1cf   : > { %1521 = vrot.lane.b32.xlu1 %v5541_v8, %s6428_s20 }
 0x1d2   : > { %1523 = vrot.lane.b32.xlu0 %v5537_v1, %s6428_s20 }
 0x1d3   : > { %1525 = vrot.lane.b32.xlu1 %v5543_v15, %s6428_s20  ;;  %s6440_s20 = smov 121  }
 0x1d6   : > { %1553 = vrot.lane.b32.xlu0 %v5535_v47, %s6429_s18 }
 0x1d7   : > { %1555 = vrot.lane.b32.xlu1 %v5541_v8, %s6429_s18 }
 0x1da   : > { %1557 = vrot.lane.b32.xlu0 %v5537_v1, %s6429_s18 }
 0x1db   : > { %1559 = vrot.lane.b32.xlu1 %v5543_v15, %s6429_s18 }
 0x1de   : > { %1605 = vrot.lane.b32.xlu0 %v5535_v47, %s6398_s23 }
 0x1df   : > { %1607 = vrot.lane.b32.xlu1 %v5541_v8, %s6398_s23 }
 0x1e2   : > { %1609 = vrot.lane.b32.xlu0 %v5537_v1, %s6398_s23 }
 0x1e3   : > { %1611 = vrot.lane.b32.xlu1 %v5543_v15, %s6398_s23  ;;  %s6439_s23 = smov 7  }
 0x1e6   : > { %1639 = vrot.lane.b32.xlu0 %v5535_v47, %s6430_s0 }
 0x1e7   : > { %1641 = vrot.lane.b32.xlu1 %v5541_v8, %s6430_s0 }
 0x1ea   : > { %1643 = vrot.lane.b32.xlu0 %v5537_v1, %s6430_s0 }
 0x1eb   : > { %1645 = vrot.lane.b32.xlu1 %v5543_v15, %s6430_s0  ;;  %s6441_s0 = smov 120  }
 0x1ee   : > { %1673 = vrot.lane.b32.xlu0 %v5535_v47, %s6431_s30 }
 0x1ef   : > { %1675 = vrot.lane.b32.xlu1 %v5541_v8, %s6431_s30 }
 0x1f2   : > { %1677 = vrot.lane.b32.xlu0 %v5537_v1, %s6431_s30 }
 0x1f3   : > { %1679 = vrot.lane.b32.xlu1 %v5543_v15, %s6431_s30 }
 0x1f6   : > { %1707 = vrot.lane.b32.xlu0 %v5535_v47, %s6432_s1 }
 0x1f7   : > { %1709 = vrot.lane.b32.xlu1 %v5541_v8, %s6432_s1 }
 0x1fa   : > { %1711 = vrot.lane.b32.xlu0 %v5537_v1, %s6432_s1 }
 0x1fb   : > { %1713 = vrot.lane.b32.xlu1 %v5543_v15, %s6432_s1 }
 0x1fe   : > { %1763 = vperm.xlu0 %4551, %v1760_v58  }
 0x230   : > { %v1452_v20 = vpop.permute.xlu0 %1451 }
 0x231   : > { %v1454_v25 = vpop.permute.xlu1 %1453 }
 0x232   : > { %v1461_v63 = vsel %vm574_vm1, %v1452_v20, %v1454_v25 }
 0x233   : > { %v1464_v49 = vmul.f32 %v1461_v63, %v5197_v23 }
 0x234   : > { %v1456_v50 = vpop.permute.xlu0 %1455 }
 0x235   : > { %v1460_v56 = vsel %vm574_vm1, %v1454_v25, %v1456_v50  ;;  %v1458_v27 = vpop.permute.xlu1 %1457 }
 0x236   : > { %v1465_v26 = vmul.f32 %v1460_v56, %v5201_v24  ;;  %v1459_v46 = vsel %vm574_vm1, %v1456_v50, %v1458_v27  ;;  %v1462_v16 = vsel %vm574_vm1, %v1458_v27, %v1452_v20 }
 0x237   : > { %v1463_v28 = vmul.f32 %v1462_v16, %v5189_v21  ;;  %v1466_v14 = vmul.f32 %v1459_v46, %v5193_v22 }
 0x238   : > { %v1486_v2 = vpop.permute.xlu0 %1485 }
 0x239   : > { %v4337_v33 = vpack.c.bf16 %v1464_v49, %v1463_v28  ;;  %v4338_v57 = vpack.c.bf16 %v1466_v14, %v1465_v26  ;;  %v1488_v7 = vpop.permute.xlu1 %1487 }
 0x23a   : > { %v1495_v3 = vsel %vm625_vm2, %v1486_v2, %v1488_v7 }
 0x23b   : > { %1483 = vst [vmem:[#allocation4] sm:$0xff] %v4337_v33  ;;  %1484 = vst [vmem:[#allocation4 + $0x8] sm:$0xff] %v4338_v57  ;;  %v1498_v27 = vmul.f32 %v1495_v3, %v5221_v40 }
 0x23c   : > { %v1490_v58 = vpop.permute.xlu0 %1489 }
 0x23d   : > { %v1494_v25 = vsel %vm625_vm2, %v1488_v7, %v1490_v58  ;;  %v1492_v20 = vpop.permute.xlu1 %1491 }
 0x23e   : > { %v1499_v63 = vmul.f32 %v1494_v25, %v5229_v42  ;;  %v1493_v50 = vsel %vm625_vm2, %v1490_v58, %v1492_v20  ;;  %v1496_v56 = vsel %vm625_vm2, %v1492_v20, %v1486_v2  ;;  %v4852_v25 = vpack.c.bf16 %v1498_v27, %v1464_v49 }
 0x23f   : > { %v1497_v46 = vmul.f32 %v1496_v56, %v5225_v41  ;;  %v1500_v16 = vmul.f32 %v1493_v50, %v5233_v43 }
 0x240   : > { %v1520_v33 = vpop.permute.xlu0 %1519  ;;  %v4853_v42 = vpack.c.bf16 %v1499_v63, %v1465_v26  ;;  %1871 = vmatprep.subr.bf16.mxu1 %v4852_v25 }
 0x241   : > { %v4339_v57 = vpack.c.bf16 %v1498_v27, %v1497_v46  ;;  %v4340_v22 = vpack.c.bf16 %v1500_v16, %v1499_v63  ;;  %v1522_v21 = vpop.permute.xlu1 %1521  ;;  %v4851_v7 = vpack.c.bf16 %v1497_v46, %v1463_v28  ;;  %v4854_v2 = vpack.c.bf16 %v1500_v16, %v1466_v14 }
 0x242   : > { %v1529_v58 = vsel %vm676_vm3, %v1520_v33, %v1522_v21 }
 0x243   : > { %1517 = vst [vmem:[#allocation4 + $0x10] sm:$0xff] %v4339_v57  ;;  %1518 = vst [vmem:[#allocation4 + $0x18] sm:$0xff] %v4340_v22  ;;  %1912 = vmatprep.subr.bf16.mxu0 %v4854_v2  ;;  %1872 = vmatpush1.bf16.msra.mxu1 %v4851_v7  ;;  %v1532_v26 = vmul.f32 %v1529_v58, %v5253_v59 }
 0x244   : > { %v1524_v23 = vpop.permute.xlu0 %1523  ;;  %1913 = vmatpush1.bf16.msra.mxu0 %v4853_v42 }
 0x245   : > { %v1528_v3 = vsel %vm676_vm3, %v1522_v21, %v1524_v23  ;;  %v1526_v20 = vpop.permute.xlu1 %1525 }
 0x246   : > { %v1533_v50 = vmul.f32 %v1528_v3, %v5261_v61  ;;  %v1527_v56 = vsel %vm676_vm3, %v1524_v23, %v1526_v20  ;;  %v1530_v22 = vsel %vm676_vm3, %v1526_v20, %v1520_v33 }
 0x247   : > { %v1531_v49 = vmul.f32 %v1530_v22, %v5257_v60  ;;  %v1534_v28 = vmul.f32 %v1527_v56, %v5265_v62 }
 0x248   : > { %v1554_v21 = vpop.permute.xlu0 %1553 }
 0x249   : > { %v4341_v14 = vpack.c.bf16 %v1532_v26, %v1531_v49  ;;  %v4342_v63 = vpack.c.bf16 %v1534_v28, %v1533_v50  ;;  %v1556_v27 = vpop.permute.xlu1 %1555 }
 0x24a   : > { %v1563_v23 = vsel %vm727_vm4, %v1554_v21, %v1556_v27 }
 0x24b   : > { %1551 = vst [vmem:[#allocation4 + $0x20] sm:$0xff] %v4341_v14  ;;  %1552 = vst [vmem:[#allocation4 + $0x28] sm:$0xff] %v4342_v63  ;;  %v1566_v25 = vmul.f32 %v1563_v23, %v5285_v36 }
 0x24c   : > { %v1558_v46 = vpop.permute.xlu0 %1557 }
 0x24d   : > { %v1562_v16 = vsel %vm727_vm4, %v1556_v27, %v1558_v46  ;;  %v1560_v33 = vpop.permute.xlu1 %1559  ;;  %v4856_v27 = vpack.c.bf16 %v1566_v25, %v1532_v26 }
 0x24e   : > { %v1567_v57 = vmul.f32 %v1562_v16, %v5293_v38  ;;  %v1561_v7 = vsel %vm727_vm4, %v1558_v46, %v1560_v33  ;;  %v1564_v42 = vsel %vm727_vm4, %v1560_v33, %v1554_v21 }
 0x24f   : > { %v1565_v58 = vmul.f32 %v1564_v42, %v5289_v37  ;;  %v1568_v2 = vmul.f32 %v1561_v7, %v5297_v39  ;;  %1873 = vmatprep.subr.bf16.mxu1 %v4856_v27 }
 0x250   : > { %v1606_v3 = vpop.permute.xlu0 %1605  ;;  %v4857_v46 = vpack.c.bf16 %v1567_v57, %v1533_v50 }
 0x251   : > { %v4343_v20 = vpack.c.bf16 %v1566_v25, %v1565_v58  ;;  %v4344_v56 = vpack.c.bf16 %v1568_v2, %v1567_v57  ;;  %v1608_v22 = vpop.permute.xlu1 %1607  ;;  %v4855_v63 = vpack.c.bf16 %v1565_v58, %v1531_v49  ;;  %v4858_v21 = vpack.c.bf16 %v1568_v2, %v1534_v28 }
 0x252   : > { %v1615_v14 = vsel %vm796_vm5, %v1606_v3, %v1608_v22 }
 0x253   : > { %1585 = vst [vmem:[#allocation4 + $0x30] sm:$0xff] %v4343_v20  ;;  %1586 = vst [vmem:[#allocation4 + $0x38] sm:$0xff] %v4344_v56  ;;  %v1617_v23 = vmul.f32 %v1615_v14, %v5317_v0  ;;  %1914 = vmatprep.subr.bf16.mxu0 %v4858_v21  ;;  %1874 = vmatpush1.bf16.msra.mxu1 %v4855_v63 }
 0x254   : > { %v1610_v16 = vpop.permute.xlu0 %1609  ;;  %1915 = vmatpush1.bf16.msra.mxu0 %v4857_v46 }
 0x255   : > { %v1614_v33 = vsel %vm796_vm5, %v1608_v22, %v1610_v16  ;;  %v1612_v7 = vpop.permute.xlu1 %1611  ;;  %v4859_v58 = vpack.c.bf16 %v1617_v23, %v5535_v47 }
 0x256   : > { %v1618_v42 = vmul.f32 %v1614_v33, %v5325_v6  ;;  %v1613_v39 = vsel %vm796_vm5, %v1610_v16, %v1612_v7  ;;  %v1616_v20 = vsel %vm796_vm5, %v1612_v7, %v1606_v3 }
 0x257   : > { %v1619_v50 = vmul.f32 %v1613_v39, %v5329_v9  ;;  %v1620_v26 = vmul.f32 %v1616_v20, %v5321_v5 }
 0x258   : > { %v4347_v49 = vpack.c.bf16 %v1618_v42, %v1617_v23  ;;  %v1640_v28 = vpop.permute.xlu0 %1639  ;;  %v4860_v2 = vpack.c.bf16 %v1618_v42, %v5541_v8 }
 0x259   : > { %v4348_v57 = vpack.c.bf16 %v1620_v26, %v1619_v50  ;;  %v1642_v25 = vpop.permute.xlu1 %1641  ;;  %v4861_v56 = vpack.c.bf16 %v1619_v50, %v5537_v1  ;;  %v4862_v39 = vpack.c.bf16 %v1620_v26, %v5543_v15 }
 0x25a   : > { %1637 = vst [vmem:[#allocation4 + $0x50] sm:$0xff] %v4347_v49  ;;  %v1649_v3 = vsel %vm847_vm6, %v1640_v28, %v1642_v25  ;;  %1875 = vmatprep.subr.bf16.mxu1 %v4860_v2 }
 0x25b   : > { %1638 = vst [vmem:[#allocation4 + $0x58] sm:$0xff] %v4348_v57  ;;  %1876 = vmatpush1.bf16.msra.mxu1 %v4859_v58  ;;  %1916 = vmatprep.subr.bf16.mxu0 %v4862_v39  ;;  %v1651_v47 = vmul.f32 %v1649_v3, %v5349_v52 }
 0x25c   : > { %v1644_v22 = vpop.permute.xlu0 %1643  ;;  %1917 = vmatpush1.bf16.msra.mxu0 %v4861_v56 }
 0x25d   : > { %v1648_v14 = vsel %vm847_vm6, %v1642_v25, %v1644_v22  ;;  %v1646_v63 = vpop.permute.xlu1 %1645 }
 0x25e   : > { %v1652_v8 = vmul.f32 %v1648_v14, %v5357_v54  ;;  %v1647_v27 = vsel %vm847_vm6, %v1644_v22, %v1646_v63  ;;  %v1650_v1 = vsel %vm847_vm6, %v1646_v63, %v1640_v28 }
 0x25f   : > { %v1653_v15 = vmul.f32 %v1647_v27, %v5361_v55  ;;  %v1654_v46 = vmul.f32 %v1650_v1, %v5353_v53 }
 0x260   : > { %v4349_v16 = vpack.c.bf16 %v1652_v8, %v1651_v47  ;;  %v1674_v21 = vpop.permute.xlu0 %1673 }
 0x261   : > { %v4350_v23 = vpack.c.bf16 %v1654_v46, %v1653_v15  ;;  %v1676_v33 = vpop.permute.xlu1 %1675 }
 0x262   : > { %1671 = vst [vmem:[#allocation4 + $0x60] sm:$0xff] %v4349_v16  ;;  %v1683_v7 = vsel %vm898_vm7, %v1674_v21, %v1676_v33 }
 0x263   : > { %1672 = vst [vmem:[#allocation4 + $0x68] sm:$0xff] %v4350_v23  ;;  %v1685_v26 = vmul.f32 %v1683_v7, %v5385_v12 }
 0x264   : > { %v1678_v42 = vpop.permute.xlu0 %1677 }
 0x265   : > { %v1682_v20 = vsel %vm898_vm7, %v1676_v33, %v1678_v42  ;;  %v1680_v50 = vpop.permute.xlu1 %1679  ;;  %v4863_v22 = vpack.c.bf16 %v1685_v26, %v1651_v47 }
 0x266   : > { %v1686_v49 = vmul.f32 %v1682_v20, %v5393_v31  ;;  %v1681_v28 = vsel %vm898_vm7, %v1678_v42, %v1680_v50  ;;  %v1684_v57 = vsel %vm898_vm7, %v1680_v50, %v1674_v21 }
 0x267   : > { %v1687_v25 = vmul.f32 %v1681_v28, %v5397_v45  ;;  %v1688_v58 = vmul.f32 %v1684_v57, %v5389_v30 }
 0x268   : > { %v4351_v2 = vpack.c.bf16 %v1686_v49, %v1685_v26  ;;  %v1708_v3 = vpop.permute.xlu0 %1707  ;;  %v4864_v14 = vpack.c.bf16 %v1686_v49, %v1652_v8 }
 0x269   : > { %v4352_v56 = vpack.c.bf16 %v1688_v58, %v1687_v25  ;;  %v1710_v39 = vpop.permute.xlu1 %1709  ;;  %v4865_v27 = vpack.c.bf16 %v1687_v25, %v1653_v15  ;;  %v4866_v1 = vpack.c.bf16 %v1688_v58, %v1654_v46  ;;  %v1741_v58 = vld [vmem:[%s6433_s13] sm:$0xf]  ;;  %s6437_s13 = smov 8  }
 0x26a   : > { %1705 = vst [vmem:[#allocation4 + $0x70] sm:$0xff] %v4351_v2  ;;  %v1717_v63 = vsel %vm949_vm8, %v1708_v3, %v1710_v39  ;;  %1877 = vmatprep.subr.bf16.mxu1 %v4864_v14  ;;  %v4591_v14 = vld [vmem:[%s6343_s4 + $0xc0] sm:$0xff]  }
 0x26b   : > { %1706 = vst [vmem:[#allocation4 + $0x78] sm:$0xff] %v4352_v56  ;;  %1878 = vmatpush1.bf16.msra.mxu1 %v4863_v22  ;;  %1918 = vmatprep.subr.bf16.mxu0 %v4866_v1  ;;  %v1719_v33 = vmul.f32 %v5415_v19, %v1717_v63  ;;  %v4590_v22 = vld [vmem:[%s6343_s4 + $0x40] sm:$0xff]   ;;  %v4594_v1 = vld [vmem:[%s6343_s4 + $0x48] sm:$0xff]  }
 0x26c   : > { %v1712_v16 = vpop.permute.xlu0 %1711  ;;  %1919 = vmatpush1.bf16.msra.mxu0 %v4865_v27  ;;  %v4592_v63 = vld [vmem:[%s6343_s4] sm:$0xff]  }
 0x26d   : > { %v1716_v21 = vsel %vm949_vm8, %v1710_v39, %v1712_v16  ;;  %v1714_v23 = vpop.permute.xlu1 %1713  ;;  %v4868_v26 = vpack.c.bf16 %v1719_v33, %v1719_v33  ;;  %v4593_v27 = vld [vmem:[%s6343_s4 + $0x80] sm:$0xff]  }
 0x26e   : > { %v1720_v7 = vmul.f32 %v5427_v44, %v1716_v21  ;;  %v1715_v47 = vsel %vm949_vm8, %v1712_v16, %v1714_v23  ;;  %v1718_v8 = vsel %vm949_vm8, %v1714_v23, %v1708_v3  ;;  %v4595_v16 = vld [vmem:[%s6343_s4 + $0xc8] sm:$0xff]  }
 0x26f   : > { %v1721_v15 = vmul.f32 %v5432_v29, %v1715_v47  ;;  %v1722_v46 = vmul.f32 %v5422_v35, %v1718_v8  ;;  %v1860_v57 = vsel %vm1111_vm9, %v4868_v26, 0  ;;  %v4596_v21 = vld [vmem:[%s6343_s4 + $0x8] sm:$0xff]   ;;  %v4600_v47 = vld [vmem:[%s6343_s4 + $0x10] sm:$0xff]   ;;  %v4607_v26 = vld [vmem:[%s6343_s4 + $0xe0] sm:$0xff]  }
 0x270   : > { %v4353_v42 = vpack.c.bf16 %v1720_v7, %v1719_v33  ;;  %v4867_v50 = vpack.c.bf16 %v1720_v7, %v1720_v7  ;;  %v4597_v23 = vld [vmem:[%s6343_s4 + $0x88] sm:$0xff]   ;;  %v4598_v33 = vld [vmem:[%s6343_s4 + $0x50] sm:$0xff]  }
 0x271   : > { %v4354_v20 = vpack.c.bf16 %v1722_v46, %v1721_v15  ;;  %v4869_v49 = vpack.c.bf16 %v1722_v46, %v1722_v46  ;;  %v4870_v28 = vpack.c.bf16 %v1721_v15, %v1721_v15  ;;  %v4599_v7 = vld [vmem:[%s6343_s4 + $0xd0] sm:$0xff]   ;;  %v4602_v15 = vld [vmem:[%s6343_s4 + $0x58] sm:$0xff]  }
 0x272   : > { %1739 = vst [vmem:[#allocation4 + $0x80] sm:$0xff] %v4353_v42  ;;  %4107 = vmatprep.subr.msk.bf16.mxu1 %vm1111_vm9, %v4867_v50  ;;  %v4601_v8 = vld [vmem:[%s6343_s4 + $0x90] sm:$0xff]   ;;  %v4603_v46 = vld [vmem:[%s6343_s4 + $0xd8] sm:$0xff]   ;;  %v4606_v50 = vld [vmem:[%s6343_s4 + $0x60] sm:$0xff]  }
 0x273   : > { %1740 = vst [vmem:[#allocation4 + $0x88] sm:$0xff] %v4354_v20  ;;  %4109 = vmatprep.subr.msk.bf16.mxu0 %vm1111_vm9, %v4869_v49  ;;  %1880 = vmatpush1.bf16.msra.mxu1 %v1860_v57  ;;  %v1866_v25 = vsel %vm1111_vm9, %v4870_v28, 0  ;;  %v4604_v42 = vld [vmem:[%s6343_s4 + $0x18] sm:$0xff]   ;;  %v4608_v49 = vld [vmem:[%s6343_s4 + $0x20] sm:$0xff]   ;;  %v4610_v57 = vld [vmem:[%s6343_s4 + $0x68] sm:$0xff]  }
 0x274   : > { %1921 = vmatpush1.bf16.msra.mxu0 %v1866_v25  ;;  %4450 = vmatprep.subr.bf16.mxu1 %v4590_v22  ;;  %v4605_v20 = vld [vmem:[%s6343_s4 + $0x98] sm:$0xff]   ;;  %v4609_v28 = vld [vmem:[%s6343_s4 + $0xa0] sm:$0xff]   ;;  %v4611_v25 = vld [vmem:[%s6343_s4 + $0xe8] sm:$0xff]  }
 0x275   : > { %4472 = vmatprep.subr.bf16.mxu0 %v4591_v14 }
 0x276   : > { %4108 = vmatmul.mubr.msk.bf16.vlgmr.msra.gmra.mrb[4].mxu1 %vm1107_vm10, %v1741_v58 }
 0x277   : > { %4110 = vmatmul.mubr.msk.bf16.vlgmr.msra.gmra.mrb[8].mxu0 %vm1107_vm10, %v1741_v58  ;;  %4451 = vmatpush3.bf16.msra.mxu1 %v4592_v63  ;;  %v4612_v58 = vld [vmem:[%s6343_s4 + $0x28] sm:$0xff]  }
 0x278   : > { %4473 = vmatpush3.bf16.msra.mxu0 %v4593_v27  ;;  %4452 = vmatprep.subr.bf16.mxu1 %v4594_v1  ;;  %v4614_v27 = vld [vmem:[%s6343_s4 + $0x70] sm:$0xff]  }
 0x279   : > { %4474 = vmatprep.subr.bf16.mxu0 %v4595_v16  ;;  %v4615_v1 = vld [vmem:[%s6343_s4 + $0xf0] sm:$0xff]  }
 0x27b   : > { %4453 = vmatpush3.bf16.msra.mxu1 %v4596_v21 }
 0x27c   : > { %4475 = vmatpush3.bf16.msra.mxu0 %v4597_v23  ;;  %4454 = vmatprep.subr.bf16.mxu1 %v4598_v33 }
 0x27d   : > { %4476 = vmatprep.subr.bf16.mxu0 %v4599_v7  ;;  %v4616_v7 = vld [vmem:[%s6343_s4 + $0x30] sm:$0xff]  }
 0x27f   : > { %4455 = vmatpush3.bf16.msra.mxu1 %v4600_v47  ;;  %v4617_v47 = vld [vmem:[%s6343_s4 + $0xb0] sm:$0xff]  }
 0x280   : > { %4477 = vmatpush3.bf16.msra.mxu0 %v4601_v8  ;;  %4456 = vmatprep.subr.bf16.mxu1 %v4602_v15 }
 0x281   : > { %4478 = vmatprep.subr.bf16.mxu0 %v4603_v46 }
 0x283   : > { %4457 = vmatpush3.bf16.msra.mxu1 %v4604_v42 }
 0x284   : > { %4479 = vmatpush3.bf16.msra.mxu0 %v4605_v20  ;;  %4458 = vmatprep.subr.bf16.mxu1 %v4606_v50 }
 0x285   : > { %4480 = vmatprep.subr.bf16.mxu0 %v4607_v26  ;;  %v4618_v26 = vld [vmem:[%s6343_s4 + $0x78] sm:$0xff]  }
 0x287   : > { %4459 = vmatpush3.bf16.msra.mxu1 %v4608_v49  ;;  %v4619_v49 = vld [vmem:[%s6343_s4 + $0xf8] sm:$0xff]  }
 0x288   : > { %4481 = vmatpush3.bf16.msra.mxu0 %v4609_v28  ;;  %4460 = vmatprep.subr.bf16.mxu1 %v4610_v57  ;;  %v4620_v28 = vld [vmem:[%s6343_s4 + $0x38] sm:$0xff]  }
 0x289   : > { %4482 = vmatprep.subr.bf16.mxu0 %v4611_v25  ;;  %v4621_v57 = vld [vmem:[%s6343_s4 + $0xb8] sm:$0xff]   ;;  %v1304_v25 = vld [vmem:[%s6351_s12] sm:$0xff] }
 0x28b   : > { %4461 = vmatpush3.bf16.msra.mxu1 %v4612_v58 }
 0x28c   : > { %4462 = vmatprep.subr.bf16.mxu1 %v4614_v27 }
 0x28f   : > { %4463 = vmatpush3.bf16.msra.mxu1 %v4616_v7 }
 0x290   : > { %4464 = vmatprep.subr.bf16.mxu1 %v4618_v26 }
 0x293   : > { %4465 = vmatpush3.bf16.msra.mxu1 %v4620_v28 }
 0x294   : > { %v5732_v2 = vpop.f32.mrb[4].mxu0 }
 0x295   : > { %v4506_v3 = vpop.f32.mrb[5].mxu0 }
 0x296   : > { %v1380_v56 = vpop.f32.mrb[6].mxu0  ;;  %v4613_v3 = vld [vmem:[%s6343_s4 + $0xa8] sm:$0xff]  }
 0x297   : > { %v4507_v39 = vpop.f32.mrb[7].mxu0  ;;  %v1764_v56 = vpop.permute.xlu0 %1763  ;;  %4483 = vmatpush3.bf16.msra.mxu0 %v4613_v3 }
 0x298   : > { %4484 = vmatprep.subr.bf16.mxu0 %v4615_v1 }
 0x29b   : > { %4485 = vmatpush3.bf16.msra.mxu0 %v4617_v47 }
 0x29c   : > { %4486 = vmatprep.subr.bf16.mxu0 %v4619_v49 }
 0x29f   : > { %4487 = vmatpush3.bf16.msra.mxu0 %v4621_v57 }
 0x349   : > { %v1905_v39 = vpop.f32.mrb[4].mxu1 }
 0x34a   : > { %v5806_v22 = vadd.f32 %v1905_v39, %v1764_v56  ;;  %v1907_v14 = vpop.f32.mrb[5].mxu1  ;;  %v1946_v63 = vpop.f32.mrb[8].mxu0 }
 0x34b   : > { %v5814_v16 = vadd.f32 %v1907_v14, %v1764_v56  ;;  %v5816_v21 = vadd.f32 %v1946_v63, %v1764_v56  ;;  %v1909_v23 = vpop.f32.mrb[6].mxu1  ;;  %v1948_v33 = vpop.f32.mrb[9].mxu0 }
 0x34c   : > { %v5824_v8 = vadd.f32 %v1948_v33, %v1764_v56  ;;  %v1910_v15 = vpop.f32.mrb[7].mxu1  ;;  %v1950_v46 = vpop.f32.mrb[10].mxu0 }
 0x34d   : > { %v1951_v42 = vpop.f32.mrb[11].mxu0  ;;  %v4552_v20 = vpack.i.bf16 %v5814_v16, %v5806_v22 }
 0x34e   : > { %v4557_v50 = vpack.i.bf16 %v5824_v8, %v5816_v21 }
 0x34f   : > { %4553 = vrot.lane.b32.xlu1 %v4552_v20, %s6434_s26 }
 0x350   : > { %4558 = vrot.lane.b32.xlu0 %v4557_v50, %s6434_s26 }
 0x353   : > { %4563 = vrot.lane.b32.xlu1 %v4552_v20, %s6431_s30 }
 0x354   : > { %4568 = vrot.lane.b32.xlu0 %v4557_v50, %s6431_s30  ;;  %s6435_s30 = scvt.s32.f32 %s5057_s27  ;;  %s4943_s27 = smov 64  }
 0x357   : > { %4573 = vrot.lane.b32.xlu1 %v4552_v20, %s6432_s1 }
 0x358   : > { %4578 = vrot.lane.b32.xlu0 %v4557_v50, %s6432_s1  ;;  %s2511_s1 = smul.f32 0.0009765625, %s6435_s30  ;;  %s4950_s30 = smov (!%p4161_p6), 113  }
 0x35b   : > { %1307 = vperm.xlu1 %4582, %v1304_v25  }
 0x377   : > { %1416 = vadd.xlane.f32.xlu0 %v5531_v11 }
 0x37f   : > { %1404 = vadd.xlane.f32.xlu1 %v5533_v51 }
 0x3c1   : > { %v4554_v58 = vpop.permute.xlu1 %4553 }
 0x3c2   : > { %v4556_v3 = vunpack.i.h.bf16 %v4554_v58  ;;  %v4555_v56 = vunpack.i.l.bf16 %v4554_v58  ;;  %v4559_v39 = vpop.permute.xlu0 %4558 }
 0x3c3   : > { %v4561_v14 = vunpack.i.h.bf16 %v4559_v39  ;;  %v4560_v63 = vunpack.i.l.bf16 %v4559_v39 }
 0x3c4   : > { %v1963_v27 = vsel %vm796_vm5, %v4555_v56, %v4556_v3 }
 0x3c5   : > { %v1962_v1 = vsel %vm796_vm5, %v4556_v3, %v4560_v63  ;;  %v4564_v23 = vpop.permute.xlu1 %4563  ;;  %v1961_v33 = vsel %vm796_vm5, %v4560_v63, %v4561_v14  ;;  %v1964_v51 = vsel %vm796_vm5, %v4561_v14, %v4555_v56  ;;  %v1965_v42 = vmax.f32 %v5806_v22, %v1963_v27 }
 0x3c6   : > { %v4566_v7 = vunpack.i.h.bf16 %v4564_v23  ;;  %v4569_v11 = vpop.permute.xlu0 %4568  ;;  %v4565_v47 = vunpack.i.l.bf16 %v4564_v23  ;;  %v1966_v20 = vmax.f32 %v5814_v16, %v1962_v1  ;;  %v1967_v25 = vmax.f32 %v5816_v21, %v1961_v33 }
 0x3c7   : > { %v4571_v15 = vunpack.i.h.bf16 %v4569_v11  ;;  %v4570_v46 = vunpack.i.l.bf16 %v4569_v11  ;;  %v1968_v58 = vmax.f32 %v5824_v8, %v1964_v51 }
 0x3c8   : > { %v1979_v50 = vsel %vm898_vm7, %v4565_v47, %v4566_v7 }
 0x3c9   : > { %v1977_v26 = vsel %vm898_vm7, %v4570_v46, %v4571_v15  ;;  %v1978_v49 = vsel %vm898_vm7, %v4566_v7, %v4570_v46  ;;  %v1980_v28 = vsel %vm898_vm7, %v4571_v15, %v4565_v47  ;;  %v4574_v57 = vpop.permute.xlu1 %4573  ;;  %v1981_v56 = vmax.f32 %v1965_v42, %v1979_v50 }
 0x3ca   : > { %v4576_v22 = vunpack.i.h.bf16 %v4574_v57  ;;  %v4575_v3 = vunpack.i.l.bf16 %v4574_v57  ;;  %v4579_v16 = vpop.permute.xlu0 %4578  ;;  %v1983_v63 = vmax.f32 %v1967_v25, %v1977_v26  ;;  %v1982_v1 = vmax.f32 %v1966_v20, %v1978_v49 }
 0x3cb   : > { %v4581_v39 = vunpack.i.h.bf16 %v4579_v16  ;;  %v4580_v14 = vunpack.i.l.bf16 %v4579_v16  ;;  %v1984_v23 = vmax.f32 %v1968_v58, %v1980_v28 }
 0x3cc   : > { %v1995_v27 = vsel %vm949_vm8, %v4575_v3, %v4576_v22 }
 0x3cd   : > { %v1997_v7 = vmax.f32 %v1981_v56, %v1995_v27  ;;  %v1993_v11 = vsel %vm949_vm8, %v4580_v14, %v4581_v39  ;;  %v1994_v21 = vsel %vm949_vm8, %v4576_v22, %v4580_v14  ;;  %v1996_v8 = vsel %vm949_vm8, %v4581_v39, %v4575_v3 }
 0x3ce   : > { %v1999_v33 = vmax.f32 %v1983_v63, %v1993_v11  ;;  %v1998_v51 = vmax.f32 %v1982_v1, %v1994_v21  ;;  %v2000_v47 = vmax.f32 %v1984_v23, %v1996_v8  ;;  %v2512_v23 = vstv %s2511_s1  ;;  %v2508_v11 = vld [vmem:[#allocation8] sm:$0x1]  ;;  %s4951_s1 = smov (!%p4161_p6), 112  }
 0x3cf   : > { %v2001_v50 = vpack.c.bf16 %v1997_v7, %v1997_v7 }
 0x3d0   : > { %v2002_v15 = vpack.c.bf16 %v1998_v51, %v1998_v51  ;;  %v2004_v46 = vpack.c.bf16 %v2000_v47, %v2000_v47  ;;  %v2003_v42 = vpack.c.bf16 %v1999_v33, %v1999_v33 }
 0x3d2   : > { %2293 = vmatprep.mubr.bf16.mxu1 %v2002_v15  ;;  %2333 = vmatprep.mubr.bf16.mxu0 %v2004_v46 }
 0x3d3   : > { %2294 = vmatmul.mubr.bf16.vlgmr.msra.gmra.mrb[8].mxu1 %v2001_v50  ;;  %2334 = vmatmul.mubr.bf16.vlgmr.msra.gmra.mrb[12].mxu0 %v2003_v42 }
 0x3da   : > { %v1308_v20 = vpop.permute.xlu1 %1307 }
 0x3db   : > { %v1378_v26 = vadd.f32 %v5732_v2, %v1308_v20 }
 0x3dd   : > { %v1383_v51 = vmax.f32 %v1378_v26, 0.0 }
 0x404   : > { %v1417_v49 = vpop.xlane.xlu0 %1416 }
 0x405   : > { %v1418_v28 = vsel %vm1111_vm9, %v1417_v49, 0.0 }
 0x406   : > { %v1419_v57 = vrot.slane %v1418_v28, 4 }
 0x408   : > { %v1420_v25 = vadd.f32 %v1419_v57, %v1418_v28 }
 0x40a   : > { %v1421_v58 = vrot.slane %v1420_v25, 2 }
 0x40c   : > { %v1405_v22 = vpop.xlane.xlu1 %1404  ;;  %v1422_v56 = vadd.f32 %v1421_v58, %v1420_v25  ;;  %v1384_v58 = vmul.f32 %v1383_v51, %v5504_v32 }
 0x40d   : > { %v1406_v3 = vsel %vm1111_vm9, %v1405_v22, 0.0 }
 0x40e   : > { %v1407_v16 = vrot.slane %v1406_v3, 4  ;;  %v1423_v63 = vrot.slane %v1422_v56, 1 }
 0x410   : > { %v1408_v39 = vadd.f32 %v1407_v16, %v1406_v3  ;;  %v1424_v2 = vadd.f32 %v1423_v63, %v1422_v56 }
 0x412   : > { %v1409_v14 = vrot.slane %v1408_v39, 2 }
 0x414   : > { %v1410_v27 = vadd.f32 %v1409_v14, %v1408_v39 }
 0x416   : > { %v1411_v1 = vrot.slane %v1410_v27, 1 }
 0x418   : > { %v1412_v7 = vadd.f32 %v1411_v1, %v1410_v27 }
 0x41a   : > { %v5887_v21 = vsel %vm1425_vm12, %v1412_v7, %v1424_v2 }
 0x41b   : > { %6436 = vst [vmem:[#allocation22_spill] sm:$0xff] %v5887_v21  ;;  %v2513_v8 = vmul.f32 %v2512_v23, %v5887_v21 }
 0x41d   : > { %v2514_v33 = vadd.f32 %v2513_v8, %v2508_v11 }
 0x41f   : > { %2516 = vst.msk [vmem:[#allocation8] sm:$0x1] %vm2515_vm13, %v2514_v33 }
 0x4a6   : > { %v4466_v47 = vpop.f32.mrb[8].mxu1  ;;  %v4488_v15 = vpop.f32.mrb[12].mxu0 }
 0x4a7   : > { %v4467_v46 = vpop.f32.mrb[9].mxu1  ;;  %v4489_v42 = vpop.f32.mrb[13].mxu0 }
 0x4a8   : > { %v4468_v50 = vadd.f32 %v4467_v46, %v4466_v47  ;;  %v4490_v20 = vadd.f32 %v4489_v42, %v4488_v15  ;;  %v4469_v49 = vpop.f32.mrb[10].mxu1  ;;  %v4491_v28 = vpop.f32.mrb[14].mxu0 }
 0x4a9   : > { %v4470_v57 = vpop.f32.mrb[11].mxu1  ;;  %v4492_v25 = vpop.f32.mrb[15].mxu0 }
 0x4aa   : > { %v2336_v22 = vadd.f32 %v4490_v20, %v4468_v50 }
 0x4ac   : > { %v2341_v3 = vsub.f32 %v1384_v58, %v2336_v22 }
 0x4ae   : > { %v2367_v16 = vsub.f32 0.0, %v2341_v3  ;;  %v2368_v56 = vmax.f32 %v2341_v3, 0.0  ;;  %v2342_v39 = vmul.f32 %v2341_v3, %v2341_v3 }
 0x4b0   : > { %v2369_v14 = vmax.f32 %v2367_v16, 0.0  ;;  %2354 = vrot.lane.b32.xlu0 %v2342_v39, %s4943_s27  ;;  %2386 = vrot.lane.b32.xlu1 %v2368_v56, %s6437_s13  ;;  %v2344_v32 = vsel %vm2343_vm14, %v2342_v39, 0.0  ;;  %s4952_s27 = smov (!%p4161_p6), 111  }
 0x4b2   : > { %v4414_v26 = vpack.c.bf16 %v2369_v14, %v2368_v56 }
 0x4b4   : > { %4439 = vst [vmem:[#allocation7 + $0x20] sm:$0xff] %v4414_v26   ;;  %2370 = vrot.lane.b32.xlu0 %v2368_v56, %s6438_s19  ;;  %2402 = vrot.lane.b32.xlu1 %v2368_v56, %s6439_s23 }
 0x4b8   : > { %2418 = vrot.lane.b32.xlu1 %v2368_v56, %s6429_s18 }
 0x4bc   : > { %2444 = vrot.lane.b32.xlu1 %v2368_v56, %s6434_s26 }
 0x4c0   : > { %2460 = vrot.lane.b32.xlu1 %v2368_v56, %s6440_s20 }
 0x4c4   : > { %2476 = vrot.lane.b32.xlu1 %v2368_v56, %s6441_s0 }
 0x4c8   : > { %2372 = vrot.lane.b32.xlu1 %v2369_v14, %s6438_s19 }
 0x4d3   : > { %2345 = vadd.xlane.f32.xlu0 %v2344_v32 }
 0x4e9   : > { %2388 = vrot.lane.b32.xlu0 %v2369_v14, %s6437_s13 }
 0x4ed   : > { %2404 = vrot.lane.b32.xlu0 %v2369_v14, %s6439_s23 }
 0x4f1   : > { %2420 = vrot.lane.b32.xlu0 %v2369_v14, %s6429_s18 }
 0x4f5   : > { %2446 = vrot.lane.b32.xlu0 %v2369_v14, %s6434_s26  ;;  %s4945_s26 = smov (!%p4161_p6), 17  }
 0x4f9   : > { %2462 = vrot.lane.b32.xlu0 %v2369_v14, %s6440_s20 }
 0x4fd   : > { %2478 = vrot.lane.b32.xlu0 %v2369_v14, %s6441_s0 }
 0x501   : > { %2494 = vrot.lane.b32.xlu0 %v2369_v14, %s6442_s21 }
 0x522   : > { %v2355_v63 = vpop.permute.xlu0 %2354  ;;  %v2387_v27 = vpop.permute.xlu1 %2386 }
 0x523   : > { %v2357_v1 = vsel %vm2343_vm14, %v2355_v63, 0.0  ;;  %v2390_v20 = vmul.f32 %v2387_v27, %v5471_v4 }
 0x524   : > { %2358 = vadd.xlane.f32.xlu1 %v2357_v1 }
 0x526   : > { %v2403_v2 = vpop.permute.xlu1 %2402  ;;  %v2371_v33 = vpop.permute.xlu0 %2370 }
 0x527   : > { %v2374_v47 = vmul.f32 %v2371_v33, %v5468_v34  ;;  %v2406_v25 = vmul.f32 %v2403_v2, %v5482_v17  ;;  %v6443_v2 = vld [vmem:[#allocation17_spill] sm:$0xff] }
 0x52a   : > { %v2419_v23 = vpop.permute.xlu1 %2418 }
 0x52b   : > { %v2422_v16 = vmul.f32 %v2419_v23, %v5477_v48 }
 0x52e   : > { %v2445_v7 = vpop.permute.xlu1 %2444 }
 0x52f   : > { %v2448_v14 = vmul.f32 %v2445_v7, %v5486_v18 }
 0x532   : > { %v2461_v11 = vpop.permute.xlu1 %2460 }
 0x533   : > { %v2464_v63 = vmul.f32 %v2461_v11, %v5490_v10 }
 0x535   : > { %2492 = vrot.lane.b32.xlu1 %v2368_v56, %s6442_s21 }
 0x536   : > { %v2477_v8 = vpop.permute.xlu1 %2476 }
 0x537   : > { %v2480_v23 = vmul.f32 %v2477_v8, %v6443_v2 }
 0x53a   : > { %v2373_v51 = vpop.permute.xlu1 %2372 }
 0x53b   : > { %v2375_v15 = vmul.f32 %v2373_v51, %v5468_v34 }
 0x53d   : > { %v4394_v46 = vpack.c.bf16 %v2375_v15, %v2374_v47 }
 0x53f   : > { %4395 = vst [vmem:[#allocation7] sm:$0xff] %v4394_v46  }
 0x560   : > { %v2346_v42 = vpop.xlane.xlu0 %2345 }
 0x561   : > { %v2347_v7 = vrot.slane %v2346_v42, 4 }
 0x563   : > { %v2348_v51 = vadd.f32 %v2347_v7, %v2346_v42  ;;  %v4634_v7 = vld [vmem:[#allocation7 + $0x48] sm:$0xff] (!%p4161_p6)  }
 0x564   : > { %v2389_v50 = vpop.permute.xlu0 %2388 }
 0x565   : > { %v2391_v49 = vmul.f32 %v2389_v50, %v5471_v4  ;;  %v2349_v47 = vrot.slane %v2348_v51, 2 }
 0x567   : > { %v4399_v28 = vpack.c.bf16 %v2391_v49, %v2390_v20  ;;  %v2350_v50 = vadd.f32 %v2349_v47, %v2348_v51  ;;  %v4635_v51 = vld [vmem:[#allocation7 + $0x50] sm:$0xff] (!%p4161_p6)   ;;  %v4636_v47 = vld [vmem:[#allocation7 + $0x58] sm:$0xff] (!%p4161_p6)  }
 0x568   : > { %v2405_v57 = vpop.permute.xlu0 %2404 }
 0x569   : > { %4436 = vst [vmem:[#allocation7 + $0x8] sm:$0xff] %v4399_v28   ;;  %v2407_v58 = vmul.f32 %v2405_v57, %v5482_v17  ;;  %v2351_v57 = vrot.slane %v2350_v50, 1 }
 0x56b   : > { %v4404_v22 = vpack.c.bf16 %v2407_v58, %v2406_v25  ;;  %v2352_v42 = vadd.f32 %v2351_v57, %v2350_v50  ;;  %v4639_v50 = vld [vmem:[%s6348_s9] ss:$8 sps:$4 sm:$0xff] (!%p4161_p6)   ;;  %v4651_v57 = vld [vmem:[%s6342_s3 + $0x44] ss:$16 sps:$4 sm:$0xff] (!%p4161_p6)  }
 0x56c   : > { %v2421_v3 = vpop.permute.xlu0 %2420 }
 0x56d   : > { %4437 = vst [vmem:[#allocation7 + $0x10] sm:$0xff] %v4404_v22   ;;  %v2423_v34 = vmul.f32 %v2421_v3, %v5477_v48 }
 0x56f   : > { %v4409_v56 = vpack.c.bf16 %v2423_v34, %v2422_v16  ;;  %v4625_v34 = vld [vmem:[#allocation7] sm:$0xff] (!%p4161_p6)  }
 0x570   : > { %v2447_v39 = vpop.permute.xlu0 %2446 }
 0x571   : > { %4438 = vst [vmem:[#allocation7 + $0x18] sm:$0xff] %v4409_v56   ;;  %v2449_v4 = vmul.f32 %v2447_v39, %v5486_v18  ;;  %v4944_v56 = vmov (!%p4161_p6), 0   ;;  %v4626_v39 = vld [vmem:[#allocation7 + $0x8] sm:$0xff] (!%p4161_p6)  }
 0x572   : > { %2685 = vmatprep.subr.bf16.mxu0 (!%p4161_p6), %v4944_v56  ;;  %4623 = vset.pattern.permute.xlu0 (!%p4161_p6), %v4944_v56 }
 0x573   : > { %v4419_v26 = vpack.c.bf16 %v2449_v4, %v2448_v14  ;;  %2686 = vmatpush1.bf16.msra.mxu0 (!%p4161_p6), %v4625_v34  ;;  %4624 = vset.pattern.permute.xlu1 (!%p4161_p6), %v4944_v56  ;;  %v4660_v34 = vld [vmem:[%s6342_s3 + $0xa4] ss:$16 sps:$4 sm:$0xff] (!%p4161_p6)  }
 0x574   : > { %v2463_v32 = vpop.permute.xlu0 %2462  ;;  %2687 = vmatprep.subr.bf16.mxu0 (!%p4161_p6), %v4944_v56  ;;  %2986 = vmatprep.mubr.bf16.mxu1 (!%p4161_p6), %v4944_v56  ;;  %v4627_v14 = vld [vmem:[#allocation7 + $0x10] sm:$0xff] (!%p4161_p6)  }
 0x575   : > { %4440 = vst [vmem:[#allocation7 + $0x28] sm:$0xff] %v4419_v26   ;;  %v2465_v17 = vmul.f32 %v2463_v32, %v5490_v10  ;;  %v4622_v10 = vld [vmem:[%s6341_s2 + $0x8] ss:$0 sm:$0xff]  ;;  %v4629_v26 = vld [vmem:[#allocation7 + $0x20] sm:$0xff] (!%p4161_p6)  }
 0x576   : > { %v4641_v32 = vld [vmem:[%s6348_s9 + $0x4] ss:$8 sps:$4 sm:$0xff] (!%p4161_p6)  }
 0x577   : > { %v4424_v27 = vpack.c.bf16 %v2465_v17, %v2464_v63  ;;  %2688 = vmatpush1.bf16.msra.mxu0 (!%p4161_p6), %v4626_v39  ;;  %4180 = vmatprep.mubr.msk.bf16.mxu0 (!%p4161_p6), %vm2675_vm15, %v4641_v32  ;;  %v2552_v17 = vld [vmem:[%s6349_s10] sm:$0xff] (!%p4161_p6) }
 0x578   : > { %v2479_v1 = vpop.permute.xlu0 %2478  ;;  %2689 = vmatprep.subr.bf16.mxu0 (!%p4161_p6), %v4944_v56  ;;  %v4628_v4 = vld [vmem:[#allocation7 + $0x18] sm:$0xff] (!%p4161_p6)   ;;  %2558 = vperm.xlu0 (!%p4161_p6), %4623, %v2552_v17   ;;  %v4662_v39 = vld [vmem:[%s6342_s3 + $0xa0] ss:$16 sps:$4 sm:$0xff] (!%p4161_p6)  }
 0x579   : > { %4441 = vst [vmem:[#allocation7 + $0x30] sm:$0xff] %v4424_v27   ;;  %v2481_v48 = vmul.f32 %v2479_v1, %v6443_v2  ;;  %v2553_v27 = vld [vmem:[%s6349_s10 + $0x8] sm:$0xff] (!%p4161_p6)  ;;  %v2554_v1 = vld [vmem:[%s6349_s10 + $0x10] sm:$0xff] (!%p4161_p6)  ;;  %v2555_v2 = vld [vmem:[%s6349_s10 + $0x18] sm:$0xff] (!%p4161_p6) }
 0x57a   : > { %2568 = vperm.xlu1 (!%p4161_p6), %4624, %v2554_v1   ;;  %v4668_v32 = vld [vmem:[%s6342_s3 + $0xe0] ss:$16 sps:$4 sm:$0xff] (!%p4161_p6)  }
 0x57b   : > { %v4429_v33 = vpack.c.bf16 %v2481_v48, %v2480_v23  ;;  %2690 = vmatpush1.bf16.msra.mxu0 (!%p4161_p6), %v4627_v14  ;;  %v4663_v14 = vld [vmem:[%s6342_s3 + $0xc4] ss:$16 sps:$4 sm:$0xff] (!%p4161_p6)  }
 0x57c   : > { %v2495_v46 = vpop.permute.xlu0 %2494  ;;  %2691 = vmatprep.subr.bf16.mxu0 (!%p4161_p6), %v4944_v56  ;;  %v4630_v63 = vld [vmem:[#allocation7 + $0x28] sm:$0xff] (!%p4161_p6)   ;;  %2563 = vperm.xlu0 (!%p4161_p6), %4623, %v2553_v27  }
 0x57d   : > { %4442 = vst [vmem:[#allocation7 + $0x38] sm:$0xff] %v4429_v33   ;;  %v2497_v49 = vmul.f32 %v4622_v10, %v2495_v46 }
 0x57e   : > { %2573 = vperm.xlu1 (!%p4161_p6), %4624, %v2555_v2  }
 0x57f   : > { %2692 = vmatpush1.bf16.msra.mxu0 (!%p4161_p6), %v4628_v4  ;;  %v4665_v4 = vld [vmem:[%s6342_s3 + $0xc0] ss:$16 sps:$4 sm:$0xff] (!%p4161_p6)  }
 0x580   : > { %2693 = vmatprep.subr.bf16.mxu0 (!%p4161_p6), %v4944_v56  ;;  %v4631_v23 = vld [vmem:[#allocation7 + $0x30] sm:$0xff] (!%p4161_p6)  }
 0x583   : > { %2694 = vmatpush1.bf16.msra.mxu0 (!%p4161_p6), %v4629_v26  ;;  %v4666_v26 = vld [vmem:[%s6342_s3 + $0xe4] ss:$16 sps:$4 sm:$0xff] (!%p4161_p6)  }
 0x584   : > { %2695 = vmatprep.subr.bf16.mxu0 (!%p4161_p6), %v4944_v56  ;;  %v4632_v48 = vld [vmem:[#allocation7 + $0x38] sm:$0xff] (!%p4161_p6)  }
 0x587   : > { %2696 = vmatpush1.bf16.msra.mxu0 (!%p4161_p6), %v4630_v63  ;;  %v4671_v63 = vld [vmem:[%s6342_s3 + $0xc] ss:$16 sps:$4 sm:$0xff] (!%p4161_p6)  }
 0x588   : > { %2697 = vmatprep.subr.bf16.mxu0 (!%p4161_p6), %v4944_v56 }
 0x58b   : > { %2698 = vmatpush1.bf16.msra.mxu0 (!%p4161_p6), %v4631_v23 }
 0x58c   : > { %2699 = vmatprep.subr.bf16.mxu0 (!%p4161_p6), %v4944_v56 }
 0x58f   : > { %2700 = vmatpush1.bf16.msra.mxu0 (!%p4161_p6), %v4632_v48 }
 0x590   : > { %2701 = vmatprep.subr.bf16.mxu0 (!%p4161_p6), %v4944_v56 }
 0x5b1   : > { %v2359_v18 = vpop.xlane.xlu1 %2358 }
 0x5b2   : > { %v2360_v15 = vrot.slane %v2359_v18, 4 }
 0x5b4   : > { %v2361_v11 = vadd.f32 %v2360_v15, %v2359_v18  ;;  %v4637_v18 = vld [vmem:[#allocation7 + $0x60] sm:$0xff] (!%p4161_p6)   ;;  %v4638_v15 = vld [vmem:[#allocation7 + $0x68] ss:$0 sps:$4 sm:$0xff] (!%p4161_p6)  }
 0x5b5   : > { %v2493_v20 = vpop.permute.xlu1 %2492  ;;  %v2683_v46 = vsel (!%p4161_p6), %vm1111_vm9, %v4638_v15, 0 }
 0x5b6   : > { %v2362_v8 = vrot.slane %v2361_v11, 2  ;;  %v2496_v28 = vmul.f32 %v4622_v10, %v2493_v20  ;;  %v4644_v20 = vld [vmem:[%s6348_s9 + $0x10] ss:$8 sps:$4 sm:$0xff] (!%p4161_p6)   ;;  %v4645_v10 = vld [vmem:[%s6342_s3 + $0x4] ss:$16 sps:$4 sm:$0xff] (!%p4161_p6)  }
 0x5b7   : > { %2954 = vmatprep.subr.bf16.mxu1 (!%p4161_p6), %v4645_v10 }
 0x5b8   : > { %v2363_v25 = vadd.f32 %v2362_v8, %v2361_v11  ;;  %v4434_v58 = vpack.c.bf16 %v2497_v49, %v2496_v28  ;;  %v4642_v11 = vld [vmem:[%s6348_s9 + $0x14] ss:$8 sps:$4 sm:$0xff] (!%p4161_p6)   ;;  %v4647_v49 = vld [vmem:[%s6342_s3] ss:$16 sps:$4 sm:$0xff] (!%p4161_p6)  }
 0x5b9   : > { %2520 = sbr.rel (%p4161_p6) target bundleno = 2445 (0x98d), region = 88  ;;  %2955 = vmatpush1.bf16.msra.mxu1 (!%p4161_p6), %v4647_v49  ;;  %v4648_v8 = vld [vmem:[%s6342_s3 + $0x24] ss:$16 sps:$4 sm:$0xff] (!%p4161_p6)   ;;  %v4650_v28 = vld [vmem:[%s6342_s3 + $0x20] ss:$16 sps:$4 sm:$0xff] (!%p4161_p6)  }
 0x5ba   : > { %v2364_v22 = vrot.slane %v2363_v25, 1  ;;  %4443 = vst [vmem:[#allocation7 + $0x40] sm:$0xff] %v4434_v58   ;;  %2956 = vmatprep.subr.bf16.mxu1 (!%p4161_p6), %v4648_v8  ;;  %v4654_v58 = vld [vmem:[%s6342_s3 + $0x64] ss:$16 sps:$4 sm:$0xff] (!%p4161_p6)  }
 0x5bc   : > { %v2365_v3 = vadd.f32 %v2364_v22, %v2363_v25  ;;  %v4653_v25 = vld [vmem:[%s6342_s3 + $0x40] ss:$16 sps:$4 sm:$0xff] (!%p4161_p6)  }
 0x5bd   : > { %2957 = vmatpush1.bf16.msra.mxu1 (!%p4161_p6), %v4650_v28  ;;  %v4656_v22 = vld [vmem:[%s6342_s3 + $0x60] ss:$16 sps:$4 sm:$0xff] (!%p4161_p6)  }
 0x5be   : > { %v5925_v16 = vsel %vm1425_vm12, %v2352_v42, %v2365_v3  ;;  %2958 = vmatprep.subr.bf16.mxu1 (!%p4161_p6), %v4651_v57  ;;  %v4657_v42 = vld [vmem:[%s6342_s3 + $0x84] ss:$16 sps:$4 sm:$0xff] (!%p4161_p6)   ;;  %v4659_v3 = vld [vmem:[%s6342_s3 + $0x80] ss:$16 sps:$4 sm:$0xff] (!%p4161_p6)  }
 0x5bf   : > { %6444 = vst [vmem:[#allocation17_spill] sm:$0xff] %v5925_v16 }
 0x5c1   : > { %v4633_v33 = vld [vmem:[#allocation7 + $0x40] sm:$0xff]   ;;  %2959 = vmatpush1.bf16.msra.mxu1 %v4653_v25 }
 0x5c2   : > { %2702 = vmatpush1.bf16.msra.mxu0 %v4633_v33  ;;  %2960 = vmatprep.subr.bf16.mxu1 %v4654_v58 }
 0x5c3   : > { %2703 = vmatprep.subr.bf16.mxu0 %v4944_v56 }
 0x5c5   : > { %2961 = vmatpush1.bf16.msra.mxu1 %v4656_v22 }
 0x5c6   : > { %2704 = vmatpush1.bf16.msra.mxu0 %v4634_v7  ;;  %2962 = vmatprep.subr.bf16.mxu1 %v4657_v42 }
 0x5c7   : > { %2705 = vmatprep.subr.bf16.mxu0 %v4944_v56 }
 0x5c9   : > { %2963 = vmatpush1.bf16.msra.mxu1 %v4659_v3 }
 0x5ca   : > { %2706 = vmatpush1.bf16.msra.mxu0 %v4635_v51  ;;  %2964 = vmatprep.subr.bf16.mxu1 %v4660_v34  ;;  %v2753_v34 = vld [vmem:[#allocation6] sm:$0xff] }
 0x5cb   : > { %2707 = vmatprep.subr.bf16.mxu0 %v4944_v56 }
 0x5cd   : > { %2965 = vmatpush1.bf16.msra.mxu1 %v4662_v39 }
 0x5ce   : > { %2708 = vmatpush1.bf16.msra.mxu0 %v4636_v47  ;;  %2966 = vmatprep.subr.bf16.mxu1 %v4663_v14 }
 0x5cf   : > { %2709 = vmatprep.subr.bf16.mxu0 %v4944_v56 }
 0x5d1   : > { %2967 = vmatpush1.bf16.msra.mxu1 %v4665_v4 }
 0x5d2   : > { %2710 = vmatpush1.bf16.msra.mxu0 %v4637_v18  ;;  %2968 = vmatprep.subr.bf16.mxu1 %v4666_v26 }
 0x5d3   : > { %2711 = vmatprep.subr.bf16.mxu0 %v4944_v56 }
 0x5d5   : > { %2969 = vmatpush1.bf16.msra.mxu1 %v4668_v32 }
 0x5d6   : > { %2712 = vmatpush1.bf16.msra.mxu0 %v2683_v46  ;;  %2995 = vmatprep.subr.bf16.mxu1 %v4671_v63 }
 0x5d9   : > { %2718 = vmatmul.mubr.bf16.vlgmr.msra.gmra.mrb[0].mxu0 %v4639_v50 }
 0x5da   : > { %4181 = vmatprep.mubr.msk.bf16.mxu0 %vm2675_vm15, %v4642_v11 }
 0x5e1   : > { %2726 = vmatmul.mubr.bf16.gmra.mrb[4].mxu0 %v4644_v20 }
 0x5f7   : > { %v2559_v17 = vpop.permute.xlu0 %2558 }
 0x5f9   : > { %v2569_v47 = vpop.permute.xlu1 %2568 }
 0x5fb   : > { %v2564_v23 = vpop.permute.xlu0 %2563 }
 0x5fd   : > { %v2574_v11 = vpop.permute.xlu1 %2573 }
 0x6ac   : > { %v2719_v27 = vpop.f32.mrb[0].mxu0 }
 0x6ad   : > { %v2720_v1 = vadd.f32 %v2719_v27, %v2559_v17  ;;  %v2721_v2 = vpop.f32.mrb[1].mxu0 }
 0x6ae   : > { %v2722_v48 = vpop.f32.mrb[2].mxu0 }
 0x6af   : > { %v4182_v33 = vmul.f32 -1.442695, %v2720_v1  ;;  %v2723_v7 = vadd.f32 %v2722_v48, %v2564_v23  ;;  %v2724_v51 = vpop.f32.mrb[3].mxu0  ;;  %v4669_v1 = vld [vmem:[%s6342_s3 + $0x8] ss:$16 sps:$4 sm:$0xff]  }
 0x6b0   : > { %v4674_v23 = vld [vmem:[%s6342_s3 + $0x2c] ss:$16 sps:$4 sm:$0xff]   ;;  %v4672_v48 = vld [vmem:[%s6342_s3 + $0x28] ss:$16 sps:$4 sm:$0xff]  }
 0x6b1   : > { %4751 = vpow2.f32 %v4182_v33  ;;  %v4183_v18 = vmul.f32 -1.442695, %v2723_v7  ;;  %v4677_v33 = vld [vmem:[%s6342_s3 + $0x4c] ss:$16 sps:$4 sm:$0xff]   ;;  %v4675_v7 = vld [vmem:[%s6342_s3 + $0x48] ss:$16 sps:$4 sm:$0xff]  }
 0x6b2   : > { %v4680_v51 = vld [vmem:[%s6342_s3 + $0x6c] ss:$16 sps:$4 sm:$0xff]  }
 0x6b3   : > { %4753 = vpow2.f32 %v4183_v18  ;;  %v4681_v18 = vld [vmem:[%s6342_s3 + $0x88] ss:$16 sps:$4 sm:$0xff]  }
 0x6b4   : > { %v2727_v15 = vpop.f32.mrb[4].mxu0 }
 0x6b5   : > { %v2728_v46 = vadd.f32 %v2727_v15, %v2569_v47  ;;  %v2729_v50 = vpop.f32.mrb[5].mxu0  ;;  %v4683_v47 = vld [vmem:[%s6342_s3 + $0x8c] ss:$16 sps:$4 sm:$0xff]  }
 0x6b6   : > { %v2730_v20 = vpop.f32.mrb[6].mxu0  ;;  %v4686_v15 = vld [vmem:[%s6342_s3 + $0xac] ss:$16 sps:$4 sm:$0xff]  }
 0x6b7   : > { %v2732_v10 = vpop.f32.mrb[7].mxu0  ;;  %v4184_v49 = vmul.f32 -1.442695, %v2728_v46  ;;  %v2731_v8 = vadd.f32 %v2730_v20, %v2574_v11  ;;  %v4684_v46 = vld [vmem:[%s6342_s3 + $0xa8] ss:$16 sps:$4 sm:$0xff]  }
 0x6b8   : > { %v4689_v50 = vld [vmem:[%s6342_s3 + $0xcc] ss:$16 sps:$4 sm:$0xff]   ;;  %v4687_v11 = vld [vmem:[%s6342_s3 + $0xc8] ss:$16 sps:$4 sm:$0xff]  }
 0x6b9   : > { %4755 = vpow2.f32 %v4184_v49  ;;  %v4692_v20 = vld [vmem:[%s6342_s3 + $0xec] ss:$16 sps:$4 sm:$0xff]   ;;  %v4690_v10 = vld [vmem:[%s6342_s3 + $0xe8] ss:$16 sps:$4 sm:$0xff]  }
 0x6ba   : > { %4757 = vtanh.f32 %v2731_v8 }
 0x6bb   : > { %v4752_v28 = vpop.eup %4751 }
 0x6bc   : > { %v2737_v57 = vadd.f32 1.0, %v4752_v28 }
 0x6bd   : > { %v4754_v25 = vpop.eup %4753 }
 0x6be   : > { %4759 = vrcp.f32 %v2737_v57  ;;  %v2743_v58 = vadd.f32 1.0, %v4754_v25  ;;  %v4695_v25 = vld [vmem:[#allocation4 + $0x4] ss:$16 sps:$4 sm:$0xff]  }
 0x6bf   : > { %3714 = vmatprep.subr.bf16.mxu0 %v4695_v25 }
 0x6c0   : > { %4761 = vrcp.f32 %v2743_v58  ;;  %v4698_v58 = vld [vmem:[#allocation4 + $0xc] ss:$16 sps:$4 sm:$0xff]  }
 0x6c3   : > { %v4756_v22 = vpop.eup %4755 }
 0x6c4   : > { %v4758_v42 = vpop.eup %4757  ;;  %v2749_v4 = vadd.f32 1.0, %v4756_v22  ;;  %v4693_v22 = vld [vmem:[#allocation4] ss:$16 sps:$4 sm:$0xff]  }
 0x6c5   : > { %3715 = vmatpush1.bf16.msra.mxu0 %v4693_v22 }
 0x6c6   : > { %4763 = vrcp.f32 %v2749_v4  ;;  %v4707_v4 = vld [vmem:[#allocation4 + $0x44] ss:$16 sps:$4 sm:$0xff]  }
 0x6c8   : > { %v4760_v3 = vpop.eup %4759 }
 0x6c9   : > { %v2755_v39 = vmul.f32 %v4760_v3, %v4758_v42  ;;  %v4696_v42 = vld [vmem:[#allocation4 + $0x8] ss:$16 sps:$4 sm:$0xff]   ;;  %v4701_v3 = vld [vmem:[#allocation4 + $0x24] ss:$16 sps:$4 sm:$0xff]  }
 0x6ca   : > { %v4762_v14 = vpop.eup %4761  ;;  %3716 = vmatprep.subr.bf16.mxu0 %v4701_v3 }
 0x6cb   : > { %v2754_v26 = vmul.f32 %v4762_v14, %v2753_v34  ;;  %v4704_v34 = vld [vmem:[#allocation4 + $0x2c] ss:$16 sps:$4 sm:$0xff]   ;;  %v4702_v14 = vld [vmem:[#allocation4 + $0x28] ss:$16 sps:$4 sm:$0xff]  }
 0x6cd   : > { %v2756_v32 = vadd.f32 %v2755_v39, %v2754_v26  ;;  %v4699_v39 = vld [vmem:[#allocation4 + $0x20] ss:$16 sps:$4 sm:$0xff]   ;;  %v4710_v26 = vld [vmem:[#allocation4 + $0x4c] ss:$16 sps:$4 sm:$0xff]  }
 0x6ce   : > { %3717 = vmatpush1.bf16.msra.mxu0 %v4699_v39 }
 0x6cf   : > { %4765 = vtanh.f32 %v2756_v32  ;;  %2760 = vst [vmem:[#allocation6] sm:$0xff] %v2756_v32  ;;  %v4705_v32 = vld [vmem:[#allocation4 + $0x40] ss:$16 sps:$4 sm:$0xff]   ;;  %3718 = vmatprep.subr.bf16.mxu0 %v4707_v4 }
 0x6d0   : > { %v4764_v63 = vpop.eup %4763 }
 0x6d2   : > { %3719 = vmatpush1.bf16.msra.mxu0 %v4705_v32 }
 0x6d9   : > { %v4766_v17 = vpop.eup %4765 }
 0x6da   : > { %v2758_v27 = vmul.f32 %v4766_v17, %v4764_v63  ;;  %v4708_v63 = vld [vmem:[#allocation4 + $0x48] ss:$16 sps:$4 sm:$0xff]   ;;  %v4713_v17 = vld [vmem:[#allocation4 + $0x64] ss:$16 sps:$4 sm:$0xff]  }
 0x6db   : > { %3720 = vmatprep.subr.bf16.mxu0 %v4713_v17 }
 0x6dc   : > { %2759 = vst [vmem:[#allocation5] sm:$0xff] %v2758_v27  ;;  %v2761_v2 = vpack.c.bf16 %v2758_v27, %v2758_v27  ;;  %v4716_v27 = vld [vmem:[#allocation4 + $0x6c] ss:$16 sps:$4 sm:$0xff]  }
 0x6de   : > { %2987 = vmatmul.mubr.bf16.vlgmr.msra.gmra.mrb[0].mxu1 %v2761_v2 }
 0x6df   : > { %2996 = vmatpush1.bf16.msra.mxu1 %v4669_v1  ;;  %3027 = vmatprep.mubr.bf16.mxu1 %v4944_v56  ;;  %v4678_v56 = vld [vmem:[%s6342_s3 + $0x68] ss:$16 sps:$4 sm:$0xff]   ;;  %v4711_v1 = vld [vmem:[#allocation4 + $0x60] ss:$16 sps:$4 sm:$0xff]  }
 0x6e0   : > { %2997 = vmatprep.subr.bf16.mxu1 %v4674_v23  ;;  %3721 = vmatpush1.bf16.msra.mxu0 %v4711_v1 }
 0x6e3   : > { %2998 = vmatpush1.bf16.msra.mxu1 %v4672_v48 }
 0x6e4   : > { %2999 = vmatprep.subr.bf16.mxu1 %v4677_v33 }
 0x6e7   : > { %3000 = vmatpush1.bf16.msra.mxu1 %v4675_v7 }
 0x6e8   : > { %3001 = vmatprep.subr.bf16.mxu1 %v4680_v51  ;;  %v3384_v51 = vld [vmem:[%s6345_s6] sm:$0xff] }
 0x6eb   : > { %3002 = vmatpush1.bf16.msra.mxu1 %v4678_v56  ;;  %v3385_v56 = vld [vmem:[%s6345_s6 + $0x8] sm:$0xff] }
 0x6ec   : > { %3003 = vmatprep.subr.bf16.mxu1 %v4683_v47  ;;  %v3386_v47 = vld [vmem:[%s6345_s6 + $0x10] sm:$0xff] }
 0x6ef   : > { %3004 = vmatpush1.bf16.msra.mxu1 %v4681_v18  ;;  %v3387_v18 = vld [vmem:[%s6345_s6 + $0x18] sm:$0xff] }
 0x6f0   : > { %3005 = vmatprep.subr.bf16.mxu1 %v4686_v15  ;;  %v4747_v15 = vld [vmem:[%s6344_s5 + $0x4] ss:$8 sps:$4 sm:$0xff]  }
 0x6f1   : > { %4296 = vmatprep.mubr.msk.bf16.mxu0 %vm2675_vm15, %v4747_v15 }
 0x6f3   : > { %3006 = vmatpush1.bf16.msra.mxu1 %v4684_v46 }
 0x6f4   : > { %3007 = vmatprep.subr.bf16.mxu1 %v4689_v50 }
 0x6f7   : > { %3008 = vmatpush1.bf16.msra.mxu1 %v4687_v11 }
 0x6f8   : > { %3009 = vmatprep.subr.bf16.mxu1 %v4692_v20 }
 0x6fb   : > { %3010 = vmatpush1.bf16.msra.mxu1 %v4690_v10 }
 0x6fc   : > { %3767 = vmatprep.subr.bf16.mxu1 %v4698_v58 }
 0x6fe   : > { %3028 = vmatmul.mubr.bf16.vlgmr.msra.gmra.mrb[4].mxu1 %v2761_v2  ;;  %v4714_v2 = vld [vmem:[#allocation4 + $0x68] ss:$16 sps:$4 sm:$0xff]  }
 0x6ff   : > { %3768 = vmatpush1.bf16.msra.mxu1 %v4696_v42  ;;  %4299 = vmatprep.mubr.msk.bf16.mxu1 %vm2675_vm15, %v4747_v15 }
 0x700   : > { %3769 = vmatprep.subr.bf16.mxu1 %v4704_v34 }
 0x703   : > { %3770 = vmatpush1.bf16.msra.mxu1 %v4702_v14 }
 0x704   : > { %3771 = vmatprep.subr.bf16.mxu1 %v4710_v26 }
 0x707   : > { %3772 = vmatpush1.bf16.msra.mxu1 %v4708_v63 }
 0x708   : > { %3773 = vmatprep.subr.bf16.mxu1 %v4716_v27 }
 0x70b   : > { %3774 = vmatpush1.bf16.msra.mxu1 %v4714_v2 }
 0x7b1   : > { %v6069_v49 = vpop.f32.mrb[0].mxu1 }
 0x7b2   : > { %3036 = vrot.lane.b32.xlu0 %v6069_v49, %s4945_s26  ;;  %v6073_v8 = vpop.f32.mrb[1].mxu1 }
 0x7b3   : > { %3038 = vrot.lane.b32.xlu1 %v6073_v8, %s4945_s26  ;;  %v2992_v28 = vpop.f32.mrb[2].mxu1 }
 0x7b4   : > { %v2993_v57 = vpop.f32.mrb[3].mxu1 }
 0x7b6   : > { %3070 = vrot.lane.b32.xlu0 %v6069_v49, %s4946_s28 }
 0x7b7   : > { %3072 = vrot.lane.b32.xlu1 %v6073_v8, %s4946_s28 }
 0x7ba   : > { %3104 = vrot.lane.b32.xlu0 %v6069_v49, %s4947_s7 }
 0x7bb   : > { %3106 = vrot.lane.b32.xlu1 %v6073_v8, %s4947_s7 }
 0x7be   : > { %3138 = vrot.lane.b32.xlu0 %v6069_v49, %s4948_s8 }
 0x7bf   : > { %3140 = vrot.lane.b32.xlu1 %v6073_v8, %s4948_s8 }
 0x7c2   : > { %3190 = vrot.lane.b32.xlu0 %v6069_v49, %s4949_s11 }
 0x7c3   : > { %3192 = vrot.lane.b32.xlu1 %v6073_v8, %s4949_s11 }
 0x7c6   : > { %3224 = vrot.lane.b32.xlu0 %v6069_v49, %s4950_s30 }
 0x7c7   : > { %3226 = vrot.lane.b32.xlu1 %v6073_v8, %s4950_s30 }
 0x7ca   : > { %3258 = vrot.lane.b32.xlu0 %v6069_v49, %s4951_s1 }
 0x7cb   : > { %3260 = vrot.lane.b32.xlu1 %v6073_v8, %s4951_s1 }
 0x7ce   : > { %3292 = vrot.lane.b32.xlu0 %v6069_v49, %s4952_s27 }
 0x7cf   : > { %3294 = vrot.lane.b32.xlu1 %v6073_v8, %s4952_s27 }
 0x7d1   : > { %v6101_v23 = vpop.f32.mrb[4].mxu1 }
 0x7d2   : > { %v6103_v48 = vpop.f32.mrb[5].mxu1  ;;  %3040 = vrot.lane.b32.xlu0 %v6101_v23, %s4945_s26 }
 0x7d3   : > { %v3033_v33 = vpop.f32.mrb[6].mxu1  ;;  %3042 = vrot.lane.b32.xlu1 %v6103_v48, %s4945_s26 }
 0x7d4   : > { %v3034_v7 = vpop.f32.mrb[7].mxu1  ;;  %v6445_v33 = vld [vmem:[#allocation13_spill] sm:$0xff] }
 0x7d6   : > { %3074 = vrot.lane.b32.xlu0 %v6101_v23, %s4946_s28 }
 0x7d7   : > { %3076 = vrot.lane.b32.xlu1 %v6103_v48, %s4946_s28 }
 0x7da   : > { %3108 = vrot.lane.b32.xlu0 %v6101_v23, %s4947_s7 }
 0x7db   : > { %3110 = vrot.lane.b32.xlu1 %v6103_v48, %s4947_s7 }
 0x7de   : > { %3142 = vrot.lane.b32.xlu0 %v6101_v23, %s4948_s8 }
 0x7df   : > { %3144 = vrot.lane.b32.xlu1 %v6103_v48, %s4948_s8 }
 0x7e2   : > { %3194 = vrot.lane.b32.xlu0 %v6101_v23, %s4949_s11 }
 0x7e3   : > { %3196 = vrot.lane.b32.xlu1 %v6103_v48, %s4949_s11 }
 0x7e6   : > { %3228 = vrot.lane.b32.xlu0 %v6101_v23, %s4950_s30 }
 0x7e7   : > { %3230 = vrot.lane.b32.xlu1 %v6103_v48, %s4950_s30 }
 0x7ea   : > { %3262 = vrot.lane.b32.xlu0 %v6101_v23, %s4951_s1 }
 0x7eb   : > { %3264 = vrot.lane.b32.xlu1 %v6103_v48, %s4951_s1 }
 0x7ee   : > { %3296 = vrot.lane.b32.xlu0 %v6101_v23, %s4952_s27 }
 0x7ef   : > { %3298 = vrot.lane.b32.xlu1 %v6103_v48, %s4952_s27 }
 0x7f2   : > { %3390 = vperm.xlu0 %4623, %v3384_v51  }
 0x7f3   : > { %3395 = vperm.xlu1 %4624, %v3385_v56   ;;  %v6446_v56 = vld [vmem:[#allocation11_spill] sm:$0xff] }
 0x7f6   : > { %3400 = vperm.xlu0 %4623, %v3386_v47  }
 0x7f7   : > { %3405 = vperm.xlu1 %4624, %v3387_v18   ;;  %v6447_v18 = vld [vmem:[#allocation12_spill] sm:$0xff] }
 0x824   : > { %v3037_v46 = vpop.permute.xlu0 %3036 }
 0x825   : > { %v3039_v50 = vpop.permute.xlu1 %3038 }
 0x826   : > { %v3046_v26 = vsel %vm574_vm1, %v3037_v46, %v3039_v50 }
 0x827   : > { %v3049_v7 = vmul.f32 %v3046_v26, %v6445_v33 }
 0x828   : > { %v3071_v11 = vpop.permute.xlu0 %3070 }
 0x829   : > { %v3073_v20 = vpop.permute.xlu1 %3072 }
 0x82a   : > { %v3080_v51 = vsel %vm625_vm2, %v3071_v11, %v3073_v20 }
 0x82c   : > { %v3105_v10 = vpop.permute.xlu0 %3104 }
 0x82d   : > { %v3107_v28 = vpop.permute.xlu1 %3106 }
 0x830   : > { %v3139_v57 = vpop.permute.xlu0 %3138 }
 0x831   : > { %v3141_v25 = vpop.permute.xlu1 %3140 }
 0x834   : > { %v6150_v58 = vpop.permute.xlu0 %3190 }
 0x835   : > { %v6152_v22 = vpop.permute.xlu1 %3192 }
 0x838   : > { %v6154_v42 = vpop.permute.xlu0 %3224 }
 0x839   : > { %v6156_v3 = vpop.permute.xlu1 %3226 }
 0x83c   : > { %v6158_v34 = vpop.permute.xlu0 %3258 }
 0x83d   : > { %v6160_v39 = vpop.permute.xlu1 %3260 }
 0x840   : > { %v6162_v14 = vpop.permute.xlu0 %3292 }
 0x841   : > { %v6164_v4 = vpop.permute.xlu1 %3294 }
 0x844   : > { %v3041_v32 = vpop.permute.xlu0 %3040 }
 0x845   : > { %v3045_v63 = vsel %vm574_vm1, %v3039_v50, %v3041_v32  ;;  %v3043_v17 = vpop.permute.xlu1 %3042  ;;  %v3346_v50 = vld [vmem:[#allocation4 + $0x80] sm:$0xff] }
 0x846   : > { %v3050_v27 = vmul.f32 %v3045_v63, %v5201_v24  ;;  %v3044_v1 = vsel %vm574_vm1, %v3041_v32, %v3043_v17  ;;  %v3047_v2 = vsel %vm574_vm1, %v3043_v17, %v3037_v46  ;;  %v3347_v63 = vld [vmem:[#allocation4 + $0x88] sm:$0xff]  ;;  %v3083_v46 = vmul.f32 %v3080_v51, %v5221_v40 }
 0x847   : > { %v3048_v47 = vmul.f32 %v3047_v2, %v6446_v56  ;;  %v3051_v15 = vmul.f32 %v3044_v1, %v6447_v18  ;;  %v6448_v17 = vld [vmem:[#allocation14_spill] sm:$0xff] }
 0x848   : > { %v3075_v16 = vpop.permute.xlu0 %3074 }
 0x849   : > { %v4373_v21 = vpack.c.bf16 %v3049_v7, %v3048_v47  ;;  %v4374_v35 = vpack.c.bf16 %v3051_v15, %v3050_v27  ;;  %v3079_v24 = vsel %vm625_vm2, %v3073_v20, %v3075_v16  ;;  %v3077_v32 = vpop.permute.xlu1 %3076  ;;  %v3114_v20 = vsel %vm676_vm3, %v3105_v10, %v3107_v28 }
 0x84a   : > { %v3084_v26 = vmul.f32 %v3079_v24, %v6448_v17  ;;  %v3078_v33 = vsel %vm625_vm2, %v3075_v16, %v3077_v32  ;;  %v3081_v2 = vsel %vm625_vm2, %v3077_v32, %v3071_v11  ;;  %v6449_v17 = vld [vmem:[#allocation15_spill] sm:$0xff] }
 0x84b   : > { %v3082_v1 = vmul.f32 %v3081_v2, %v5225_v41  ;;  %v3085_v7 = vmul.f32 %v3078_v33, %v5233_v43  ;;  %v4255_v27 = vcombine.low %v3346_v50, %v4373_v21  ;;  %v4256_v56 = vcombine.high %v3346_v50, %v4373_v21 }
 0x84c   : > { %v3109_v47 = vpop.permute.xlu0 %3108  ;;  %v4257_v18 = vcombine.low %v3347_v63, %v4374_v35  ;;  %v4258_v40 = vcombine.high %v3347_v63, %v4374_v35  ;;  %v3117_v21 = vmul.f32 %v3114_v20, %v5253_v59  ;;  %v3148_v35 = vsel %vm727_vm4, %v3139_v57, %v3141_v25 }
 0x84d   : > { %v3113_v51 = vsel %vm676_vm3, %v3107_v28, %v3109_v47  ;;  %v3111_v15 = vpop.permute.xlu1 %3110  ;;  %3722 = vmatprep.subr.bf16.mxu0 %v4256_v56  ;;  %v3151_v59 = vmul.f32 %v3148_v35, %v5285_v36  ;;  %v3234_v36 = vsel %vm847_vm6, %v6154_v42, %v6156_v3 }
 0x84e   : > { %v3118_v16 = vmul.f32 %v3113_v51, %v5261_v61  ;;  %v3112_v41 = vsel %vm676_vm3, %v3109_v47, %v3111_v15  ;;  %v3115_v43 = vsel %vm676_vm3, %v3111_v15, %v3105_v10  ;;  %3775 = vmatprep.subr.bf16.mxu1 %v4258_v40  ;;  %3723 = vmatpush1.bf16.msra.mxu0 %v4255_v27 }
 0x84f   : > { %v3116_v11 = vmul.f32 %v3115_v43, %v5257_v60  ;;  %v3119_v28 = vmul.f32 %v3112_v41, %v5265_v62  ;;  %3776 = vmatpush1.bf16.msra.mxu1 %v4257_v18  ;;  %v3200_v61 = vsel %vm796_vm5, %v6150_v58, %v6152_v22  ;;  %v4872_v27 = vpack.c.bf16 %v3117_v21, %v3083_v46 }
 0x850   : > { %v3143_v50 = vpop.permute.xlu0 %3142  ;;  %v3202_v56 = vmul.f32 %v3200_v61, %v5317_v0  ;;  %v4873_v20 = vpack.c.bf16 %v3118_v16, %v3084_v26  ;;  %v3236_v51 = vmul.f32 %v3234_v36, %v5349_v52  ;;  %v3382_v36 = vld [vmem:[#allocation4 + $0x1a0] sm:$0xff] }
 0x851   : > { %v3147_v10 = vsel %vm727_vm4, %v3141_v25, %v3143_v50  ;;  %v3145_v24 = vpop.permute.xlu1 %3144  ;;  %v4871_v2 = vpack.c.bf16 %v3116_v11, %v3082_v1  ;;  %v4874_v47 = vpack.c.bf16 %v3119_v28, %v3085_v7  ;;  %3724 = vmatprep.subr.bf16.mxu0 %v4872_v27  ;;  %v4876_v7 = vpack.c.bf16 %v6073_v8, %v3151_v59  ;;  %v4734_v27 = vld [vmem:[#allocation4 + $0x16c] ss:$16 sps:$4 sm:$0xff]  }
 0x852   : > { %v3152_v32 = vmul.f32 %v3147_v10, %v5293_v38  ;;  %v3146_v60 = vsel %vm727_vm4, %v3143_v50, %v3145_v24  ;;  %v3149_v62 = vsel %vm727_vm4, %v3145_v24, %v3139_v57 }
 0x853   : > { %v3150_v63 = vmul.f32 %v3149_v62, %v5289_v37  ;;  %v3153_v33 = vmul.f32 %v3146_v60, %v6449_v17  ;;  %3777 = vmatprep.subr.bf16.mxu1 %v4874_v47  ;;  %3725 = vmatpush1.bf16.msra.mxu0 %v4871_v2  ;;  %v4728_v17 = vld [vmem:[#allocation4 + $0x14c] ss:$16 sps:$4 sm:$0xff]   ;;  %v4731_v2 = vld [vmem:[#allocation4 + $0x164] ss:$16 sps:$4 sm:$0xff]  }
 0x854   : > { %v3195_v25 = vpop.permute.xlu0 %3194  ;;  %3778 = vmatpush1.bf16.msra.mxu1 %v4873_v20  ;;  %3726 = vmatprep.subr.bf16.mxu0 %v4876_v7  ;;  %v4737_v20 = vld [vmem:[#allocation4 + $0x184] ss:$16 sps:$4 sm:$0xff]   ;;  %v4740_v47 = vld [vmem:[#allocation4 + $0x18c] ss:$16 sps:$4 sm:$0xff]  }
 0x855   : > { %v3199_v38 = vsel %vm796_vm5, %v6152_v22, %v3195_v25  ;;  %v3197_v57 = vpop.permute.xlu1 %3196  ;;  %v4875_v22 = vpack.c.bf16 %v6069_v49, %v3150_v63  ;;  %v4878_v40 = vpack.c.bf16 %v6103_v48, %v3153_v33  ;;  %v4717_v63 = vld [vmem:[#allocation4 + $0x120] ss:$16 sps:$4 sm:$0xff]   ;;  %v4726_v33 = vld [vmem:[#allocation4 + $0x148] ss:$16 sps:$4 sm:$0xff]  }
 0x856   : > { %v3203_v37 = vmul.f32 %v3199_v38, %v5325_v6  ;;  %v3198_v46 = vsel %vm796_vm5, %v3195_v25, %v3197_v57  ;;  %v3201_v0 = vsel %vm796_vm5, %v3197_v57, %v6150_v58  ;;  %v4877_v6 = vpack.c.bf16 %v6101_v23, %v3152_v32  ;;  %v4719_v32 = vld [vmem:[#allocation4 + $0x124] ss:$16 sps:$4 sm:$0xff]   ;;  %v4732_v25 = vld [vmem:[#allocation4 + $0x168] ss:$16 sps:$4 sm:$0xff]   ;;  %v4735_v57 = vld [vmem:[#allocation4 + $0x180] ss:$16 sps:$4 sm:$0xff]  }
 0x857   : > { %v3204_v26 = vmul.f32 %v3198_v46, %v5329_v9  ;;  %v3205_v1 = vmul.f32 %v3201_v0, %v5321_v5  ;;  %v3268_v58 = vsel %vm898_vm7, %v6158_v34, %v6160_v39  ;;  %3779 = vmatprep.subr.bf16.mxu1 %v4878_v40  ;;  %3727 = vmatpush1.bf16.msra.mxu0 %v4875_v22  ;;  %v3383_v38 = vld [vmem:[#allocation4 + $0x1a8] sm:$0xff]  ;;  %v4750_v40 = vld [vmem:[%s6344_s5 + $0x10] ss:$8 sps:$4 sm:$0xff]  }
 0x858   : > { %v3229_v18 = vpop.permute.xlu0 %3228  ;;  %3780 = vmatpush1.bf16.msra.mxu1 %v4877_v6  ;;  %v4292_v46 = vcombine.high %v3382_v36, %v3382_v36  ;;  %v4291_v0 = vcombine.low %v3382_v36, %v3382_v36  ;;  %v4748_v6 = vld [vmem:[%s6344_s5 + $0x14] ss:$8 sps:$4 sm:$0xff]  }
 0x859   : > { %v3233_v5 = vsel %vm847_vm6, %v6156_v3, %v3229_v18  ;;  %v3231_v9 = vpop.permute.xlu1 %3230  ;;  %v3270_v3 = vmul.f32 %v3268_v58, %v5385_v12  ;;  %v4879_v12 = vpack.c.bf16 %v3236_v51, %v3202_v56  ;;  %v4729_v56 = vld [vmem:[#allocation4 + $0x160] ss:$16 sps:$4 sm:$0xff]  }
 0x85a   : > { %v3237_v49 = vmul.f32 %v3233_v5, %v5357_v54  ;;  %v3232_v8 = vsel %vm847_vm6, %v3229_v18, %v3231_v9  ;;  %v3235_v52 = vsel %vm847_vm6, %v3231_v9, %v6154_v42  ;;  %v3302_v54 = vsel %vm949_vm8, %v6162_v14, %v6164_v4  ;;  %v4745_v18 = vld [vmem:[%s6344_s5] ss:$8 sps:$4 sm:$0xff]  }
 0x85b   : > { %v3238_v23 = vmul.f32 %v3232_v8, %v5361_v55  ;;  %v3239_v48 = vmul.f32 %v3235_v52, %v5353_v53  ;;  %v3703_v22 = vsel %vm1111_vm9, %v4291_v0, 0 }
 0x85c   : > { %v3263_v15 = vpop.permute.xlu0 %3262  ;;  %v4880_v35 = vpack.c.bf16 %v3237_v49, %v3203_v37  ;;  %v4738_v37 = vld [vmem:[#allocation4 + $0x188] ss:$16 sps:$4 sm:$0xff]  }
 0x85d   : > { %v3267_v16 = vsel %vm898_vm7, %v6160_v39, %v3263_v15  ;;  %v3265_v42 = vpop.permute.xlu1 %3264  ;;  %v4881_v11 = vpack.c.bf16 %v3238_v23, %v3204_v26  ;;  %v4882_v50 = vpack.c.bf16 %v3239_v48, %v3205_v1  ;;  %v3304_v39 = vmul.f32 %v5415_v19, %v3302_v54  ;;  %v6450_v19 = vld [vmem:[#allocation16_spill] sm:$0xff] }
 0x85e   : > { %v3271_v41 = vmul.f32 %v3267_v16, %v5393_v31  ;;  %v3266_v55 = vsel %vm898_vm7, %v3263_v15, %v3265_v42  ;;  %v3269_v53 = vsel %vm898_vm7, %v3265_v42, %v6158_v34  ;;  %3728 = vmatprep.subr.bf16.mxu0 %v4880_v35  ;;  %v4294_v26 = vcombine.high %v3383_v38, %v3383_v38 }
 0x85f   : > { %v3272_v43 = vmul.f32 %v3266_v55, %v5397_v45  ;;  %v3273_v21 = vmul.f32 %v3269_v53, %v5389_v30  ;;  %3729 = vmatpush1.bf16.msra.mxu0 %v4879_v12  ;;  %3781 = vmatprep.subr.bf16.mxu1 %v4882_v50  ;;  %v4883_v59 = vpack.c.bf16 %v3304_v39, %v3270_v3 }
 0x860   : > { %v3297_v28 = vpop.permute.xlu0 %3296  ;;  %3782 = vmatpush1.bf16.msra.mxu1 %v4881_v11  ;;  %v4293_v1 = vcombine.low %v3383_v38, %v3383_v38 }
 0x861   : > { %v3301_v31 = vsel %vm949_vm8, %v6164_v4, %v3297_v28  ;;  %v3299_v61 = vpop.permute.xlu1 %3298 }
 0x862   : > { %v3305_v10 = vmul.f32 %v5427_v44, %v3301_v31  ;;  %v3300_v34 = vsel %vm949_vm8, %v3297_v28, %v3299_v61  ;;  %v3303_v30 = vsel %vm949_vm8, %v3299_v61, %v6162_v14  ;;  %v4722_v44 = vld [vmem:[#allocation4 + $0x12c] ss:$16 sps:$4 sm:$0xff]   ;;  %v4725_v14 = vld [vmem:[#allocation4 + $0x144] ss:$16 sps:$4 sm:$0xff]   ;;  %v3709_v7 = vsel %vm1111_vm9, %v4293_v1, 0 }
 0x863   : > { %v3306_v45 = vmul.f32 %v5432_v29, %v3300_v34  ;;  %v3307_v24 = vmul.f32 %v6450_v19, %v3303_v30  ;;  %v4723_v29 = vld [vmem:[#allocation4 + $0x140] ss:$16 sps:$4 sm:$0xff]  }
 0x864   : > { %v4884_v4 = vpack.c.bf16 %v3305_v10, %v3271_v41 }
 0x865   : > { %v4885_v60 = vpack.c.bf16 %v3306_v45, %v3272_v43  ;;  %v4886_v62 = vpack.c.bf16 %v3307_v24, %v3273_v21 }
 0x866   : > { %3730 = vmatprep.subr.bf16.mxu0 %v4884_v4 }
 0x867   : > { %3731 = vmatpush1.bf16.msra.mxu0 %v4883_v59  ;;  %3783 = vmatprep.subr.bf16.mxu1 %v4886_v62 }
 0x868   : > { %3784 = vmatpush1.bf16.msra.mxu1 %v4885_v60  ;;  %3732 = vmatprep.subr.bf16.mxu0 %v4719_v32 }
 0x869   : > { %3785 = vmatprep.subr.bf16.mxu1 %v4722_v44 }
 0x86b   : > { %3733 = vmatpush1.bf16.msra.mxu0 %v4717_v63 }
 0x86c   : > { %3786 = vmatpush1.bf16.msra.mxu1 %v4720_v13  ;;  %3734 = vmatprep.subr.bf16.mxu0 %v4725_v14 }
 0x86d   : > { %3787 = vmatprep.subr.bf16.mxu1 %v4728_v17 }
 0x86f   : > { %3735 = vmatpush1.bf16.msra.mxu0 %v4723_v29 }
 0x870   : > { %3788 = vmatpush1.bf16.msra.mxu1 %v4726_v33  ;;  %3736 = vmatprep.subr.bf16.mxu0 %v4731_v2 }
 0x871   : > { %3789 = vmatprep.subr.bf16.mxu1 %v4734_v27  ;;  %v3391_v51 = vpop.permute.xlu0 %3390 }
 0x872   : > { %v3396_v58 = vpop.permute.xlu1 %3395 }
 0x873   : > { %3737 = vmatpush1.bf16.msra.mxu0 %v4729_v56 }
 0x874   : > { %3790 = vmatpush1.bf16.msra.mxu1 %v4732_v25  ;;  %3738 = vmatprep.subr.bf16.mxu0 %v4737_v20 }
 0x875   : > { %3791 = vmatprep.subr.bf16.mxu1 %v4740_v47  ;;  %v3401_v39 = vpop.permute.xlu0 %3400 }
 0x876   : > { %v3406_v32 = vpop.permute.xlu1 %3405 }
 0x877   : > { %3739 = vmatpush1.bf16.msra.mxu0 %v4735_v57 }
 0x878   : > { %3792 = vmatpush1.bf16.msra.mxu1 %v4738_v37  ;;  %4295 = vmatprep.subr.msk.bf16.mxu0 %vm1111_vm9, %v4292_v46 }
 0x879   : > { %4298 = vmatprep.subr.msk.bf16.mxu1 %vm1111_vm9, %v4294_v26 }
 0x87b   : > { %3741 = vmatpush1.bf16.msra.mxu0 %v3703_v22 }
 0x87c   : > { %3794 = vmatpush1.bf16.msra.mxu1 %v3709_v7 }
 0x87e   : > { %3747 = vmatmul.mubr.bf16.vlgmr.msra.gmra.mrb[8].mxu0 %v4745_v18 }
 0x87f   : > { %3800 = vmatmul.mubr.bf16.vlgmr.msra.gmra.mrb[8].mxu1 %v4745_v18  ;;  %4297 = vmatprep.mubr.msk.bf16.mxu0 %vm2675_vm15, %v4748_v6 }
 0x880   : > { %4300 = vmatprep.mubr.msk.bf16.mxu1 %vm2675_vm15, %v4748_v6 }
 0x886   : > { %3757 = vmatmul.mubr.bf16.gmra.mrb[12].mxu0 %v4750_v40 }
 0x887   : > { %3810 = vmatmul.mubr.bf16.gmra.mrb[12].mxu1 %v4750_v40 }
 0x951   : > { %v3748_v5 = vpop.f32.mrb[8].mxu0 }
 0x952   : > { %v3749_v9 = vadd.f32 %v3748_v5, %v3391_v51  ;;  %v3750_v49 = vpop.f32.mrb[9].mxu0  ;;  %v3801_v8 = vpop.f32.mrb[8].mxu1 }
 0x953   : > { %v3751_v52 = vadd.f32 %v3750_v49, %v3391_v51  ;;  %v3802_v23 = vadd.f32 %v3801_v8, %v3391_v51  ;;  %v3752_v48 = vpop.f32.mrb[10].mxu0  ;;  %v3803_v15 = vpop.f32.mrb[9].mxu1 }
 0x954   : > { %v4301_v3 = vmul.f32 -1.442695, %v3749_v9  ;;  %v3753_v54 = vadd.f32 %v3752_v48, %v3396_v58  ;;  %v3754_v16 = vpop.f32.mrb[11].mxu0  ;;  %v3805_v42 = vpop.f32.mrb[10].mxu1  ;;  %v3804_v55 = vadd.f32 %v3803_v15, %v3391_v51  ;;  %v3896_v9 = vld [vmem:[#allocation3] sm:$0xff] }
 0x955   : > { %v4302_v41 = vmul.f32 -1.442695, %v3751_v52  ;;  %v3755_v53 = vadd.f32 %v3754_v16, %v3396_v58  ;;  %v3806_v12 = vadd.f32 %v3805_v42, %v3396_v58  ;;  %v3807_v43 = vpop.f32.mrb[11].mxu1  ;;  %v4303_v21 = vmul.f32 -1.442695, %v3802_v23 }
 0x956   : > { %4767 = vpow2.f32 %v4301_v3  ;;  %v4305_v35 = vmul.f32 -1.442695, %v3753_v54  ;;  %v3808_v11 = vadd.f32 %v3807_v43, %v3396_v58  ;;  %v4304_v10 = vmul.f32 -1.442695, %v3804_v55 }
 0x957   : > { %v4306_v28 = vmul.f32 -1.442695, %v3755_v53  ;;  %4769 = vpow2.f32 %v4302_v41  ;;  %v4307_v50 = vmul.f32 -1.442695, %v3806_v12  ;;  %v3897_v41 = vld [vmem:[#allocation3 + $0x8] sm:$0xff]  ;;  %v3898_v12 = vld [vmem:[#allocation3 + $0x10] sm:$0xff] }
 0x958   : > { %4771 = vpow2.f32 %v4305_v35  ;;  %v4308_v31 = vmul.f32 -1.442695, %v3808_v11  ;;  %v3899_v35 = vld [vmem:[#allocation3 + $0x18] sm:$0xff] }
 0x959   : > { %v3758_v61 = vpop.f32.mrb[12].mxu0  ;;  %4773 = vpow2.f32 %v4303_v21 }
 0x95a   : > { %v3759_v34 = vadd.f32 %v3758_v61, %v3401_v39  ;;  %v3760_v30 = vpop.f32.mrb[13].mxu0  ;;  %v3811_v45 = vpop.f32.mrb[12].mxu1  ;;  %4775 = vpow2.f32 %v4306_v28 }
 0x95b   : > { %v3762_v19 = vpop.f32.mrb[14].mxu0  ;;  %v3813_v24 = vpop.f32.mrb[13].mxu1  ;;  %4777 = vpow2.f32 %v4307_v50  ;;  %v3761_v62 = vadd.f32 %v3760_v30, %v3401_v39  ;;  %v3812_v13 = vadd.f32 %v3811_v45, %v3401_v39 }
 0x95c   : > { %v3764_v59 = vpop.f32.mrb[15].mxu0  ;;  %v3815_v4 = vpop.f32.mrb[14].mxu1  ;;  %4779 = vpow2.f32 %v4308_v31  ;;  %v4309_v60 = vmul.f32 -1.442695, %v3759_v34  ;;  %v3763_v63 = vadd.f32 %v3762_v19, %v3406_v32  ;;  %v3814_v17 = vadd.f32 %v3813_v24, %v3401_v39 }
 0x95d   : > { %v3817_v44 = vpop.f32.mrb[15].mxu1  ;;  %4781 = vpow2.f32 %v4304_v10  ;;  %v4310_v33 = vmul.f32 -1.442695, %v3761_v62  ;;  %v4311_v56 = vmul.f32 -1.442695, %v3812_v13  ;;  %v3765_v7 = vadd.f32 %v3764_v59, %v3406_v32 }
 0x95e   : > { %4783 = vpow2.f32 %v4309_v60  ;;  %v4312_v47 = vmul.f32 -1.442695, %v3814_v17  ;;  %v3816_v51 = vadd.f32 %v3815_v4, %v3406_v32  ;;  %v3818_v5 = vadd.f32 %v3817_v44, %v3406_v32 }
 0x95f   : > { %4785 = vtanh.f32 %v3763_v63 }
 0x960   : > { %v4768_v14 = vpop.eup %4767 }
 0x961   : > { %v3832_v29 = vadd.f32 1.0, %v4768_v14  ;;  %v4770_v2 = vpop.eup %4769 }
 0x962   : > { %v4772_v27 = vpop.eup %4771  ;;  %v3833_v38 = vadd.f32 1.0, %v4770_v2 }
 0x963   : > { %4787 = vrcp.f32 %v3832_v29  ;;  %v4774_v25 = vpop.eup %4773  ;;  %v3856_v20 = vadd.f32 1.0, %v4772_v27 }
 0x964   : > { %v4776_v36 = vpop.eup %4775  ;;  %4789 = vpow2.f32 %v4310_v33  ;;  %v3834_v0 = vadd.f32 1.0, %v4774_v25 }
 0x965   : > { %v4778_v57 = vpop.eup %4777  ;;  %4791 = vrcp.f32 %v3856_v20  ;;  %v3857_v37 = vadd.f32 1.0, %v4776_v36 }
 0x966   : > { %v4780_v46 = vpop.eup %4779  ;;  %4793 = vpow2.f32 %v4311_v56  ;;  %v3858_v1 = vadd.f32 1.0, %v4778_v57 }
 0x967   : > { %v4782_v26 = vpop.eup %4781  ;;  %4795 = vpow2.f32 %v4312_v47  ;;  %v3859_v22 = vadd.f32 1.0, %v4780_v46 }
 0x968   : > { %4797 = vrcp.f32 %v3833_v38  ;;  %v4784_v18 = vpop.eup %4783  ;;  %v3835_v6 = vadd.f32 1.0, %v4782_v26 }
 0x969   : > { %4799 = vrcp.f32 %v3857_v37  ;;  %v4786_v40 = vpop.eup %4785  ;;  %v3880_v23 = vadd.f32 1.0, %v4784_v18 }
 0x96a   : > { %4801 = vrcp.f32 %v3834_v0 }
 0x96b   : > { %4803 = vrcp.f32 %v3858_v1 }
 0x96c   : > { %4805 = vrcp.f32 %v3859_v22 }
 0x96d   : > { %v4788_v58 = vpop.eup %4787  ;;  %4807 = vtanh.f32 %v3765_v7 }
 0x96e   : > { %v3904_v49 = vmul.f32 %v4788_v58, %v4786_v40  ;;  %v4790_v8 = vpop.eup %4789  ;;  %4809 = vrcp.f32 %v3835_v6 }
 0x96f   : > { %v4792_v52 = vpop.eup %4791  ;;  %4811 = vtanh.f32 %v3816_v51  ;;  %v3881_v11 = vadd.f32 1.0, %v4790_v8 }
 0x970   : > { %v4794_v48 = vpop.eup %4793  ;;  %v3900_v15 = vmul.f32 %v4792_v52, %v3896_v9  ;;  %4813 = vtanh.f32 %v3818_v5 }
 0x971   : > { %v4796_v3 = vpop.eup %4795  ;;  %4815 = vrcp.f32 %v3880_v23  ;;  %v3882_v50 = vadd.f32 1.0, %v4794_v48 }
 0x972   : > { %v4798_v54 = vpop.eup %4797  ;;  %v3908_v16 = vadd.f32 %v3904_v49, %v3900_v15  ;;  %v3883_v30 = vadd.f32 1.0, %v4796_v3 }
 0x973   : > { %v4800_v42 = vpop.eup %4799 }
 0x974   : > { %v4802_v55 = vpop.eup %4801  ;;  %4817 = vtanh.f32 %v3908_v16  ;;  %3924 = vst [vmem:[#allocation3] sm:$0xff] %v3908_v16  ;;  %v3901_v21 = vmul.f32 %v4800_v42, %v3897_v41 }
 0x975   : > { %v4804_v53 = vpop.eup %4803  ;;  %4819 = vrcp.f32 %v3881_v11 }
 0x976   : > { %v4806_v43 = vpop.eup %4805  ;;  %v3902_v31 = vmul.f32 %v4804_v53, %v3898_v12  ;;  %4821 = vrcp.f32 %v3882_v50 }
 0x977   : > { %v4808_v28 = vpop.eup %4807  ;;  %v3903_v34 = vmul.f32 %v4806_v43, %v3899_v35 }
 0x978   : > { %v4810_v39 = vpop.eup %4809  ;;  %v3905_v61 = vmul.f32 %v4808_v28, %v4798_v54 }
 0x979   : > { %v4812_v10 = vpop.eup %4811 }
 0x97a   : > { %v4814_v45 = vpop.eup %4813  ;;  %v3909_v19 = vadd.f32 %v3905_v61, %v3901_v21  ;;  %v3906_v24 = vmul.f32 %v4812_v10, %v4802_v55 }
 0x97b   : > { %v3907_v59 = vmul.f32 %v4814_v45, %v4810_v39  ;;  %v4816_v32 = vpop.eup %4815 }
 0x97c   : > { %4823 = vtanh.f32 %v3909_v19  ;;  %3925 = vst [vmem:[#allocation3 + $0x8] sm:$0xff] %v3909_v19  ;;  %v3910_v4 = vadd.f32 %v3906_v24, %v3902_v31 }
 0x97d   : > { %4825 = vrcp.f32 %v3883_v30  ;;  %v3911_v60 = vadd.f32 %v3907_v59, %v3903_v34 }
 0x97e   : > { %v4818_v62 = vpop.eup %4817  ;;  %4827 = vtanh.f32 %v3910_v4  ;;  %3926 = vst [vmem:[#allocation3 + $0x10] sm:$0xff] %v3910_v4 }
 0x97f   : > { %v3916_v44 = vmul.f32 %v4818_v62, %v4816_v32  ;;  %4829 = vtanh.f32 %v3911_v60  ;;  %3927 = vst [vmem:[#allocation3 + $0x18] sm:$0xff] %v3911_v60  ;;  %v4820_v63 = vpop.eup %4819 }
 0x980   : > { %v4822_v13 = vpop.eup %4821 }
 0x981   : > { %3920 = vst [vmem:[#allocation2] sm:$0xff] %v3916_v44 }
 0x986   : > { %v4824_v14 = vpop.eup %4823 }
 0x987   : > { %v4826_v17 = vpop.eup %4825  ;;  %v3917_v29 = vmul.f32 %v4824_v14, %v4820_v63 }
 0x988   : > { %v4828_v33 = vpop.eup %4827 }
 0x989   : > { %v4830_v2 = vpop.eup %4829  ;;  %3921 = vst [vmem:[#allocation2 + $0x8] sm:$0xff] %v3917_v29  ;;  %v3918_v27 = vmul.f32 %v4828_v33, %v4822_v13 }
 0x98a   : > { %v3919_v56 = vmul.f32 %v4830_v2, %v4826_v17 }
 0x98b   : > { %3922 = vst [vmem:[#allocation2 + $0x10] sm:$0xff] %v3918_v27 }
 0x98c   : > { %3923 = vst [vmem:[#allocation2 + $0x18] sm:$0xff] %v3919_v56 }
 0x98d PF: > { %p4313_p7 = scmp.ne.s32.totalorder %s5050_s25, 3 }
 0x98e   : > { %v6451_v25 = vld [vmem:[#allocation20_spill] sm:$0xff] (!%p4313_p7)  ;;  %v6452_v20 = vld [vmem:[#allocation18_spill] sm:$0xff] (!%p4313_p7)  ;;  %v6453_v36 = vld [vmem:[#allocation21_spill] sm:$0xff] (!%p4313_p7)  ;;  %vm3947_vm0 = vcmask (!%p4313_p7), 1040384   ;;  %vm3949_vm1 = vcmask (!%p4313_p7), 9216  }
 0x98f   : > { %3931 = sbr.rel (%p4313_p7) target bundleno = 2458 (0x99a), region = 92  ;;  %v3936_v47 = vcombine.low (!%p4313_p7), %v6452_v20, %v6451_v25  ;;  %v6454_v38 = vld [vmem:[#allocation19_spill] sm:$0xff] (!%p4313_p7)  ;;  %v6455_v37 = vld [vmem:[#allocation22_spill] sm:$0xff] (!%p4313_p7) }
 0x990   : > { %v3937_v57 = vcombine.low (!%p4313_p7), %v6454_v38, %v6453_v36  ;;  %v3942_v46 = vmul.f32 (!%p4313_p7), 0.0009765625, %v6455_v37 }
 0x991   : > { %3940 = vst [vmem:[%s6354_s15] sm:$0xff] (!%p4313_p7), %v3936_v47 }
 0x992   : > { %3941 = vst [vmem:[%s6354_s15 + $0x8] sm:$0xff] (!%p4313_p7), %v3937_v57 }
 0x993   : > { %v6456_v0 = vld [vmem:[#allocation17_spill] sm:$0xff] (!%p4313_p7) }
 0x994   : > { %v3943_v26 = vmul.f32 (!%p4313_p7), 0.001953125, %v6456_v0 }
 0x996   : > { %v3945_v1 = vrot.slane %v3943_v26, 7 }
 0x998   : > { %v3948_v22 = vsel %vm3947_vm0, %v3942_v46, %v3945_v1 }
 0x999   : > { %3950 = vst.msk [vmem:[%s6356_s17] sm:$0x3] %vm3949_vm1, %v3948_v22 }
 0x99a PF: > { %p4512_p8 = scmp.eq.s32.totalorder %s5050_s25, 3  ;;  %s4953_s18 = smov [#allocation8]  }
 0x99b   : > { %s3961_s22 = sshll.u32 %s4953_s18, 4  ;;  %s3962_s22 = int_to_ptr.vmem [resolvable:$true] %s3961_s22 }
 0x99c   : > { %s4887_s26 = scalar_lea.vmem %s3962_s22, 16  ;;  %s4893_s28 = scalar_lea.vmem %s3962_s22, 32 }
 0x99d   : > { %p4888_p9 = scmp.ne.s32.totalorder %s3962_s22, %s4887_s26  ;;  %p4894_p12 = scmp.lt.s32.totalorder %s3962_s22, %s3962_s22 }
 0x99e   : > { %p4895_p13 = scmp.lt.s32.totalorder %s4893_s28, %s4887_s26 }
 0x99f   : > { %p4889_p10 = pnand %p4888_p9, %p4512_p8 }
 0x9a0   : > { %p4896_p0 = por %p4895_p13, %p4894_p12 }
 0x9a1   : > { %p4890_p11 = pneg %p4889_p10 }
 0x9a3   : > { %p4897_p1 = pnand %p4896_p0, %p4890_p11 }
 0x9a5   : > { %4900 = shalt.err (!%p4897_p1)
}
 0x9a6   : > { %s4901_s11 = scalar_lea.hbm %s6355_s16, 16 }
 0x9a7   : > { %p4902_p2 = scmp.ne.s32.totalorder %s6355_s16, %s4901_s11  ;;  %p4907_p5 = scmp.lt.u32.totalorder %s4901_s11, %s6355_s16 }
 0x9a9   : > { %p4903_p3 = pnand %p4902_p2, %p4512_p8 }
 0x9ab   : > { %p4904_p4 = pneg %p4903_p3 }
 0x9ad   : > { %p4909_p6 = pnand %p4907_p5, %p4904_p4 }
 0x9af   : > { %4912 = shalt.err (!%p4909_p6)
}
 0x9b0   : > { %4509 = dma.vmem_to_hbm [thread:$0]  (%p4512_p8), %s3962_s22, 16, %s6355_s16, [#allocation9]  }
 0x9b1   : > { %4918 = dma.done.wait (%p4512_p8), [#allocation9], 16  }
 0x9b2   : > { %4920 = vsyncadd (%p4512_p8), [#allocation9], 4294967280 }
 0x9b3 PF: > { %s29_s24 = sadd.s32 1, %s4923_s24  }
 0x9b4   : > { %p26_p7 = scmp.ge.s32.totalorder %s29_s24, 6  }
 0x9b6   :  { %28 = sbr.rel (!%p26_p7) target bundleno = 8 (0x8), region = 135 }
 0x9bd   :  { %3983 = vsyncpa [#allocation9], 1 }
 0x9be   :  { %3985 = vsyncpa [#allocation9 + $0x1], 1 }

</bundles_post_ra>
